<compile_context>
chip_gen: v6e
topology: v6e:2x2x1
jax: 0.10.0
libtpu: 0.0.40
codegen_flags: <defaults>
</compile_context>

<pallas_src>
import jax
import jax.numpy as jnp
from jax.experimental import pallas as pl
from jax.experimental.pallas import tpu as pltpu

EPS = 1e-8


# --------------------------------------------------------------------------
# kernels
# --------------------------------------------------------------------------
def _layernorm_tile(y, gamma, beta):
    """PyTorch-module LayerNorm: unbiased std (/(d-1)), eps added to std.

    Two-pass (centered) variance: one extra XLU reduction, no catastrophic
    cancellation when |mean| >> std in the residual stream.
    """
    d = y.shape[-1]
    mean = jnp.sum(y, axis=-1, keepdims=True) * (1.0 / d)
    diff = y - mean
    var = jnp.sum(diff * diff, axis=-1, keepdims=True) * (1.0 / (d - 1))
    inv = pl.reciprocal(jnp.sqrt(var) + EPS, approx=True)        # EUP slot
    return gamma * diff * inv + beta


def ffn_kernel_resident(x_ref, w1_ref, b1_ref, w2_ref, b2_ref,
                        gamma_ref, beta_ref, o_ref):
    """Whole W1/W2 resident in VMEM; one grid axis over rows."""
    # conv1 (1x1) == x @ W1 + b1, ReLU          (bm, D) @ (D, H) -> (bm, H)
    x_bf = x_ref[...].astype(jnp.bfloat16)       # only bf16 copy stays live
    h = jnp.dot(x_bf, w1_ref[...], preferred_element_type=jnp.float32)
    h = jnp.maximum(h + b1_ref[...], 0.0)
    # conv2 (1x1) == h @ W2 + b2                (bm, H) @ (H, D) -> (bm, D)
    y = jnp.dot(h.astype(jnp.bfloat16), w2_ref[...],
                preferred_element_type=jnp.float32)
    # residual: re-read x from the VMEM input buffer (short live range)
    y = y + b2_ref[...] + x_ref[...].astype(jnp.float32)
    o_ref[...] = _layernorm_tile(y, gamma_ref[...], beta_ref[...]).astype(o_ref.dtype)


def ffn_kernel_tiled(x_ref, w1_ref, b1_ref, w2_ref, b2_ref,
                     gamma_ref, beta_ref, o_ref, acc_ref):
    """Hidden dim tiled: grid = (rows, H/bh), 'arbitrary' reduction axis last.

    Per k step: h_k = relu(x @ W1[:, k] + b1[k]); acc += h_k @ W2[k, :].
    Finalize (bias2 + residual + LayerNorm) on the last k step.
    """
    k = pl.program_id(1)

    @pl.when(k == 0)
    def _():
        acc_ref[...] = jnp.zeros_like(acc_ref)

    x_bf = x_ref[...].astype(jnp.bfloat16)
    h = jnp.dot(x_bf, w1_ref[...], preferred_element_type=jnp.float32)
    h = jnp.maximum(h + b1_ref[...], 0.0)
    acc_ref[...] += jnp.dot(h.astype(jnp.bfloat16), w2_ref[...],
                            preferred_element_type=jnp.float32)

    @pl.when(k == pl.num_programs(1) - 1)
    def _():
        y = acc_ref[...] + b2_ref[...] + x_ref[...].astype(jnp.float32)
        o_ref[...] = _layernorm_tile(y, gamma_ref[...], beta_ref[...]).astype(o_ref.dtype)


# --------------------------------------------------------------------------
# wrapper
# --------------------------------------------------------------------------
def _vmem_budget_bytes():
    """Per-generation VMEM budget: physical capacity minus 16 MiB headroom
    for Mosaic internal scratch / spill buffers (~48 MiB v7x, ~112 MiB v5e/v6e)."""
    cap = 64 << 20
    try:
        cap = int(pltpu.get_tpu_info().vmem_capacity_bytes)
    except Exception:
        pass
    return max(cap - (16 << 20), 16 << 20)


def _largest_divisor_tile(n, upper, mult):
    """Largest t <= upper with t % mult == 0 and n % t == 0 (n % mult == 0 assumed)."""
    t = min(upper, n)
    t -= t % mult
    while t > mult and n % t != 0:
        t -= mult
    return max(t, mult)


def feed_forward(x, w1, b1, w2, b2, gamma, beta, *,
                 block_rows=512, block_hidden=512,
                 out_dtype=None, input_buffers=2,
                 force_weight_tiling=False):
    """x: (B, T, D), w1: (D, H), w2: (H, D). Returns (B, T, D) in out_dtype
    (defaults to x.dtype). Eval-mode FeedForward (dropout == identity)."""
    B, T, D = x.shape
    H = w1.shape[1]
    N = B * T
    out_dtype = out_dtype or x.dtype

    # Lane-dense output / MXU-friendly contraction dims.
    assert D % 128 == 0, "D must be a multiple of 128 (lane-dense stores / MXU)"
    assert H % 128 == 0, "H must be a multiple of 128 (MXU-friendly hidden dim)"
    assert N % 8 == 0, "B*T must be a multiple of 8 (sublane constraint)"

    budget = _vmem_budget_bytes()
    xbytes = jnp.dtype(x.dtype).itemsize
    obytes = jnp.dtype(out_dtype).itemsize

    x2d = x.reshape(N, D)
    w1_bf = w1.astype(jnp.bfloat16)
    w2_bf = w2.astype(jnp.bfloat16)
    b1r = b1.reshape(1, H).astype(jnp.float32)
    b2r = b2.reshape(1, D).astype(jnp.float32)
    gammar = gamma.reshape(1, D).astype(jnp.float32)
    betar = beta.reshape(1, D).astype(jnp.float32)

    # Grid-invariant operands resident whole in VMEM (no double buffering).
    resident = pl.BlockSpec(memory_space=pltpu.MemorySpace.VMEM)

    resident_weight_bytes = 2 * D * H * 2          # bf16 W1 + W2, single copy
    use_tiled = force_weight_tiling or (resident_weight_bytes > 0.7 * budget)

    cost = pl.CostEstimate(
        flops=4 * N * D * H,                       # two matmuls
        transcendentals=2 * N,                     # sqrt + reciprocal per row
        bytes_accessed=N * D * (xbytes + obytes) + resident_weight_bytes
        + (H + 3 * D) * 4,
    )

    def _x_spec(bm, extra_grid_args):
        if extra_grid_args:
            idx = lambda i, k: (i, 0)
        else:
            idx = lambda i: (i, 0)
        # Sweepable deeper input pipelining (review: try Buffered(3) where
        # VMEM headroom remains); only on the streaming-x (resident) path.
        if input_buffers and input_buffers > 2 and not extra_grid_args:
            try:
                return pl.BlockSpec((bm, D), idx,
                                    pipeline_mode=pl.Buffered(input_buffers))
            except (TypeError, AttributeError):
                pass
        return pl.BlockSpec((bm, D), idx)

    if not use_tiled:
        # ------------------------ resident-weights path ------------------------
        bm = _largest_divisor_tile(N, block_rows, 8)

        def need(bm_):
            tiles = 2 * bm_ * D * xbytes + 2 * bm_ * D * obytes   # x/out dbl-buffered
            interm = bm_ * H * 4 + bm_ * H * 2 + bm_ * D * 4 + bm_ * D * 2
            small = (H + 3 * D) * 4
            return tiles + resident_weight_bytes + small + interm

        while bm > 8 and need(bm) > budget:
            bm = _largest_divisor_tile(N, bm - 8, 8)

        grid = (N // bm,)
        out2d = pl.pallas_call(
            ffn_kernel_resident,
            out_shape=jax.ShapeDtypeStruct((N, D), out_dtype),
            grid_spec=pltpu.PrefetchScalarGridSpec(
                num_scalar_prefetch=0,
                grid=grid,
                in_specs=[
                    _x_spec(bm, extra_grid_args=False),   # x row tile (streamed)
                    resident,                             # W1 (bf16)
                    resident,                             # b1
                    resident,                             # W2 (bf16)
                    resident,                             # b2
                    resident,                             # gamma
                    resident,                             # beta
                ],
                out_specs=pl.BlockSpec((bm, D), lambda i: (i, 0)),
            ),
            compiler_params=pltpu.CompilerParams(
                dimension_semantics=("parallel",),
                vmem_limit_bytes=int(budget),
            ),
            cost_estimate=cost,
        )(x2d, w1_bf, b1r, w2_bf, b2r, gammar, betar)
    else:
        # ------------------------- H-tiled fallback path ------------------------
        bm = _largest_divisor_tile(N, block_rows, 8)
        bh = _largest_divisor_tile(H, block_hidden, 128)

        def need(bm_, bh_):
            tiles = 2 * bm_ * D * xbytes + 2 * bm_ * D * obytes
            wts = 2 * (2 * D * bh_) * 2 + 2 * bh_ * 4             # W1/W2/b1 blocks, dbl-buffered
            acc = bm_ * D * 4
            interm = bm_ * bh_ * 4 + bm_ * bh_ * 2 + bm_ * D * 4
            small = 3 * D * 4
            return tiles + wts + acc + interm + small

        while bm > 8 and need(bm, bh) > budget:
            bm = _largest_divisor_tile(N, bm - 8, 8)
        while bh > 128 and need(bm, bh) > budget:
            bh = _largest_divisor_tile(H, bh - 128, 128)

        grid = (N // bm, H // bh)                 # reduction axis last
        out2d = pl.pallas_call(
            ffn_kernel_tiled,
            out_shape=jax.ShapeDtypeStruct((N, D), out_dtype),
            grid_spec=pltpu.PrefetchScalarGridSpec(
                num_scalar_prefetch=0,
                grid=grid,
                in_specs=[
                    _x_spec(bm, extra_grid_args=True),            # x row tile (revisited)
                    pl.BlockSpec((D, bh), lambda i, k: (0, k)),   # W1 column tile
                    pl.BlockSpec((1, bh), lambda i, k: (0, k)),   # b1 tile
                    pl.BlockSpec((bh, D), lambda i, k: (k, 0)),   # W2 row tile
                    resident,                                     # b2
                    resident,                                     # gamma
                    resident,                                     # beta
                ],
                out_specs=pl.BlockSpec((bm, D), lambda i, k: (i, 0)),
                scratch_shapes=[pltpu.VMEM((bm, D), jnp.float32)],
            ),
            compiler_params=pltpu.CompilerParams(
                dimension_semantics=("parallel", "arbitrary"),
                vmem_limit_bytes=int(budget),
            ),
            cost_estimate=cost,
        )(x2d, w1_bf, b1r, w2_bf, b2r, gammar, betar)

    return out2d.reshape(B, T, D)


# --------------------------------------------------------------------------
# references
# --------------------------------------------------------------------------
def _layernorm_pt(y, gamma, beta):
    d = y.shape[-1]
    mean = jnp.mean(y, axis=-1, keepdims=True)
    std = jnp.sqrt(jnp.sum((y - mean) ** 2, axis=-1, keepdims=True) / (d - 1))
    return gamma * (y - mean) / (std + EPS) + beta


def reference_f32(x, w1, b1, w2, b2, gamma, beta):
    """Pure f32 module semantics (matches the PyTorch forward, eval mode)."""
    h = jnp.maximum(jnp.einsum("btd,dh->bth", x, w1) + b1, 0.0)
    y = jnp.einsum("bth,hd->btd", h, w2) + b2 + x
    return _layernorm_pt(y, gamma, beta)


def reference_bf16(x, w1, b1, w2, b2, gamma, beta):
    """Same math, matmul inputs in bf16 with f32 accumulation (kernel-like)."""
    bf = jnp.bfloat16
    h = jnp.einsum("btd,dh->bth", x.astype(bf), w1.astype(bf),
                   preferred_element_type=jnp.float32) + b1
    h = jnp.maximum(h, 0.0)
    y = jnp.einsum("bth,hd->btd", h.astype(bf), w2.astype(bf),
                   preferred_element_type=jnp.float32) + b2 + x
    return _layernorm_pt(y, gamma, beta)


if __name__ == "__main__":
    # Small shapes consistent with the module: in_units = num_units[1] = 128
    # (residual requires equality), hidden num_units[0] = 256.
    # N = B*T = 2048 -> 4 row-grid steps of 512 rows (even count for megacore).
    B, T, D, H = 8, 256, 128, 256

    key = jax.random.PRNGKey(0)
    kx, kw1, kb1, kw2, kb2 = jax.random.split(key, 5)

    x = jax.random.normal(kx, (B, T, D), dtype=jnp.float32)

    # Conv1d weights in PyTorch are (out_ch, in_ch, 1); fold to matmul form
    # W (in, out) so that out = x @ W + b.
    w1 = jax.random.normal(kw1, (D, H), dtype=jnp.float32) * (1.0 / jnp.sqrt(D))
    b1 = jax.random.normal(kb1, (H,), dtype=jnp.float32) * 0.01
    w2 = jax.random.normal(kw2, (H, D), dtype=jnp.float32) * (1.0 / jnp.sqrt(H))
    b2 = jax.random.normal(kb2, (D,), dtype=jnp.float32) * 0.01
    gamma = jnp.ones((D,), dtype=jnp.float32)
    beta = jnp.zeros((D,), dtype=jnp.float32)

    ref_bf = reference_bf16(x, w1, b1, w2, b2, gamma, beta)
    ref32 = reference_f32(x, w1, b1, w2, b2, gamma, beta)

    # Main (resident-weights) path.
    out = feed_forward(x, w1, b1, w2, b2, gamma, beta)
    out = jax.block_until_ready(out)
    assert out.shape == (B, T, D)

    # Tight check vs a bf16-matmul-consistent reference (remaining differences:
    # MXU accumulation order + approx EUP reciprocal in the LayerNorm).
    assert jnp.allclose(out, ref_bf, atol=1e-2, rtol=1e-2), "mismatch vs bf16 reference"
    # Looser check vs exact f32 PyTorch-module semantics (bf16 matmul inputs
    # introduce ~1e-2-level deviations by construction).
    assert jnp.allclose(out, ref32, atol=3e-2, rtol=3e-2), "mismatch vs f32 reference"

    # Exercise the H-tiled fallback path (auto-selected when resident bf16
    # weights would exceed ~70% of the per-generation VMEM budget, e.g. large
    # FFN dims on v7x's 64 MiB VMEM). Forced here to validate correctness.
    out_t = feed_forward(x, w1, b1, w2, b2, gamma, beta,
                         force_weight_tiling=True, block_hidden=128)
    out_t = jax.block_until_ready(out_t)
    assert out_t.shape == (B, T, D)
    assert jnp.allclose(out_t, ref_bf, atol=1e-2, rtol=1e-2), "tiled path mismatch"

    print("KERNEL_OK")
</pallas_src>

<mosaic_0001>
module attributes {stable_mosaic.version = 11 : i64} {
  func.func @ffn_kernel_resident(%arg0: i32, %arg1: memref<512x128xf32, #tpu.memory_space<vmem>>, %arg2: memref<128x256xbf16, #tpu.memory_space<vmem>>, %arg3: memref<1x256xf32, #tpu.memory_space<vmem>>, %arg4: memref<256x128xbf16, #tpu.memory_space<vmem>>, %arg5: memref<1x128xf32, #tpu.memory_space<vmem>>, %arg6: memref<1x128xf32, #tpu.memory_space<vmem>>, %arg7: memref<1x128xf32, #tpu.memory_space<vmem>>, %arg8: memref<512x128xf32, #tpu.memory_space<vmem>>) attributes {dimension_semantics = [#tpu.dimension_semantics<parallel>], iteration_bounds = array<i64: 4>, scalar_prefetch = 0 : i64, scratch_operands = 0 : i64, tpu.core_type = #tpu.core_type<tc>, window_params = [{transform_indices = @transform_0, window_bounds = array<i64: 512, 128>}, {pipeline_mode = #tpu.pipeline_mode<synchronous>, transform_indices = @transform_1, window_bounds = array<i64: 128, 256>}, {pipeline_mode = #tpu.pipeline_mode<synchronous>, transform_indices = @transform_2, window_bounds = array<i64: 1, 256>}, {pipeline_mode = #tpu.pipeline_mode<synchronous>, transform_indices = @transform_3, window_bounds = array<i64: 256, 128>}, {pipeline_mode = #tpu.pipeline_mode<synchronous>, transform_indices = @transform_4, window_bounds = array<i64: 1, 128>}, {pipeline_mode = #tpu.pipeline_mode<synchronous>, transform_indices = @transform_5, window_bounds = array<i64: 1, 128>}, {pipeline_mode = #tpu.pipeline_mode<synchronous>, transform_indices = @transform_6, window_bounds = array<i64: 1, 128>}, {transform_indices = @transform_7, window_bounds = array<i64: 512, 128>}]} {
    %c0 = arith.constant 0 : index
    %c0_0 = arith.constant 0 : index
    %0 = vector.load %arg1[%c0, %c0_0] : memref<512x128xf32, #tpu.memory_space<vmem>>, vector<512x128xf32>
    %1 = arith.truncf %0 : vector<512x128xf32> to vector<512x128xbf16>
    %c0_1 = arith.constant 0 : index
    %c0_2 = arith.constant 0 : index
    %2 = vector.load %arg2[%c0_1, %c0_2] : memref<128x256xbf16, #tpu.memory_space<vmem>>, vector<128x256xbf16>
    %cst = arith.constant dense<0.000000e+00> : vector<512x256xf32>
    %3 = tpu.matmul %1, %2, %cst {dimension_numbers = #tpu.dot_dimension_numbers<[1], [0], [0], [1], [0, 0, 1, 1], [], []>} : vector<512x128xbf16>, vector<128x256xbf16>, vector<512x256xf32> -> vector<512x256xf32>
    %c0_3 = arith.constant 0 : index
    %c0_4 = arith.constant 0 : index
    %4 = vector.load %arg3[%c0_3, %c0_4] : memref<1x256xf32, #tpu.memory_space<vmem>>, vector<1x256xf32>
    %5 = vector.broadcast %4 : vector<1x256xf32> to vector<512x256xf32>
    %6 = arith.addf %3, %5 : vector<512x256xf32>
    %cst_5 = arith.constant 0.000000e+00 : f32
    %7 = vector.broadcast %cst_5 : f32 to vector<512x256xf32>
    %8 = arith.maximumf %6, %7 : vector<512x256xf32>
    %9 = arith.truncf %8 : vector<512x256xf32> to vector<512x256xbf16>
    %c0_6 = arith.constant 0 : index
    %c0_7 = arith.constant 0 : index
    %10 = vector.load %arg4[%c0_6, %c0_7] : memref<256x128xbf16, #tpu.memory_space<vmem>>, vector<256x128xbf16>
    %cst_8 = arith.constant dense<0.000000e+00> : vector<512x128xf32>
    %11 = tpu.matmul %9, %10, %cst_8 {dimension_numbers = #tpu.dot_dimension_numbers<[1], [0], [0], [1], [0, 0, 1, 1], [], []>} : vector<512x256xbf16>, vector<256x128xbf16>, vector<512x128xf32> -> vector<512x128xf32>
    %c0_9 = arith.constant 0 : index
    %c0_10 = arith.constant 0 : index
    %12 = vector.load %arg5[%c0_9, %c0_10] : memref<1x128xf32, #tpu.memory_space<vmem>>, vector<1x128xf32>
    %13 = vector.broadcast %12 : vector<1x128xf32> to vector<512x128xf32>
    %14 = arith.addf %11, %13 : vector<512x128xf32>
    %c0_11 = arith.constant 0 : index
    %c0_12 = arith.constant 0 : index
    %15 = vector.load %arg1[%c0_11, %c0_12] : memref<512x128xf32, #tpu.memory_space<vmem>>, vector<512x128xf32>
    %16 = arith.addf %14, %15 : vector<512x128xf32>
    %c0_13 = arith.constant 0 : index
    %c0_14 = arith.constant 0 : index
    %17 = vector.load %arg6[%c0_13, %c0_14] : memref<1x128xf32, #tpu.memory_space<vmem>>, vector<1x128xf32>
    %c0_15 = arith.constant 0 : index
    %c0_16 = arith.constant 0 : index
    %18 = vector.load %arg7[%c0_15, %c0_16] : memref<1x128xf32, #tpu.memory_space<vmem>>, vector<1x128xf32>
    %cst_17 = arith.constant dense<0.000000e+00> : vector<512xf32>
    %19 = vector.multi_reduction <add>, %16, %cst_17 [1] : vector<512x128xf32> to vector<512xf32>
    %20 = vector.shape_cast %19 : vector<512xf32> to vector<512x1xf32>
    %cst_18 = arith.constant 7.812500e-03 : f32
    %21 = vector.broadcast %cst_18 : f32 to vector<512x1xf32>
    %22 = arith.mulf %20, %21 : vector<512x1xf32>
    %23 = vector.broadcast %22 : vector<512x1xf32> to vector<512x128xf32>
    %24 = arith.subf %16, %23 : vector<512x128xf32>
    %25 = arith.mulf %24, %24 : vector<512x128xf32>
    %cst_19 = arith.constant dense<0.000000e+00> : vector<512xf32>
    %26 = vector.multi_reduction <add>, %25, %cst_19 [1] : vector<512x128xf32> to vector<512xf32>
    %27 = vector.shape_cast %26 : vector<512xf32> to vector<512x1xf32>
    %cst_20 = arith.constant 0.00787401571 : f32
    %28 = vector.broadcast %cst_20 : f32 to vector<512x1xf32>
    %29 = arith.mulf %27, %28 : vector<512x1xf32>
    %30 = math.sqrt %29 : vector<512x1xf32>
    %cst_21 = arith.constant 9.99999993E-9 : f32
    %31 = vector.broadcast %cst_21 : f32 to vector<512x1xf32>
    %32 = arith.addf %30, %31 : vector<512x1xf32>
    %33 = tpu.reciprocal %32 {approx = true} : vector<512x1xf32> -> vector<512x1xf32>
    %34 = vector.broadcast %17 : vector<1x128xf32> to vector<512x128xf32>
    %35 = arith.mulf %34, %24 : vector<512x128xf32>
    %36 = vector.broadcast %33 : vector<512x1xf32> to vector<512x128xf32>
    %37 = arith.mulf %35, %36 : vector<512x128xf32>
    %38 = vector.broadcast %18 : vector<1x128xf32> to vector<512x128xf32>
    %39 = arith.addf %37, %38 : vector<512x128xf32>
    %c0_22 = arith.constant 0 : index
    %c0_23 = arith.constant 0 : index
    %40 = vector.load %arg8[%c0_22, %c0_23] : memref<512x128xf32, #tpu.memory_space<vmem>>, vector<512x128xf32>
    tpu.vector_store %arg8[%c0_22, %c0_23], %39 {strides = array<i32>} : memref<512x128xf32, #tpu.memory_space<vmem>>, vector<512x128xf32>,
    return
  }
  func.func @transform_0(%arg0: i32) -> (i32, i32) {
    %c0_i32 = arith.constant 0 : i32
    %c0_i32_0 = arith.constant 0 : i32
    return %arg0, %c0_i32 : i32, i32
  }
  func.func @transform_1(%arg0: i32) -> (i32, i32) {
    %c0_i32 = arith.constant 0 : i32
    %c0_i32_0 = arith.constant 0 : i32
    %c0_i32_1 = arith.constant 0 : i32
    return %c0_i32, %c0_i32_0 : i32, i32
  }
  func.func @transform_2(%arg0: i32) -> (i32, i32) {
    %c0_i32 = arith.constant 0 : i32
    %c0_i32_0 = arith.constant 0 : i32
    %c0_i32_1 = arith.constant 0 : i32
    return %c0_i32, %c0_i32_0 : i32, i32
  }
  func.func @transform_3(%arg0: i32) -> (i32, i32) {
    %c0_i32 = arith.constant 0 : i32
    %c0_i32_0 = arith.constant 0 : i32
    %c0_i32_1 = arith.constant 0 : i32
    return %c0_i32, %c0_i32_0 : i32, i32
  }
  func.func @transform_4(%arg0: i32) -> (i32, i32) {
    %c0_i32 = arith.constant 0 : i32
    %c0_i32_0 = arith.constant 0 : i32
    %c0_i32_1 = arith.constant 0 : i32
    return %c0_i32, %c0_i32_0 : i32, i32
  }
  func.func @transform_5(%arg0: i32) -> (i32, i32) {
    %c0_i32 = arith.constant 0 : i32
    %c0_i32_0 = arith.constant 0 : i32
    %c0_i32_1 = arith.constant 0 : i32
    return %c0_i32, %c0_i32_0 : i32, i32
  }
  func.func @transform_6(%arg0: i32) -> (i32, i32) {
    %c0_i32 = arith.constant 0 : i32
    %c0_i32_0 = arith.constant 0 : i32
    %c0_i32_1 = arith.constant 0 : i32
    return %c0_i32, %c0_i32_0 : i32, i32
  }
  func.func @transform_7(%arg0: i32) -> (i32, i32) {
    %c0_i32 = arith.constant 0 : i32
    %c0_i32_0 = arith.constant 0 : i32
    return %arg0, %c0_i32 : i32, i32
  }
}

</mosaic_0001>

<bundles_post_ra>
// kernel: tpu_custom_call.1
= control target key start
LH: loop header
LB: loop body
LE: loop exit
PB: predicated region body
PF: predicated region fallthrough
CT: control target
= control target key end

     0   :  { %s5747_s0 = inlined_call_operand.hbm [shape: f32[2048,128], index: 0, kind: input, shape index: {}]   ;;  %s5748_s1 = inlined_call_operand.hbm [shape: bf16[128,256], index: 1, kind: input, shape index: {}]   ;;  %s5749_s2 = inlined_call_operand.vmem [shape: f32[1,256], index: 2, kind: input, shape index: {}]   ;;  %s5750_s3 = inlined_call_operand.hbm [shape: bf16[256,128], index: 3, kind: input, shape index: {}]   ;;  %s5751_s4 = inlined_call_operand.vmem [shape: f32[1,128], index: 4, kind: input, shape index: {}]   ;;  %s5752_s5 = inlined_call_operand.vmem [shape: f32[1,128], index: 5, kind: input, shape index: {}]   ;;  %s5753_s6 = inlined_call_operand.vmem [shape: f32[1,128], index: 6, kind: input, shape index: {}]   ;;  %s5754_s7 = inlined_call_operand.hbm [shape: f32[2048,128], index: 7, kind: output, shape index: {}]  }
   0x1   :  { %5790 = sst [smem:[#allocation39_spill]] %s5748_s1 }
   0x2   :  { %12 = vsyncpa [#allocation3], 0 }
   0x3   :  { %14 = vsyncpa [#allocation3 + $0x1], 0 }
   0x4   :  { %15 = vsyncpa [#allocation6], 0 }
   0x5   :  { %16 = vsyncpa [#allocation4], 0 }
   0x6   :  { %18 = vsyncpa [#allocation4 + $0x1], 0  ;;  %s3756_s24 = smov 0   ;;  %s3758_s25 = smov 0  }
   0x7   :  { %s3760_s26 = smov 0   ;;  %s3762_s27 = smov 0  }
   0x8 LB: > { %s3777_s28 = sadd.s32 4294967295, %s3703_s27   ;;  %s3030_s29 = sadd.s32 4294967294, %s3703_s27   ;;  %s3703_s27 = sphi %s3762_s27, %s5867_s27   ;;  %s3699_s26 = sphi %s3760_s26, %s5866_s26   ;;  %s3695_s25 = sphi %s3758_s25, %s5865_s25   ;;  %s3691_s24 = sphi %s3756_s24, %s5864_s24  }
   0x9   : > { %p44_p0 = scmp.ne.s32.totalorder %s3695_s25, %s3691_s24  ;;  %p5756_p1 = scmp.eq.s32.totalorder %s3777_s28, 0 }
   0xa   : > { %p194_p2 = scmp.eq.s32.totalorder %s3777_s28, 3  ;;  %p200_p3 = scmp.eq.s32.totalorder %s3030_s29, 3 }
   0xb   : > { %p3786_p4 = por %p5756_p1, %p44_p0  ;;  %p3031_p5 = scmp.ge.s32.totalorder %s3703_s27, 1 }
   0xc   : > { %p3791_p6 = por %p200_p3, %p44_p0  ;;  %p207_p7 = scmp.lt.s32.totalorder %s3703_s27, 5 }
   0xd   : > { %s5791_s30 = scalar_select %p3786_p4, 1, 0 }
   0xe   : > { %s5792_s8 = scalar_select %p3791_p6, 1, 0 }
   0xf   : > { %p3796_p8 = pnand %p3031_p5, %p207_p7  ;;  %s3705_s10 = smov [#allocation5]  }
  0x10   : > { %s219_s11 = sshll.u32 %s3705_s10, 4  ;;  %s3706_s13 = smov [#allocation7]   ;;  %s220_s11 = int_to_ptr.vmem [resolvable:$true] %s219_s11 }
  0x11   : > { %s5793_s9 = scalar_select %p3796_p8, 1, 0 }
  0x12   : > { %p3129_p9 = pneg %p3796_p8  ;;  %s235_s14 = sshll.u32 %s3706_s13, 4  ;;  %s236_s14 = int_to_ptr.vmem [resolvable:$true] %s235_s14 }
  0x13   : > { %s3566_s15 = scalar_lea.vmem %s220_s11, 2048  ;;  %p3574_p3 = scmp.lt.s32.totalorder %s220_s11, %s220_s11 }
  0x14   : > { %p3804_p10 = pnand %p3129_p9, %p5756_p1  ;;  %p3567_p12 = scmp.ne.s32.totalorder %s220_s11, %s3566_s15 }
  0x15   : > { %p3575_p5 = scmp.lt.s32.totalorder %s3566_s15, %s3566_s15 }
  0x16   : > { %p3557_p11 = pneg %p3804_p10 }
  0x17   : > { %p3576_p7 = por %p3575_p5, %p3574_p3 }
  0x18   : > { %p3569_p13 = pnand %p3567_p12, %p3557_p11 }
  0x1a   : > { %p3570_p0 = pneg %p3569_p13 }
  0x1c   : > { %p3577_p9 = pnand %p3576_p7, %p3570_p0 }
  0x1e   : > { %3580 = shalt.err (!%p3577_p9)
}
  0x1f   : > { %s5755_s16 = smov 128   ;;  %s5757_s17 = smov 8  }
  0x20   : > { %s5795_s1 = sld [smem:[#allocation39_spill]]  ;;  %s3592_s20 = scalar_lea.vmem %s236_s14, 2048 }
  0x21   : > { %p3593_p12 = scmp.ne.s32.totalorder %s236_s14, %s3592_s20  ;;  %p3600_p0 = scmp.lt.s32.totalorder %s236_s14, %s236_s14 }
  0x22   : > { %p3601_p5 = scmp.lt.s32.totalorder %s3592_s20, %s3592_s20 }
  0x23   : > { %p3595_p13 = pnand %p3593_p12, %p3557_p11 }
  0x24   : > { %p3602_p7 = por %p3601_p5, %p3600_p0 }
  0x25   : > { %p3596_p3 = pneg %p3595_p13 }
  0x26   : > { %3132 = dma.hbm_to_vmem [thread:$0]  (!%p3804_p10), %s5795_s1, 2048, %s220_s11, [#allocation6], %s5755_s16, %s5755_s16, %s5757_s17  }
  0x27   : > { %p3603_p9 = pnand %p3602_p7, %p3596_p3 }
  0x29   : > { %3606 = shalt.err (!%p3603_p9)
}
  0x2a   : > { %s3709_s21 = smov 64   ;;  %s3710_s22 = smov 4  }
  0x2b   : > { %3135 = dma.hbm_to_vmem [thread:$0]  (!%p3804_p10), %s5750_s3, 2048, %s236_s14, [#allocation6], %s3709_s21, %s3709_s21, %s3710_s22  }
  0x2c   : > { %s3830_s10 = sadd.s32 1, %s3703_s27   ;;  %s31_s13 = sadd.s32 1, %s3699_s26 }
  0x2d   : > { %s28_s11 = ssub.s32 %s3703_s27, %s3830_s10  ;;  %p38_p12 = scmp.ne.s32.totalorder %s3699_s26, %s3695_s25 }
  0x2e   : > { %p29_p11 = scmp.eq.s32.totalorder %s28_s11, 0  ;;  %p39_p13 = scmp.eq.s32.totalorder %s3703_s27, 0 }
  0x2f   : > { %p3843_p0 = por %p194_p2, %p38_p12  ;;  %p3146_p5 = scmp.lt.s32.totalorder %s3703_s27, 4 }
  0x30   : > { %s3839_s15 = scalar_select %p29_p11, %s3699_s26, %s31_s13  }
  0x31   : > { %p40_p3 = por %p39_p13, %p38_p12  ;;  %s258_s12 = sand.u32 1, %s3699_s26  }
  0x32   : > { %s5796_s18 = scalar_select %p3843_p0, 1, 0 }
  0x33   : > { %s3035_s19 = sshll.u32 %s258_s12, 9  ;;  %s3083_s14 = sshll.u32 %s3703_s27, 13 }
  0x34   : > { %s3853_s22 = scalar_lea.hbm %s5747_s0, %s3083_s14  ;;  %s262_s23 = scalar_lea.vmem [#allocation2], %s3035_s19 }
  0x35   : > { %s269_s29 = sshll.u32 %s262_s23, 4  ;;  %p3857_p2 = pnand %p3146_p5, %p40_p3  ;;  %s3855_s29 = int_to_ptr.vmem [resolvable:$true] %s269_s29 }
  0x36   : > { %s3861_s13 = scalar_lea.sflag [#allocation3], %s258_s12  ;;  %s3607_s16 = scalar_lea.hbm %s3853_s22, 8192 }
  0x37   : > { %p3608_p10 = scmp.ne.s32.totalorder %s3853_s22, %s3607_s16  ;;  %p3609_p7 = pneg %p3857_p2 }
  0x38   : > { %s3612_s19 = scalar_lea.hbm %s5747_s0, 32768  ;;  %p3613_p12 = scmp.lt.s32.totalorder %s3853_s22, %s5747_s0 }
  0x39   : > { %p3610_p9 = pnand %p3609_p7, %p3608_p10  ;;  %p3614_p13 = scmp.lt.s32.totalorder %s3612_s19, %s3607_s16 }
  0x3b   : > { %p3611_p11 = pneg %p3610_p9  ;;  %p3615_p3 = por %p3614_p13, %p3613_p12 }
  0x3d   : > { %p3616_p5 = pnand %p3615_p3, %p3611_p11 }
  0x3f   : > { %3619 = shalt.err (!%p3616_p5)
}
  0x40   : > { %s3620_s12 = scalar_lea.vmem %s3855_s29, 8192  ;;  %s3711_s17 = smov [#allocation2]  }
  0x41   : > { %p3621_p1 = scmp.ne.s32.totalorder %s3855_s29, %s3620_s12  ;;  %s3625_s1 = sshll.u32 %s3711_s17, 4  ;;  %s3626_s1 = int_to_ptr.vmem [resolvable:$false] %s3625_s1 }
  0x42   : > { %s3627_s14 = scalar_lea.vmem %s3626_s1, 16384  ;;  %p3628_p9 = scmp.lt.s32.totalorder %s3855_s29, %s3626_s1 }
  0x43   : > { %p3623_p6 = pnand %p3621_p1, %p3609_p7  ;;  %p3629_p0 = scmp.lt.s32.totalorder %s3627_s14, %s3620_s12 }
  0x45   : > { %p3624_p10 = pneg %p3623_p6  ;;  %p3630_p4 = por %p3629_p0, %p3628_p9 }
  0x47   : > { %p3631_p8 = pnand %p3630_p4, %p3624_p10 }
  0x49   : > { %3634 = shalt.err (!%p3631_p8)
}
  0x4a   : > { %s5798_s16 = smov 8   ;;  %s5799_s20 = smov 128  }
  0x4b   : > { %3139 = dma.hbm_to_vmem [thread:$0]  (!%p3857_p2), %s3853_s22, 8192, %s3855_s29, %s3861_s13, %s5799_s20, %s5799_s20, %s5798_s16  }
  0x4c   : > { %p5800_p1 = scmp.ne.s32.totalorder %s5793_s9, 0 }
  0x4e   : > { %281 = sbr.rel (%p5800_p1) target bundleno = 1128 (0x468), region = 48 }
  0x53   : > { %s3888_s17 = sand.u32 1, %s3695_s25   ;;  %p5801_p4 = scmp.ne.s32.totalorder %s5791_s30, 0 }
  0x54   : > { %s3039_s1 = sshll.u32 %s3888_s17, 9  ;;  %s284_s19 = scalar_lea.sflag [#allocation3], %s3888_s17 }
  0x55   : > { %s3894_s11 = scalar_lea.vmem [#allocation2], %s3039_s1 }
  0x56   : > { %3678 = dma.done.wait (%p5801_p4), %s284_s19, 8192  }
  0x57   : > { %3680 = vsyncadd (%p5801_p4), %s284_s19, 4294959104  ;;  %p5802_p6 = scmp.eq.s32.totalorder %s3777_s28, 0 }
  0x59   : > { %3682 = dma.done.wait (%p5802_p6), [#allocation6], 4096   ;;  %p5803_p8 = pmov %p5802_p6 }
  0x5a   : > { %v3712_v0 = vmov 0   ;;  %v3191_v1 = vld [vmem:[#allocation5 + $0x74] ss:$8 sps:$4 sm:$0xff]   ;;  %v3193_v2 = vld [vmem:[#allocation5 + $0x70] ss:$8 sps:$4 sm:$0xff]   ;;  %v3217_v14 = vld [vmem:[#allocation7 + $0x28] sm:$0xff]  }
  0x5b   : > { %3684 = vsyncadd (%p5803_p8), [#allocation6], 4294963200  ;;  %565 = vmatprep.mubr.bf16.mxu0 %v3712_v0  ;;  %3085 = vmatprep.subr.bf16.mxu1 %v3712_v0  ;;  %v3194_v3 = vld [vmem:[#allocation5 + $0x64] ss:$8 sps:$4 sm:$0xff]   ;;  %v3196_v4 = vld [vmem:[#allocation5 + $0x60] ss:$8 sps:$4 sm:$0xff]  }
  0x5c   : > { %533 = vmatprep.subr.bf16.mxu0 %v3191_v1  ;;  %v3197_v5 = vld [vmem:[#allocation5 + $0x54] ss:$8 sps:$4 sm:$0xff]   ;;  %v3199_v6 = vld [vmem:[#allocation5 + $0x50] ss:$8 sps:$4 sm:$0xff]   ;;  %v3200_v7 = vld [vmem:[#allocation5 + $0x44] ss:$8 sps:$4 sm:$0xff]  }
  0x5d   : > { %534 = vmatpush1.bf16.msra.mxu0 %v3193_v2  ;;  %v3202_v8 = vld [vmem:[#allocation5 + $0x40] ss:$8 sps:$4 sm:$0xff]   ;;  %v3203_v9 = vld [vmem:[#allocation5 + $0x34] ss:$8 sps:$4 sm:$0xff]   ;;  %v3205_v12 = vld [vmem:[#allocation5 + $0x30] ss:$8 sps:$4 sm:$0xff]  }
  0x5e   : > { %535 = vmatprep.subr.bf16.mxu0 %v3194_v3  ;;  %v3215_v10 = vld [vmem:[#allocation7 + $0x38] sm:$0xff]   ;;  %v3216_v11 = vld [vmem:[#allocation7 + $0x30] sm:$0xff]   ;;  %v3206_v13 = vld [vmem:[#allocation5 + $0x24] ss:$8 sps:$4 sm:$0xff]   ;;  %s4872_s20 = scalar_lea.vmem [#allocation8], %s3039_s1  ;;  %s3084_s29 = sshll.u32 %s3777_s28, 13 }
  0x5f   : > { %3101 = vmatpush1.bf16.msra.mxu1 %v3215_v10  ;;  %v3208_v15 = vld [vmem:[#allocation5 + $0x20] ss:$8 sps:$4 sm:$0xff]   ;;  %v3209_v16 = vld [vmem:[#allocation5 + $0x14] ss:$8 sps:$4 sm:$0xff]   ;;  %v3211_v18 = vld [vmem:[#allocation5 + $0x10] ss:$8 sps:$4 sm:$0xff]   ;;  %s5702_s12 = scalar_lea.hbm %s5754_s7, %s3084_s29 }
  0x60   : > { %3086 = vmatprep.subr.bf16.mxu1 %v3712_v0  ;;  %v3218_v17 = vld [vmem:[#allocation7 + $0x20] sm:$0xff]   ;;  %v3219_v21 = vld [vmem:[#allocation7 + $0x18] sm:$0xff]   ;;  %v330_v23 = vld [vmem:[%s3894_s11 + $0x8] sm:$0xff]  ;;  %s2938_s13 = sshll.u32 %s4872_s20, 4  ;;  %s2925_s14 = scalar_lea.sflag [#allocation4], %s3888_s17  ;;  %s5704_s13 = int_to_ptr.vmem [resolvable:$true] %s2938_s13 }
  0x61   : > { %536 = vmatpush1.bf16.msra.mxu0 %v3196_v4  ;;  %v3212_v19 = vld [vmem:[#allocation5 + $0x4] ss:$8 sps:$4 sm:$0xff]   ;;  %v3214_v20 = vld [vmem:[#allocation5] ss:$8 sps:$4 sm:$0xff]   ;;  %v3220_v24 = vld [vmem:[#allocation7 + $0x10] sm:$0xff]   ;;  %s3635_s16 = scalar_lea.vmem %s5704_s13, 8192 }
  0x62   : > { %537 = vmatprep.subr.bf16.mxu0 %v3197_v5  ;;  %v329_v22 = vld [vmem:[%s3894_s11] sm:$0xff]  ;;  %v3221_v26 = vld [vmem:[#allocation7 + $0x8] sm:$0xff]   ;;  %v331_v27 = vld [vmem:[%s3894_s11 + $0x10] sm:$0xff]  ;;  %p3636_p0 = scmp.ne.s32.totalorder %s5704_s13, %s3635_s16  ;;  %p5862_p2 = scmp.ne.s32.totalorder %s5796_s18, 0 }
  0x63   : > { %3102 = vmatpush1.bf16.msra.mxu1 %v3216_v11  ;;  %v393_v25 = vpack.c.bf16 %v330_v23, %v329_v22  ;;  %v332_v28 = vld [vmem:[%s3894_s11 + $0x18] sm:$0xff]  ;;  %v3222_v30 = vld [vmem:[#allocation7] sm:$0xff]   ;;  %v334_v33 = vld [vmem:[%s3894_s11 + $0x28] sm:$0xff]  ;;  %s3713_s28 = smov [#allocation8]  }
  0x64   : > { %3087 = vmatprep.subr.bf16.mxu1 %v3712_v0  ;;  %v394_v29 = vpack.c.bf16 %v332_v28, %v331_v27  ;;  %v3223_v31 = vld [vmem:[#allocation7 + $0x78] sm:$0xff]   ;;  %v333_v32 = vld [vmem:[%s3894_s11 + $0x20] sm:$0xff]  ;;  %v3224_v35 = vld [vmem:[#allocation7 + $0x70] sm:$0xff]   ;;  %p3637_p7 = pnand %p3636_p0, %p5862_p2  ;;  %s3639_s1 = sshll.u32 %s3713_s28, 4  ;;  %s3640_s1 = int_to_ptr.vmem [resolvable:$false] %s3639_s1 }
  0x65   : > { %538 = vmatpush1.bf16.msra.mxu0 %v3199_v6  ;;  %v395_v34 = vpack.c.bf16 %v334_v33, %v333_v32  ;;  %v335_v36 = vld [vmem:[%s3894_s11 + $0x30] sm:$0xff]  ;;  %v336_v37 = vld [vmem:[%s3894_s11 + $0x38] sm:$0xff]  ;;  %v337_v39 = vld [vmem:[%s3894_s11 + $0x40] sm:$0xff]  ;;  %s3641_s19 = scalar_lea.vmem %s3640_s1, 16384  ;;  %p3642_p12 = scmp.lt.s32.totalorder %s5704_s13, %s3640_s1 }
  0x66   : > { %539 = vmatprep.subr.bf16.mxu0 %v3200_v7  ;;  %v396_v38 = vpack.c.bf16 %v336_v37, %v335_v36  ;;  %v338_v40 = vld [vmem:[%s3894_s11 + $0x48] sm:$0xff]  ;;  %v339_v43 = vld [vmem:[%s3894_s11 + $0x50] sm:$0xff]  ;;  %v340_v44 = vld [vmem:[%s3894_s11 + $0x58] sm:$0xff]  ;;  %p3638_p11 = pneg %p3637_p7  ;;  %p3643_p13 = scmp.lt.s32.totalorder %s3641_s19, %s3635_s16 }
  0x67   : > { %3103 = vmatpush1.bf16.msra.mxu1 %v3217_v14  ;;  %v397_v41 = vpack.c.bf16 %v338_v40, %v337_v39  ;;  %v3225_v42 = vld [vmem:[#allocation7 + $0x68] sm:$0xff]   ;;  %v398_v45 = vpack.c.bf16 %v340_v44, %v339_v43  ;;  %v341_v46 = vld [vmem:[%s3894_s11 + $0x60] sm:$0xff]  ;;  %v343_v50 = vld [vmem:[%s3894_s11 + $0x70] sm:$0xff] }
  0x68   : > { %3088 = vmatprep.subr.bf16.mxu1 %v3712_v0  ;;  %v342_v47 = vld [vmem:[%s3894_s11 + $0x68] sm:$0xff]  ;;  %v3226_v49 = vld [vmem:[#allocation7 + $0x60] sm:$0xff]   ;;  %v344_v51 = vld [vmem:[%s3894_s11 + $0x78] sm:$0xff]  ;;  %p3644_p3 = por %p3643_p13, %p3642_p12 }
  0x69   : > { %540 = vmatpush1.bf16.msra.mxu0 %v3202_v8  ;;  %v399_v48 = vpack.c.bf16 %v342_v47, %v341_v46  ;;  %v400_v52 = vpack.c.bf16 %v344_v51, %v343_v50  ;;  %v345_v53 = vld [vmem:[%s3894_s11 + $0x80] sm:$0xff]  ;;  %v346_v54 = vld [vmem:[%s3894_s11 + $0x88] sm:$0xff]  ;;  %v347_v56 = vld [vmem:[%s3894_s11 + $0x90] sm:$0xff] }
  0x6a   : > { %541 = vmatprep.subr.bf16.mxu0 %v3203_v9  ;;  %v401_v55 = vpack.c.bf16 %v346_v54, %v345_v53  ;;  %v348_v57 = vld [vmem:[%s3894_s11 + $0x98] sm:$0xff]  ;;  %v349_v59 = vld [vmem:[%s3894_s11 + $0xa0] sm:$0xff]  ;;  %v350_v60 = vld [vmem:[%s3894_s11 + $0xa8] sm:$0xff]  ;;  %p3645_p5 = pnand %p3644_p3, %p3638_p11 }
  0x6b   : > { %3104 = vmatpush1.bf16.msra.mxu1 %v3218_v17  ;;  %v402_v58 = vpack.c.bf16 %v348_v57, %v347_v56  ;;  %v3227_v61 = vld [vmem:[#allocation7 + $0x58] sm:$0xff]   ;;  %v403_v62 = vpack.c.bf16 %v350_v60, %v349_v59  ;;  %v351_v63 = vld [vmem:[%s3894_s11 + $0xb0] sm:$0xff]  ;;  %v3229_v4 = vld [vmem:[#allocation7 + $0x48] sm:$0xff]  }
  0x6c   : > { %3089 = vmatprep.subr.bf16.mxu1 %v3712_v0  ;;  %v352_v1 = vld [vmem:[%s3894_s11 + $0xb8] sm:$0xff]  ;;  %v3228_v2 = vld [vmem:[#allocation7 + $0x50] sm:$0xff]   ;;  %v353_v5 = vld [vmem:[%s3894_s11 + $0xc0] sm:$0xff] }
  0x6d   : > { %542 = vmatpush1.bf16.msra.mxu0 %v3205_v12  ;;  %v404_v3 = vpack.c.bf16 %v352_v1, %v351_v63  ;;  %v354_v6 = vld [vmem:[%s3894_s11 + $0xc8] sm:$0xff]  ;;  %v3230_v7 = vld [vmem:[#allocation7 + $0x40] sm:$0xff]   ;;  %v355_v9 = vld [vmem:[%s3894_s11 + $0xd0] sm:$0xff] }
  0x6e   : > { %543 = vmatprep.subr.bf16.mxu0 %v3206_v13  ;;  %v405_v8 = vpack.c.bf16 %v354_v6, %v353_v5  ;;  %v357_v12 = vld [vmem:[%s3894_s11 + $0xe0] sm:$0xff]  ;;  %v358_v13 = vld [vmem:[%s3894_s11 + $0xe8] sm:$0xff]  ;;  %v364_v22 = vld [vmem:[%s3894_s11 + $0x118] sm:$0xff] }
  0x6f   : > { %3105 = vmatpush1.bf16.msra.mxu1 %v3219_v21  ;;  %v367_v27 = vld [vmem:[%s3894_s11 + $0x130] sm:$0xff]  ;;  %v368_v28 = vld [vmem:[%s3894_s11 + $0x138] sm:$0xff]  ;;  %v373_v36 = vld [vmem:[%s3894_s11 + $0x160] sm:$0xff] }
  0x70   : > { %3090 = vmatprep.subr.bf16.mxu1 %v3712_v0  ;;  %v371_v33 = vld [vmem:[%s3894_s11 + $0x150] sm:$0xff]  ;;  %v374_v37 = vld [vmem:[%s3894_s11 + $0x168] sm:$0xff]  ;;  %v376_v40 = vld [vmem:[%s3894_s11 + $0x178] sm:$0xff] }
  0x71   : > { %544 = vmatpush1.bf16.msra.mxu0 %v3208_v15  ;;  %v359_v15 = vld [vmem:[%s3894_s11 + $0xf0] sm:$0xff]  ;;  %v378_v43 = vld [vmem:[%s3894_s11 + $0x188] sm:$0xff]  ;;  %v380_v47 = vld [vmem:[%s3894_s11 + $0x198] sm:$0xff] }
  0x72   : > { %545 = vmatprep.subr.bf16.mxu0 %v3209_v16  ;;  %v360_v16 = vld [vmem:[%s3894_s11 + $0xf8] sm:$0xff]  ;;  %v375_v39 = vld [vmem:[%s3894_s11 + $0x170] sm:$0xff]  ;;  %v381_v54 = vld [vmem:[%s3894_s11 + $0x1a0] sm:$0xff] }
  0x73   : > { %3106 = vmatpush1.bf16.msra.mxu1 %v3220_v24  ;;  %v379_v46 = vld [vmem:[%s3894_s11 + $0x190] sm:$0xff]  ;;  %v441_v63 = vld [vmem:[%s5749_s2] sm:$0x3] }
  0x74   : > { %3091 = vmatprep.subr.bf16.mxu1 %v3712_v0  ;;  %v418_v50 = vpack.c.bf16 %v380_v47, %v379_v46 }
  0x75   : > { %546 = vmatpush1.bf16.msra.mxu0 %v3211_v18  ;;  %v361_v18 = vld [vmem:[%s3894_s11 + $0x100] sm:$0xff] }
  0x76   : > { %547 = vmatprep.subr.bf16.mxu0 %v3212_v19  ;;  %v362_v19 = vld [vmem:[%s3894_s11 + $0x108] sm:$0xff] }
  0x77   : > { %3107 = vmatpush1.bf16.msra.mxu1 %v3221_v26 }
  0x78   : > { %3092 = vmatprep.subr.bf16.mxu1 %v3712_v0 }
  0x79   : > { %548 = vmatpush1.bf16.msra.mxu0 %v3214_v20  ;;  %v409_v20 = vpack.c.bf16 %v362_v19, %v361_v18  ;;  %v385_v18 = vld [vmem:[%s3894_s11 + $0x1c0] sm:$0xff]  ;;  %v386_v19 = vld [vmem:[%s3894_s11 + $0x1c8] sm:$0xff] }
  0x7a   : > { %1213 = vmatprep.subr.bf16.mxu0 %v3712_v0 }
  0x7b   : > { %3108 = vmatpush1.bf16.msra.mxu1 %v3222_v30 }
  0x7c   : > { %566 = vmatmul.mubr.bf16.vlgmr.msra.gmra.mxu0 %v393_v25  ;;  %3093 = vmatprep.subr.bf16.mxu1 %v3712_v0  ;;  %v366_v25 = vld [vmem:[%s3894_s11 + $0x128] sm:$0xff] }
  0x7d   : > { %1214 = vmatpush1.bf16.msra.mxu0 %v3215_v10  ;;  %575 = vmatprep.mubr.bf16.mxu0 %v3712_v0  ;;  %v356_v10 = vld [vmem:[%s3894_s11 + $0xd8] sm:$0xff] }
  0x7e   : > { %1215 = vmatprep.subr.bf16.mxu0 %v3712_v0 }
  0x7f   : > { %3109 = vmatpush2.bf16.msra.mxu1 %v3223_v31 }
  0x80   : > { %3094 = vmatprep.subr.bf16.mxu1 %v3712_v0 }
  0x81   : > { %1216 = vmatpush1.bf16.msra.mxu0 %v3216_v11  ;;  %v406_v11 = vpack.c.bf16 %v356_v10, %v355_v9 }
  0x82   : > { %1217 = vmatprep.subr.bf16.mxu0 %v3712_v0 }
  0x83   : > { %3110 = vmatpush2.bf16.msra.mxu1 %v3224_v35 }
  0x84   : > { %576 = vmatmul.mubr.bf16.gmra.mxu0 %v394_v29  ;;  %3095 = vmatprep.subr.bf16.mxu1 %v3712_v0  ;;  %v412_v29 = vpack.c.bf16 %v368_v28, %v367_v27 }
  0x85   : > { %585 = vmatprep.mubr.bf16.mxu0 %v3712_v0  ;;  %1218 = vmatpush1.bf16.msra.mxu0 %v3217_v14  ;;  %v407_v14 = vpack.c.bf16 %v358_v13, %v357_v12 }
  0x86   : > { %1219 = vmatprep.subr.bf16.mxu0 %v3712_v0 }
  0x87   : > { %3111 = vmatpush2.bf16.msra.mxu1 %v3225_v42 }
  0x88   : > { %3096 = vmatprep.subr.bf16.mxu1 %v3712_v0 }
  0x89   : > { %1220 = vmatpush1.bf16.msra.mxu0 %v3218_v17  ;;  %v408_v17 = vpack.c.bf16 %v360_v16, %v359_v15 }
  0x8a   : > { %1221 = vmatprep.subr.bf16.mxu0 %v3712_v0 }
  0x8b   : > { %3112 = vmatpush2.bf16.msra.mxu1 %v3226_v49 }
  0x8c   : > { %586 = vmatmul.mubr.bf16.gmra.mxu0 %v395_v34  ;;  %3097 = vmatprep.subr.bf16.mxu1 %v3712_v0  ;;  %v372_v34 = vld [vmem:[%s3894_s11 + $0x158] sm:$0xff] }
  0x8d   : > { %595 = vmatprep.mubr.bf16.mxu0 %v3712_v0  ;;  %1222 = vmatpush1.bf16.msra.mxu0 %v3219_v21  ;;  %v363_v21 = vld [vmem:[%s3894_s11 + $0x110] sm:$0xff] }
  0x8e   : > { %1223 = vmatprep.subr.bf16.mxu0 %v3712_v0  ;;  %v410_v23 = vpack.c.bf16 %v364_v22, %v363_v21 }
  0x8f   : > { %3113 = vmatpush2.bf16.msra.mxu1 %v3227_v61 }
  0x90   : > { %3098 = vmatprep.subr.bf16.mxu1 %v3712_v0 }
  0x91   : > { %1224 = vmatpush1.bf16.msra.mxu0 %v3220_v24  ;;  %v365_v24 = vld [vmem:[%s3894_s11 + $0x120] sm:$0xff] }
  0x92   : > { %1225 = vmatprep.subr.bf16.mxu0 %v3712_v0 }
  0x93   : > { %3114 = vmatpush2.bf16.msra.mxu1 %v3228_v2 }
  0x94   : > { %596 = vmatmul.mubr.bf16.gmra.mxu0 %v396_v38  ;;  %3099 = vmatprep.subr.bf16.mxu1 %v3712_v0  ;;  %v415_v38 = vpack.c.bf16 %v374_v37, %v373_v36  ;;  %v388_v36 = vld [vmem:[%s3894_s11 + $0x1d8] sm:$0xff] }
  0x95   : > { %605 = vmatprep.mubr.bf16.mxu0 %v3712_v0  ;;  %1226 = vmatpush1.bf16.msra.mxu0 %v3221_v26  ;;  %v411_v26 = vpack.c.bf16 %v366_v25, %v365_v24  ;;  %v421_v25 = vpack.c.bf16 %v386_v19, %v385_v18  ;;  %v391_v18 = vld [vmem:[%s3894_s11 + $0x1f0] sm:$0xff]  ;;  %v392_v19 = vld [vmem:[%s3894_s11 + $0x1f8] sm:$0xff] }
  0x96   : > { %1227 = vmatprep.subr.bf16.mxu0 %v3712_v0 }
  0x97   : > { %3115 = vmatpush2.bf16.msra.mxu1 %v3229_v4 }
  0x98   : > { %3100 = vmatprep.subr.bf16.mxu1 %v3712_v0 }
  0x99   : > { %1228 = vmatpush1.bf16.msra.mxu0 %v3222_v30  ;;  %v369_v30 = vld [vmem:[%s3894_s11 + $0x140] sm:$0xff] }
  0x9a   : > { %1229 = vmatprep.subr.bf16.mxu0 %v3712_v0 }
  0x9b   : > { %3116 = vmatpush2.bf16.msra.mxu1 %v3230_v7 }
  0x9c   : > { %606 = vmatmul.mubr.bf16.gmra.mxu0 %v397_v41  ;;  %v416_v41 = vpack.c.bf16 %v376_v40, %v375_v39 }
  0x9d   : > { %615 = vmatprep.mubr.bf16.mxu0 %v3712_v0  ;;  %1230 = vmatpush2.bf16.msra.mxu0 %v3223_v31  ;;  %v370_v31 = vld [vmem:[%s3894_s11 + $0x148] sm:$0xff] }
  0x9e   : > { %1231 = vmatprep.subr.bf16.mxu0 %v3712_v0  ;;  %v413_v32 = vpack.c.bf16 %v370_v31, %v369_v30 }
  0xa1   : > { %1232 = vmatpush2.bf16.msra.mxu0 %v3224_v35  ;;  %v414_v35 = vpack.c.bf16 %v372_v34, %v371_v33 }
  0xa2   : > { %1233 = vmatprep.subr.bf16.mxu0 %v3712_v0 }
  0xa4   : > { %616 = vmatmul.mubr.bf16.gmra.mxu0 %v398_v45 }
  0xa5   : > { %625 = vmatprep.mubr.bf16.mxu0 %v3712_v0  ;;  %1234 = vmatpush2.bf16.msra.mxu0 %v3225_v42  ;;  %v377_v42 = vld [vmem:[%s3894_s11 + $0x180] sm:$0xff] }
  0xa6   : > { %1235 = vmatprep.subr.bf16.mxu0 %v3712_v0  ;;  %v417_v44 = vpack.c.bf16 %v378_v43, %v377_v42 }
  0xa9   : > { %1236 = vmatpush2.bf16.msra.mxu0 %v3226_v49 }
  0xaa   : > { %1237 = vmatprep.subr.bf16.mxu0 %v3712_v0 }
  0xac   : > { %626 = vmatmul.mubr.bf16.gmra.mxu0 %v399_v48 }
  0xad   : > { %635 = vmatprep.mubr.bf16.mxu0 %v3712_v0  ;;  %1238 = vmatpush2.bf16.msra.mxu0 %v3227_v61 }
  0xae   : > { %1239 = vmatprep.subr.bf16.mxu0 %v3712_v0 }
  0xb1   : > { %1240 = vmatpush2.bf16.msra.mxu0 %v3228_v2  ;;  %v383_v2 = vld [vmem:[%s3894_s11 + $0x1b0] sm:$0xff] }
  0xb2   : > { %1241 = vmatprep.subr.bf16.mxu0 %v3712_v0 }
  0xb4   : > { %636 = vmatmul.mubr.bf16.gmra.mxu0 %v400_v52  ;;  %v443_v52 = vlaneseq }
  0xb5   : > { %645 = vmatprep.mubr.bf16.mxu0 %v3712_v0  ;;  %1242 = vmatpush2.bf16.msra.mxu0 %v3229_v4 }
  0xb6   : > { %1243 = vmatprep.subr.bf16.mxu0 %v3712_v0  ;;  %v444_v57 = vshrl.u32 %v443_v52, 7 }
  0xb8   : > { %v445_v61 = vsub.s32 0, %v444_v57 }
  0xb9   : > { %1244 = vmatpush2.bf16.msra.mxu0 %v3230_v7 }
  0xba   : > { %v4039_v5 = vrot.slane %v441_v63, %v445_v61  ;;  %v390_v61 = vld [vmem:[%s3894_s11 + $0x1e8] sm:$0xff] }
  0xbc   : > { %646 = vmatmul.mubr.bf16.gmra.mxu0 %v401_v55  ;;  %v382_v55 = vld [vmem:[%s3894_s11 + $0x1a8] sm:$0xff] }
  0xbd   : > { %655 = vmatprep.mubr.bf16.mxu0 %v3712_v0  ;;  %v419_v59 = vpack.c.bf16 %v382_v55, %v381_v54 }
  0xc4   : > { %656 = vmatmul.mubr.bf16.gmra.mxu0 %v402_v58 }
  0xc5   : > { %665 = vmatprep.mubr.bf16.mxu0 %v3712_v0 }
  0xcc   : > { %666 = vmatmul.mubr.bf16.gmra.mxu0 %v403_v62  ;;  %v449_v62 = vsub.s32 1, %v444_v57 }
  0xcd   : > { %675 = vmatprep.mubr.bf16.mxu0 %v3712_v0 }
  0xce   : > { %v4041_v6 = vrot.slane %v441_v63, %v449_v62 }
  0xd4   : > { %676 = vmatmul.mubr.bf16.gmra.mxu0 %v404_v3  ;;  %v384_v3 = vld [vmem:[%s3894_s11 + $0x1b8] sm:$0xff] }
  0xd5   : > { %685 = vmatprep.mubr.bf16.mxu0 %v3712_v0 }
  0xdc   : > { %686 = vmatmul.mubr.bf16.gmra.mxu0 %v405_v8  ;;  %v420_v8 = vpack.c.bf16 %v384_v3, %v383_v2 }
  0xdd   : > { %695 = vmatprep.mubr.bf16.mxu0 %v3712_v0 }
  0xe4   : > { %696 = vmatmul.mubr.bf16.gmra.mxu0 %v406_v11 }
  0xe5   : > { %705 = vmatprep.mubr.bf16.mxu0 %v3712_v0 }
  0xec   : > { %706 = vmatmul.mubr.bf16.gmra.mxu0 %v407_v14 }
  0xed   : > { %715 = vmatprep.mubr.bf16.mxu0 %v3712_v0 }
  0xf4   : > { %716 = vmatmul.mubr.bf16.gmra.mxu0 %v408_v17 }
  0xf5   : > { %725 = vmatprep.mubr.bf16.mxu0 %v3712_v0 }
  0xfc   : > { %726 = vmatmul.mubr.bf16.gmra.mxu0 %v409_v20 }
  0xfd   : > { %735 = vmatprep.mubr.bf16.mxu0 %v3712_v0 }
 0x104   : > { %736 = vmatmul.mubr.bf16.gmra.mxu0 %v410_v23 }
 0x105   : > { %745 = vmatprep.mubr.bf16.mxu0 %v3712_v0 }
 0x10c   : > { %746 = vmatmul.mubr.bf16.gmra.mxu0 %v411_v26 }
 0x10d   : > { %755 = vmatprep.mubr.bf16.mxu0 %v3712_v0 }
 0x114   : > { %756 = vmatmul.mubr.bf16.gmra.mxu0 %v412_v29 }
 0x115   : > { %765 = vmatprep.mubr.bf16.mxu0 %v3712_v0 }
 0x11c   : > { %766 = vmatmul.mubr.bf16.gmra.mxu0 %v413_v32 }
 0x11d   : > { %775 = vmatprep.mubr.bf16.mxu0 %v3712_v0 }
 0x124   : > { %776 = vmatmul.mubr.bf16.gmra.mxu0 %v414_v35  ;;  %v387_v35 = vld [vmem:[%s3894_s11 + $0x1d0] sm:$0xff] }
 0x125   : > { %785 = vmatprep.mubr.bf16.mxu0 %v3712_v0  ;;  %v422_v42 = vpack.c.bf16 %v388_v36, %v387_v35 }
 0x12c   : > { %786 = vmatmul.mubr.bf16.gmra.mxu0 %v415_v38 }
 0x12d   : > { %795 = vmatprep.mubr.bf16.mxu0 %v3712_v0 }
 0x134   : > { %796 = vmatmul.mubr.bf16.gmra.mxu0 %v416_v41 }
 0x135   : > { %805 = vmatprep.mubr.bf16.mxu0 %v3712_v0 }
 0x13c   : > { %v4011_v45 = vpop.f32.mrf.mxu0  ;;  %806 = vmatmul.mubr.bf16.gmra.mxu0 %v417_v44 }
 0x13d   : > { %815 = vmatprep.mubr.bf16.mxu0 %v3712_v0 }
 0x13e   : > { %v4016_v48 = vpop.f32.mrf.mxu0 }
 0x140   : > { %v4018_v49 = vpop.f32.mrf.mxu0 }
 0x142   : > { %v4020_v51 = vpop.f32.mrf.mxu0 }
 0x144   : > { %v4022_v53 = vpop.f32.mrf.mxu0  ;;  %816 = vmatmul.mubr.bf16.gmra.mxu0 %v418_v50 }
 0x145   : > { %825 = vmatprep.mubr.bf16.mxu0 %v3712_v0 }
 0x146   : > { %v4027_v56 = vpop.f32.mrf.mxu0 }
 0x147   : > { %v580_v36 = vadd.f32 %v4027_v56, %v4041_v6 }
 0x148   : > { %v4029_v58 = vpop.f32.mrf.mxu0 }
 0x149   : > { %v582_v56 = vadd.f32 %v4029_v58, %v4039_v5 }
 0x14a   : > { %v4031_v60 = vpop.f32.mrf.mxu0 }
 0x14c   : > { %v587_v1 = vpop.f32.mrf.mxu0  ;;  %826 = vmatmul.mubr.bf16.gmra.mxu0 %v419_v59  ;;  %v389_v59 = vld [vmem:[%s3894_s11 + $0x1e0] sm:$0xff] }
 0x14d   : > { %835 = vmatprep.mubr.bf16.mxu0 %v3712_v0  ;;  %v588_v11 = vadd.f32 %v587_v1, %v4039_v5 }
 0x14e   : > { %v589_v4 = vpop.f32.mrf.mxu0 }
 0x14f   : > { %v590_v9 = vadd.f32 %v589_v4, %v4041_v6  ;;  %v894_v20 = vmax.f32 %v588_v11, 0.0  ;;  %v423_v4 = vpack.c.bf16 %v390_v61, %v389_v59  ;;  %v574_v11 = vadd.f32 %v4020_v51, %v4041_v6 }
 0x150   : > { %v591_v7 = vpop.f32.mrf.mxu0  ;;  %v578_v59 = vadd.f32 %v4022_v53, %v4039_v5 }
 0x151   : > { %v592_v10 = vadd.f32 %v591_v7, %v4039_v5  ;;  %v895_v16 = vmax.f32 %v590_v9, 0.0 }
 0x152   : > { %v593_v12 = vpop.f32.mrf.mxu0 }
 0x153   : > { %v594_v13 = vadd.f32 %v593_v12, %v4041_v6  ;;  %v896_v14 = vmax.f32 %v592_v10, 0.0 }
 0x154   : > { %v597_v15 = vpop.f32.mrf.mxu0  ;;  %836 = vmatmul.mubr.bf16.gmra.mxu0 %v420_v8 }
 0x155   : > { %v897_v17 = vmax.f32 %v594_v13, 0.0  ;;  %845 = vmatprep.mubr.bf16.mxu0 %v3712_v0  ;;  %v1018_v23 = vpack.c.bf16 %v896_v14, %v894_v20  ;;  %v598_v28 = vadd.f32 %v597_v15, %v4039_v5  ;;  %v570_v15 = vadd.f32 %v4016_v48, %v4041_v6 }
 0x156   : > { %v599_v21 = vpop.f32.mrf.mxu0  ;;  %v572_v48 = vadd.f32 %v4018_v49, %v4039_v5 }
 0x157   : > { %v1019_v22 = vpack.c.bf16 %v897_v17, %v895_v16  ;;  %v600_v26 = vadd.f32 %v599_v21, %v4041_v6  ;;  %v898_v37 = vmax.f32 %v598_v28, 0.0 }
 0x158   : > { %v601_v24 = vpop.f32.mrf.mxu0 }
 0x159   : > { %v602_v27 = vadd.f32 %v601_v24, %v4039_v5  ;;  %1261 = vmatprep.mubr.bf16.mxu1 %v1019_v22  ;;  %v899_v33 = vmax.f32 %v600_v26, 0.0  ;;  %v889_v22 = vmax.f32 %v574_v11, 0.0  ;;  %v887_v26 = vmax.f32 %v570_v15, 0.0 }
 0x15a   : > { %v603_v29 = vpop.f32.mrf.mxu0  ;;  %1262 = vmatmul.mubr.bf16.vlgmr.msra.gmra.mxu1 %v1018_v23 }
 0x15b   : > { %v604_v30 = vadd.f32 %v603_v29, %v4041_v6  ;;  %v900_v31 = vmax.f32 %v602_v27, 0.0 }
 0x15c   : > { %v607_v32 = vpop.f32.mrf.mxu0  ;;  %846 = vmatmul.mubr.bf16.gmra.mxu0 %v421_v25  ;;  %v424_v25 = vpack.c.bf16 %v392_v19, %v391_v18 }
 0x15d   : > { %v901_v34 = vmax.f32 %v604_v30, 0.0  ;;  %855 = vmatprep.mubr.bf16.mxu0 %v3712_v0  ;;  %v1020_v40 = vpack.c.bf16 %v900_v31, %v898_v37  ;;  %v608_v46 = vadd.f32 %v607_v32, %v4039_v5  ;;  %v584_v30 = vadd.f32 %v4031_v60, %v4041_v6 }
 0x15e   : > { %v609_v38 = vpop.f32.mrf.mxu0  ;;  %v1015_v32 = vpack.c.bf16 %v889_v22, %v887_v26 }
 0x15f   : > { %v1021_v39 = vpack.c.bf16 %v901_v34, %v899_v33  ;;  %v610_v43 = vadd.f32 %v609_v38, %v4041_v6  ;;  %v902_v62 = vmax.f32 %v608_v46, 0.0  ;;  %v568_v33 = vadd.f32 %v4011_v45, %v4039_v5 }
 0x160   : > { %v611_v41 = vpop.f32.mrf.mxu0  ;;  %v888_v38 = vmax.f32 %v572_v48, 0.0  ;;  %v891_v46 = vmax.f32 %v580_v36, 0.0 }
 0x161   : > { %v612_v44 = vadd.f32 %v611_v41, %v4039_v5  ;;  %1269 = vmatprep.mubr.bf16.mxu1 %v1021_v39  ;;  %v903_v55 = vmax.f32 %v610_v43, 0.0  ;;  %v893_v41 = vmax.f32 %v584_v30, 0.0 }
 0x162   : > { %v613_v47 = vpop.f32.mrf.mxu0  ;;  %1270 = vmatmul.mubr.bf16.gmra.mxu1 %v1020_v40 }
 0x163   : > { %v614_v50 = vadd.f32 %v613_v47, %v4041_v6  ;;  %v904_v52 = vmax.f32 %v612_v44, 0.0 }
 0x164   : > { %v617_v54 = vpop.f32.mrf.mxu0  ;;  %856 = vmatmul.mubr.bf16.gmra.mxu0 %v422_v42  ;;  %v886_v42 = vmax.f32 %v568_v33, 0.0 }
 0x165   : > { %v905_v57 = vmax.f32 %v614_v50, 0.0  ;;  %865 = vmatprep.mubr.bf16.mxu0 %v3712_v0  ;;  %v1022_v2 = vpack.c.bf16 %v904_v52, %v902_v62  ;;  %v618_v9 = vadd.f32 %v617_v54, %v4039_v5 }
 0x166   : > { %v619_v63 = vpop.f32.mrf.mxu0  ;;  %v1014_v50 = vpack.c.bf16 %v888_v38, %v886_v42 }
 0x167   : > { %v1023_v1 = vpack.c.bf16 %v905_v57, %v903_v55  ;;  %v620_v7 = vadd.f32 %v619_v63, %v4041_v6  ;;  %v906_v20 = vmax.f32 %v618_v9, 0.0  ;;  %v1017_v57 = vpack.c.bf16 %v893_v41, %v891_v46 }
 0x168   : > { %v621_v3 = vpop.f32.mrf.mxu0 }
 0x169   : > { %v622_v8 = vadd.f32 %v621_v3, %v4039_v5  ;;  %1277 = vmatprep.mubr.bf16.mxu1 %v1023_v1  ;;  %v907_v16 = vmax.f32 %v620_v7, 0.0  ;;  %v890_v7 = vmax.f32 %v578_v59, 0.0 }
 0x16a   : > { %v623_v10 = vpop.f32.mrf.mxu0  ;;  %1278 = vmatmul.mubr.bf16.gmra.mxu1 %v1022_v2  ;;  %v892_v2 = vmax.f32 %v582_v56, 0.0 }
 0x16b   : > { %v624_v12 = vadd.f32 %v623_v10, %v4041_v6  ;;  %v908_v13 = vmax.f32 %v622_v8, 0.0 }
 0x16c   : > { %v627_v14 = vpop.f32.mrf.mxu0  ;;  %866 = vmatmul.mubr.bf16.gmra.mxu0 %v423_v4 }
 0x16d   : > { %v909_v17 = vmax.f32 %v624_v12, 0.0  ;;  %875 = vmatprep.mubr.bf16.mxu0 %v3712_v0  ;;  %v1024_v24 = vpack.c.bf16 %v908_v13, %v906_v20  ;;  %v628_v0 = vadd.f32 %v627_v14, %v4039_v5  ;;  %v1016_v12 = vpack.c.bf16 %v892_v2, %v890_v7 }
 0x16e   : > { %v629_v21 = vpop.f32.mrf.mxu0 }
 0x16f   : > { %v1025_v23 = vpack.c.bf16 %v909_v17, %v907_v16  ;;  %v630_v27 = vadd.f32 %v629_v21, %v4041_v6  ;;  %v910_v39 = vmax.f32 %v628_v0, 0.0 }
 0x170   : > { %v631_v51 = vpop.f32.mrf.mxu0 }
 0x171   : > { %v632_v28 = vadd.f32 %v631_v51, %v4039_v5  ;;  %1285 = vmatprep.mubr.bf16.mxu1 %v1025_v23  ;;  %v911_v49 = vmax.f32 %v630_v27, 0.0 }
 0x172   : > { %v633_v29 = vpop.f32.mrf.mxu0  ;;  %1286 = vmatmul.mubr.bf16.gmra.mxu1 %v1024_v24 }
 0x173   : > { %v634_v31 = vadd.f32 %v633_v29, %v4041_v6  ;;  %v912_v34 = vmax.f32 %v632_v28, 0.0 }
 0x174   : > { %v637_v35 = vpop.f32.mrf.mxu0  ;;  %876 = vmatmul.mubr.bf16.gmra.mxu0 %v424_v25 }
 0x175   : > { %v913_v37 = vmax.f32 %v634_v31, 0.0  ;;  %1245 = vmatprep.mubr.bf16.mxu0 %v1015_v32  ;;  %v1026_v43 = vpack.c.bf16 %v912_v34, %v910_v39  ;;  %v638_v52 = vadd.f32 %v637_v35, %v4039_v5 }
 0x176   : > { %v639_v40 = vpop.f32.mrf.mxu0 }
 0x177   : > { %v1027_v60 = vpack.c.bf16 %v913_v37, %v911_v49  ;;  %v640_v45 = vadd.f32 %v639_v40, %v4041_v6  ;;  %v914_v3 = vmax.f32 %v638_v52, 0.0 }
 0x178   : > { %v641_v44 = vpop.f32.mrf.mxu0 }
 0x179   : > { %v642_v47 = vadd.f32 %v641_v44, %v4039_v5  ;;  %1293 = vmatprep.mubr.bf16.mxu1 %v1027_v60  ;;  %v915_v63 = vmax.f32 %v640_v45, 0.0 }
 0x17a   : > { %v643_v54 = vpop.f32.mrf.mxu0  ;;  %1294 = vmatmul.mubr.bf16.gmra.mxu1 %v1026_v43 }
 0x17b   : > { %v644_v55 = vadd.f32 %v643_v54, %v4041_v6  ;;  %v916_v61 = vmax.f32 %v642_v47, 0.0 }
 0x17c   : > { %v647_v62 = vpop.f32.mrf.mxu0  ;;  %1246 = vmatmul.mubr.bf16.vlgmr.msra.gmra.mxu0 %v1014_v50 }
 0x17d   : > { %v917_v1 = vmax.f32 %v644_v55, 0.0  ;;  %1253 = vmatprep.mubr.bf16.mxu0 %v1017_v57  ;;  %v1028_v8 = vpack.c.bf16 %v916_v61, %v914_v3  ;;  %v648_v53 = vadd.f32 %v647_v62, %v4039_v5 }
 0x17e   : > { %v649_v4 = vpop.f32.mrf.mxu0 }
 0x17f   : > { %v1029_v58 = vpack.c.bf16 %v917_v1, %v915_v63  ;;  %v650_v10 = vadd.f32 %v649_v4, %v4041_v6  ;;  %v918_v19 = vmax.f32 %v648_v53, 0.0 }
 0x180   : > { %v651_v9 = vpop.f32.mrf.mxu0 }
 0x181   : > { %v652_v11 = vadd.f32 %v651_v9, %v4039_v5  ;;  %1301 = vmatprep.mubr.bf16.mxu1 %v1029_v58  ;;  %v919_v17 = vmax.f32 %v650_v10, 0.0 }
 0x182   : > { %v653_v13 = vpop.f32.mrf.mxu0  ;;  %1302 = vmatmul.mubr.bf16.gmra.mxu1 %v1028_v8 }
 0x183   : > { %v654_v14 = vadd.f32 %v653_v13, %v4041_v6  ;;  %v920_v15 = vmax.f32 %v652_v11, 0.0 }
 0x184   : > { %v657_v16 = vpop.f32.mrf.mxu0  ;;  %1254 = vmatmul.mubr.bf16.gmra.mxu0 %v1016_v12 }
 0x185   : > { %v921_v18 = vmax.f32 %v654_v14, 0.0  ;;  %v1030_v22 = vpack.c.bf16 %v920_v15, %v918_v19  ;;  %v658_v25 = vadd.f32 %v657_v16, %v4039_v5 }
 0x186   : > { %v659_v20 = vpop.f32.mrf.mxu0 }
 0x187   : > { %v1031_v21 = vpack.c.bf16 %v921_v18, %v919_v17  ;;  %v660_v24 = vadd.f32 %v659_v20, %v4041_v6  ;;  %v922_v30 = vmax.f32 %v658_v25, 0.0 }
 0x188   : > { %v661_v23 = vpop.f32.mrf.mxu0 }
 0x189   : > { %v662_v51 = vadd.f32 %v661_v23, %v4039_v5  ;;  %1309 = vmatprep.mubr.bf16.mxu1 %v1031_v21  ;;  %v923_v0 = vmax.f32 %v660_v24, 0.0 }
 0x18a   : > { %v663_v26 = vpop.f32.mrf.mxu0  ;;  %1310 = vmatmul.mubr.bf16.gmra.mxu1 %v1030_v22 }
 0x18b   : > { %v664_v27 = vadd.f32 %v663_v26, %v4041_v6  ;;  %v924_v28 = vmax.f32 %v662_v51, 0.0 }
 0x18c   : > { %v667_v48 = vpop.f32.mrf.mxu0 }
 0x18d   : > { %v925_v29 = vmax.f32 %v664_v27, 0.0  ;;  %v1032_v33 = vpack.c.bf16 %v924_v28, %v922_v30  ;;  %v668_v49 = vadd.f32 %v667_v48, %v4039_v5 }
 0x18e   : > { %v669_v31 = vpop.f32.mrf.mxu0 }
 0x18f   : > { %v1033_v32 = vpack.c.bf16 %v925_v29, %v923_v0  ;;  %v670_v35 = vadd.f32 %v669_v31, %v4041_v6  ;;  %v926_v42 = vmax.f32 %v668_v49, 0.0 }
 0x190   : > { %v671_v34 = vpop.f32.mrf.mxu0 }
 0x191   : > { %v672_v36 = vadd.f32 %v671_v34, %v4039_v5  ;;  %1317 = vmatprep.mubr.bf16.mxu1 %v1033_v32  ;;  %v927_v41 = vmax.f32 %v670_v35, 0.0 }
 0x192   : > { %v673_v37 = vpop.f32.mrf.mxu0  ;;  %1318 = vmatmul.mubr.bf16.gmra.mxu1 %v1032_v33 }
 0x193   : > { %v674_v38 = vadd.f32 %v673_v37, %v4041_v6  ;;  %v928_v39 = vmax.f32 %v672_v36, 0.0 }
 0x194   : > { %v677_v40 = vpop.f32.mrf.mxu0 }
 0x195   : > { %v929_v60 = vmax.f32 %v674_v38, 0.0  ;;  %v1034_v46 = vpack.c.bf16 %v928_v39, %v926_v42  ;;  %v678_v56 = vadd.f32 %v677_v40, %v4039_v5 }
 0x196   : > { %v679_v43 = vpop.f32.mrf.mxu0 }
 0x197   : > { %v1035_v44 = vpack.c.bf16 %v929_v60, %v927_v41  ;;  %v680_v47 = vadd.f32 %v679_v43, %v4041_v6  ;;  %v930_v62 = vmax.f32 %v678_v56, 0.0 }
 0x198   : > { %v681_v45 = vpop.f32.mrf.mxu0 }
 0x199   : > { %v682_v50 = vadd.f32 %v681_v45, %v4039_v5  ;;  %1325 = vmatprep.mubr.bf16.mxu1 %v1035_v44  ;;  %v931_v59 = vmax.f32 %v680_v47, 0.0 }
 0x19a   : > { %v683_v52 = vpop.f32.mrf.mxu0  ;;  %1326 = vmatmul.mubr.bf16.gmra.mxu1 %v1034_v46 }
 0x19b   : > { %v684_v54 = vadd.f32 %v683_v52, %v4041_v6  ;;  %v932_v55 = vmax.f32 %v682_v50, 0.0 }
 0x19c   : > { %v687_v57 = vpop.f32.mrf.mxu0 }
 0x19d   : > { %v933_v61 = vmax.f32 %v684_v54, 0.0  ;;  %v1036_v2 = vpack.c.bf16 %v932_v55, %v930_v62  ;;  %v688_v7 = vadd.f32 %v687_v57, %v4039_v5 }
 0x19e   : > { %v689_v63 = vpop.f32.mrf.mxu0 }
 0x19f   : > { %v1037_v1 = vpack.c.bf16 %v933_v61, %v931_v59  ;;  %v690_v4 = vadd.f32 %v689_v63, %v4041_v6  ;;  %v934_v13 = vmax.f32 %v688_v7, 0.0 }
 0x1a0   : > { %v691_v3 = vpop.f32.mrf.mxu0 }
 0x1a1   : > { %v692_v58 = vadd.f32 %v691_v3, %v4039_v5  ;;  %1333 = vmatprep.mubr.bf16.mxu1 %v1037_v1  ;;  %v935_v12 = vmax.f32 %v690_v4, 0.0 }
 0x1a2   : > { %v693_v8 = vpop.f32.mrf.mxu0  ;;  %1334 = vmatmul.mubr.bf16.gmra.mxu1 %v1036_v2 }
 0x1a3   : > { %v694_v9 = vadd.f32 %v693_v8, %v4041_v6  ;;  %v936_v10 = vmax.f32 %v692_v58, 0.0 }
 0x1a4   : > { %v697_v11 = vpop.f32.mrf.mxu0 }
 0x1a5   : > { %v937_v53 = vmax.f32 %v694_v9, 0.0  ;;  %v1038_v16 = vpack.c.bf16 %v936_v10, %v934_v13  ;;  %v698_v20 = vadd.f32 %v697_v11, %v4039_v5 }
 0x1a6   : > { %v699_v14 = vpop.f32.mrf.mxu0 }
 0x1a7   : > { %v1039_v15 = vpack.c.bf16 %v937_v53, %v935_v12  ;;  %v700_v18 = vadd.f32 %v699_v14, %v4041_v6  ;;  %v938_v26 = vmax.f32 %v698_v20, 0.0 }
 0x1a8   : > { %v701_v17 = vpop.f32.mrf.mxu0 }
 0x1a9   : > { %v702_v19 = vadd.f32 %v701_v17, %v4039_v5  ;;  %1341 = vmatprep.mubr.bf16.mxu1 %v1039_v15  ;;  %v939_v51 = vmax.f32 %v700_v18, 0.0 }
 0x1aa   : > { %v703_v21 = vpop.f32.mrf.mxu0  ;;  %1342 = vmatmul.mubr.bf16.gmra.mxu1 %v1038_v16 }
 0x1ab   : > { %v704_v22 = vadd.f32 %v703_v21, %v4041_v6  ;;  %v940_v23 = vmax.f32 %v702_v19, 0.0 }
 0x1ac   : > { %v707_v24 = vpop.f32.mrf.mxu0 }
 0x1ad   : > { %v941_v25 = vmax.f32 %v704_v22, 0.0  ;;  %v1040_v48 = vpack.c.bf16 %v940_v23, %v938_v26  ;;  %v708_v31 = vadd.f32 %v707_v24, %v4039_v5 }
 0x1ae   : > { %v709_v27 = vpop.f32.mrf.mxu0 }
 0x1af   : > { %v1041_v28 = vpack.c.bf16 %v941_v25, %v939_v51  ;;  %v710_v29 = vadd.f32 %v709_v27, %v4041_v6  ;;  %v942_v37 = vmax.f32 %v708_v31, 0.0 }
 0x1b0   : > { %v711_v0 = vpop.f32.mrf.mxu0 }
 0x1b1   : > { %v712_v30 = vadd.f32 %v711_v0, %v4039_v5  ;;  %1349 = vmatprep.mubr.bf16.mxu1 %v1041_v28  ;;  %v943_v36 = vmax.f32 %v710_v29, 0.0 }
 0x1b2   : > { %v713_v32 = vpop.f32.mrf.mxu0  ;;  %1350 = vmatmul.mubr.bf16.gmra.mxu1 %v1040_v48 }
 0x1b3   : > { %v714_v33 = vadd.f32 %v713_v32, %v4041_v6  ;;  %v944_v34 = vmax.f32 %v712_v30, 0.0 }
 0x1b4   : > { %v717_v35 = vpop.f32.mrf.mxu0 }
 0x1b5   : > { %v945_v49 = vmax.f32 %v714_v33, 0.0  ;;  %v1042_v40 = vpack.c.bf16 %v944_v34, %v942_v37  ;;  %v718_v43 = vadd.f32 %v717_v35, %v4039_v5 }
 0x1b6   : > { %v719_v38 = vpop.f32.mrf.mxu0 }
 0x1b7   : > { %v1043_v39 = vpack.c.bf16 %v945_v49, %v943_v36  ;;  %v720_v60 = vadd.f32 %v719_v38, %v4041_v6  ;;  %v946_v52 = vmax.f32 %v718_v43, 0.0 }
 0x1b8   : > { %v721_v41 = vpop.f32.mrf.mxu0 }
 0x1b9   : > { %v722_v42 = vadd.f32 %v721_v41, %v4039_v5  ;;  %1357 = vmatprep.mubr.bf16.mxu1 %v1043_v39  ;;  %v947_v50 = vmax.f32 %v720_v60, 0.0 }
 0x1ba   : > { %v723_v44 = vpop.f32.mrf.mxu0  ;;  %1358 = vmatmul.mubr.bf16.gmra.mxu1 %v1042_v40 }
 0x1bb   : > { %v724_v46 = vadd.f32 %v723_v44, %v4041_v6  ;;  %v948_v45 = vmax.f32 %v722_v42, 0.0 }
 0x1bc   : > { %v727_v47 = vpop.f32.mrf.mxu0 }
 0x1bd   : > { %v949_v56 = vmax.f32 %v724_v46, 0.0  ;;  %v1044_v57 = vpack.c.bf16 %v948_v45, %v946_v52  ;;  %v728_v63 = vadd.f32 %v727_v47, %v4039_v5 }
 0x1be   : > { %v729_v54 = vpop.f32.mrf.mxu0 }
 0x1bf   : > { %v1045_v55 = vpack.c.bf16 %v949_v56, %v947_v50  ;;  %v730_v61 = vadd.f32 %v729_v54, %v4041_v6  ;;  %v950_v8 = vmax.f32 %v728_v63, 0.0 }
 0x1c0   : > { %v731_v59 = vpop.f32.mrf.mxu0 }
 0x1c1   : > { %v732_v62 = vadd.f32 %v731_v59, %v4039_v5  ;;  %1365 = vmatprep.mubr.bf16.mxu1 %v1045_v55  ;;  %v951_v58 = vmax.f32 %v730_v61, 0.0 }
 0x1c2   : > { %v733_v1 = vpop.f32.mrf.mxu0  ;;  %1366 = vmatmul.mubr.bf16.gmra.mxu1 %v1044_v57 }
 0x1c3   : > { %v734_v2 = vadd.f32 %v733_v1, %v4041_v6  ;;  %v952_v3 = vmax.f32 %v732_v62, 0.0 }
 0x1c4   : > { %v737_v4 = vpop.f32.mrf.mxu0 }
 0x1c5   : > { %v953_v7 = vmax.f32 %v734_v2, 0.0  ;;  %v1046_v11 = vpack.c.bf16 %v952_v3, %v950_v8  ;;  %v738_v14 = vadd.f32 %v737_v4, %v4039_v5 }
 0x1c6   : > { %v739_v9 = vpop.f32.mrf.mxu0 }
 0x1c7   : > { %v1047_v10 = vpack.c.bf16 %v953_v7, %v951_v58  ;;  %v740_v53 = vadd.f32 %v739_v9, %v4041_v6  ;;  %v954_v21 = vmax.f32 %v738_v14, 0.0 }
 0x1c8   : > { %v741_v12 = vpop.f32.mrf.mxu0 }
 0x1c9   : > { %v742_v13 = vadd.f32 %v741_v12, %v4039_v5  ;;  %1373 = vmatprep.mubr.bf16.mxu1 %v1047_v10  ;;  %v955_v19 = vmax.f32 %v740_v53, 0.0 }
 0x1ca   : > { %v743_v15 = vpop.f32.mrf.mxu0  ;;  %1374 = vmatmul.mubr.bf16.gmra.mxu1 %v1046_v11 }
 0x1cb   : > { %v744_v16 = vadd.f32 %v743_v15, %v4041_v6  ;;  %v956_v17 = vmax.f32 %v742_v13, 0.0 }
 0x1cc   : > { %v747_v18 = vpop.f32.mrf.mxu0 }
 0x1cd   : > { %v957_v20 = vmax.f32 %v744_v16, 0.0  ;;  %v1048_v24 = vpack.c.bf16 %v956_v17, %v954_v21  ;;  %v748_v27 = vadd.f32 %v747_v18, %v4039_v5 }
 0x1ce   : > { %v749_v22 = vpop.f32.mrf.mxu0 }
 0x1cf   : > { %v1049_v23 = vpack.c.bf16 %v957_v20, %v955_v19  ;;  %v750_v25 = vadd.f32 %v749_v22, %v4041_v6  ;;  %v958_v32 = vmax.f32 %v748_v27, 0.0 }
 0x1d0   : > { %v751_v51 = vpop.f32.mrf.mxu0 }
 0x1d1   : > { %v752_v26 = vadd.f32 %v751_v51, %v4039_v5  ;;  %1381 = vmatprep.mubr.bf16.mxu1 %v1049_v23  ;;  %v959_v30 = vmax.f32 %v750_v25, 0.0 }
 0x1d2   : > { %v753_v28 = vpop.f32.mrf.mxu0  ;;  %1382 = vmatmul.mubr.bf16.gmra.mxu1 %v1048_v24 }
 0x1d3   : > { %v754_v48 = vadd.f32 %v753_v28, %v4041_v6  ;;  %v960_v0 = vmax.f32 %v752_v26, 0.0 }
 0x1d4   : > { %v757_v29 = vpop.f32.mrf.mxu0 }
 0x1d5   : > { %v961_v31 = vmax.f32 %v754_v48, 0.0  ;;  %v1050_v35 = vpack.c.bf16 %v960_v0, %v958_v32  ;;  %v758_v38 = vadd.f32 %v757_v29, %v4039_v5 }
 0x1d6   : > { %v759_v33 = vpop.f32.mrf.mxu0 }
 0x1d7   : > { %v1051_v34 = vpack.c.bf16 %v961_v31, %v959_v30  ;;  %v760_v49 = vadd.f32 %v759_v33, %v4041_v6  ;;  %v962_v44 = vmax.f32 %v758_v38, 0.0 }
 0x1d8   : > { %v761_v36 = vpop.f32.mrf.mxu0 }
 0x1d9   : > { %v762_v37 = vadd.f32 %v761_v36, %v4039_v5  ;;  %1389 = vmatprep.mubr.bf16.mxu1 %v1051_v34  ;;  %v963_v42 = vmax.f32 %v760_v49, 0.0 }
 0x1da   : > { %v763_v39 = vpop.f32.mrf.mxu0  ;;  %1390 = vmatmul.mubr.bf16.gmra.mxu1 %v1050_v35 }
 0x1db   : > { %v764_v40 = vadd.f32 %v763_v39, %v4041_v6  ;;  %v964_v41 = vmax.f32 %v762_v37, 0.0 }
 0x1dc   : > { %v767_v60 = vpop.f32.mrf.mxu0 }
 0x1dd   : > { %v965_v43 = vmax.f32 %v764_v40, 0.0  ;;  %v1052_v47 = vpack.c.bf16 %v964_v41, %v962_v44  ;;  %v768_v54 = vadd.f32 %v767_v60, %v4039_v5 }
 0x1de   : > { %v769_v46 = vpop.f32.mrf.mxu0 }
 0x1df   : > { %v1053_v45 = vpack.c.bf16 %v965_v43, %v963_v42  ;;  %v770_v56 = vadd.f32 %v769_v46, %v4041_v6  ;;  %v966_v1 = vmax.f32 %v768_v54, 0.0 }
 0x1e0   : > { %v771_v50 = vpop.f32.mrf.mxu0 }
 0x1e1   : > { %v772_v52 = vadd.f32 %v771_v50, %v4039_v5  ;;  %1397 = vmatprep.mubr.bf16.mxu1 %v1053_v45  ;;  %v967_v62 = vmax.f32 %v770_v56, 0.0 }
 0x1e2   : > { %v773_v55 = vpop.f32.mrf.mxu0  ;;  %1398 = vmatmul.mubr.bf16.gmra.mxu1 %v1052_v47 }
 0x1e3   : > { %v774_v57 = vadd.f32 %v773_v55, %v4041_v6  ;;  %v968_v59 = vmax.f32 %v772_v52, 0.0 }
 0x1e4   : > { %v777_v61 = vpop.f32.mrf.mxu0 }
 0x1e5   : > { %v969_v63 = vmax.f32 %v774_v57, 0.0  ;;  %v1054_v4 = vpack.c.bf16 %v968_v59, %v966_v1  ;;  %v778_v9 = vadd.f32 %v777_v61, %v4039_v5 }
 0x1e6   : > { %v779_v2 = vpop.f32.mrf.mxu0 }
 0x1e7   : > { %v1055_v3 = vpack.c.bf16 %v969_v63, %v967_v62  ;;  %v780_v7 = vadd.f32 %v779_v2, %v4041_v6  ;;  %v970_v15 = vmax.f32 %v778_v9, 0.0 }
 0x1e8   : > { %v781_v58 = vpop.f32.mrf.mxu0 }
 0x1e9   : > { %v782_v8 = vadd.f32 %v781_v58, %v4039_v5  ;;  %1405 = vmatprep.mubr.bf16.mxu1 %v1055_v3  ;;  %v971_v13 = vmax.f32 %v780_v7, 0.0 }
 0x1ea   : > { %v783_v10 = vpop.f32.mrf.mxu0  ;;  %1406 = vmatmul.mubr.bf16.gmra.mxu1 %v1054_v4 }
 0x1eb   : > { %v784_v11 = vadd.f32 %v783_v10, %v4041_v6  ;;  %v972_v12 = vmax.f32 %v782_v8, 0.0 }
 0x1ec   : > { %v787_v53 = vpop.f32.mrf.mxu0 }
 0x1ed   : > { %v973_v14 = vmax.f32 %v784_v11, 0.0  ;;  %v1056_v18 = vpack.c.bf16 %v972_v12, %v970_v15  ;;  %v788_v22 = vadd.f32 %v787_v53, %v4039_v5 }
 0x1ee   : > { %v789_v16 = vpop.f32.mrf.mxu0 }
 0x1ef   : > { %v1057_v17 = vpack.c.bf16 %v973_v14, %v971_v13  ;;  %v790_v20 = vadd.f32 %v789_v16, %v4041_v6  ;;  %v974_v28 = vmax.f32 %v788_v22, 0.0 }
 0x1f0   : > { %v791_v19 = vpop.f32.mrf.mxu0 }
 0x1f1   : > { %v792_v21 = vadd.f32 %v791_v19, %v4039_v5  ;;  %1413 = vmatprep.mubr.bf16.mxu1 %v1057_v17  ;;  %v975_v26 = vmax.f32 %v790_v20, 0.0 }
 0x1f2   : > { %v793_v23 = vpop.f32.mrf.mxu0  ;;  %1414 = vmatmul.mubr.bf16.gmra.mxu1 %v1056_v18 }
 0x1f3   : > { %v794_v24 = vadd.f32 %v793_v23, %v4041_v6  ;;  %v976_v51 = vmax.f32 %v792_v21, 0.0 }
 0x1f4   : > { %v797_v25 = vpop.f32.mrf.mxu0 }
 0x1f5   : > { %v977_v27 = vmax.f32 %v794_v24, 0.0  ;;  %v1058_v29 = vpack.c.bf16 %v976_v51, %v974_v28  ;;  %v798_v33 = vadd.f32 %v797_v25, %v4039_v5 }
 0x1f6   : > { %v799_v48 = vpop.f32.mrf.mxu0 }
 0x1f7   : > { %v1059_v0 = vpack.c.bf16 %v977_v27, %v975_v26  ;;  %v800_v31 = vadd.f32 %v799_v48, %v4041_v6  ;;  %v978_v39 = vmax.f32 %v798_v33, 0.0  ;;  %v4176_v48 = vld [vmem:[%s5751_s4] ss:$0 sm:$0xff] }
 0x1f8   : > { %v801_v30 = vpop.f32.mrf.mxu0 }
 0x1f9   : > { %v802_v32 = vadd.f32 %v801_v30, %v4039_v5  ;;  %1421 = vmatprep.mubr.bf16.mxu1 %v1059_v0  ;;  %v979_v37 = vmax.f32 %v800_v31, 0.0 }
 0x1fa   : > { %v803_v34 = vpop.f32.mrf.mxu0  ;;  %1422 = vmatmul.mubr.bf16.gmra.mxu1 %v1058_v29 }
 0x1fb   : > { %v804_v35 = vadd.f32 %v803_v34, %v4041_v6  ;;  %v980_v36 = vmax.f32 %v802_v32, 0.0 }
 0x1fc   : > { %v807_v49 = vpop.f32.mrf.mxu0 }
 0x1fd   : > { %v981_v38 = vmax.f32 %v804_v35, 0.0  ;;  %v1060_v60 = vpack.c.bf16 %v980_v36, %v978_v39  ;;  %v808_v46 = vadd.f32 %v807_v49, %v4039_v5 }
 0x1fe   : > { %v809_v40 = vpop.f32.mrf.mxu0 }
 0x1ff   : > { %v1061_v41 = vpack.c.bf16 %v981_v38, %v979_v37  ;;  %v810_v43 = vadd.f32 %v809_v40, %v4041_v6  ;;  %v982_v55 = vmax.f32 %v808_v46, 0.0  ;;  %v3487_v38 = vld [vmem:[%s3894_s11 + $0x20] sm:$0xff] }
 0x200   : > { %v811_v42 = vpop.f32.mrf.mxu0 }
 0x201   : > { %v812_v44 = vadd.f32 %v811_v42, %v4039_v5  ;;  %1429 = vmatprep.mubr.bf16.mxu1 %v1061_v41  ;;  %v983_v52 = vmax.f32 %v810_v43, 0.0 }
 0x202   : > { %v813_v45 = vpop.f32.mrf.mxu0  ;;  %1430 = vmatmul.mubr.bf16.gmra.mxu1 %v1060_v60 }
 0x203   : > { %v814_v47 = vadd.f32 %v813_v45, %v4041_v6  ;;  %v984_v50 = vmax.f32 %v812_v44, 0.0 }
 0x204   : > { %v817_v56 = vpop.f32.mrf.mxu0 }
 0x205   : > { %v985_v54 = vmax.f32 %v814_v47, 0.0  ;;  %v1062_v61 = vpack.c.bf16 %v984_v50, %v982_v55  ;;  %v818_v62 = vadd.f32 %v817_v56, %v4039_v5  ;;  %v3488_v56 = vld [vmem:[%s3894_s11 + $0x28] sm:$0xff] }
 0x206   : > { %v819_v57 = vpop.f32.mrf.mxu0 }
 0x207   : > { %v1063_v59 = vpack.c.bf16 %v985_v54, %v983_v52  ;;  %v820_v1 = vadd.f32 %v819_v57, %v4041_v6  ;;  %v986_v58 = vmax.f32 %v818_v62, 0.0 }
 0x208   : > { %v821_v63 = vpop.f32.mrf.mxu0 }
 0x209   : > { %v822_v2 = vadd.f32 %v821_v63, %v4039_v5  ;;  %1437 = vmatprep.mubr.bf16.mxu1 %v1063_v59  ;;  %v987_v9 = vmax.f32 %v820_v1, 0.0 }
 0x20a   : > { %v823_v3 = vpop.f32.mrf.mxu0  ;;  %1438 = vmatmul.mubr.bf16.gmra.mxu1 %v1062_v61 }
 0x20b   : > { %v824_v4 = vadd.f32 %v823_v3, %v4041_v6  ;;  %v988_v7 = vmax.f32 %v822_v2, 0.0 }
 0x20c   : > { %v827_v8 = vpop.f32.mrf.mxu0 }
 0x20d   : > { %v989_v10 = vmax.f32 %v824_v4, 0.0  ;;  %v828_v11 = vadd.f32 %v827_v8, %v4039_v5  ;;  %v1064_v14 = vpack.c.bf16 %v988_v7, %v986_v58  ;;  %v3489_v4 = vld [vmem:[%s3894_s11 + $0x30] sm:$0xff] }
 0x20e   : > { %v829_v12 = vpop.f32.mrf.mxu0 }
 0x20f   : > { %v1065_v53 = vpack.c.bf16 %v989_v10, %v987_v9  ;;  %v830_v13 = vadd.f32 %v829_v12, %v4041_v6  ;;  %v990_v17 = vmax.f32 %v828_v11, 0.0 }
 0x210   : > { %v831_v15 = vpop.f32.mrf.mxu0 }
 0x211   : > { %v832_v16 = vadd.f32 %v831_v15, %v4039_v5  ;;  %1445 = vmatprep.mubr.bf16.mxu1 %v1065_v53  ;;  %v991_v19 = vmax.f32 %v830_v13, 0.0 }
 0x212   : > { %v833_v18 = vpop.f32.mrf.mxu0  ;;  %1446 = vmatmul.mubr.bf16.gmra.mxu1 %v1064_v14 }
 0x213   : > { %v992_v20 = vmax.f32 %v832_v16, 0.0  ;;  %v834_v21 = vadd.f32 %v833_v18, %v4041_v6  ;;  %v3490_v16 = vld [vmem:[%s3894_s11 + $0x38] sm:$0xff] }
 0x214   : > { %v837_v22 = vpop.f32.mrf.mxu0 }
 0x215   : > { %v993_v23 = vmax.f32 %v834_v21, 0.0  ;;  %v1066_v24 = vpack.c.bf16 %v992_v20, %v990_v17  ;;  %v838_v51 = vadd.f32 %v837_v22, %v4039_v5 }
 0x216   : > { %v839_v25 = vpop.f32.mrf.mxu0 }
 0x217   : > { %v1067_v26 = vpack.c.bf16 %v993_v23, %v991_v19  ;;  %v840_v27 = vadd.f32 %v839_v25, %v4041_v6  ;;  %v994_v29 = vmax.f32 %v838_v51, 0.0 }
 0x218   : > { %v841_v28 = vpop.f32.mrf.mxu0 }
 0x219   : > { %v842_v0 = vadd.f32 %v841_v28, %v4039_v5  ;;  %1453 = vmatprep.mubr.bf16.mxu1 %v1067_v26  ;;  %v995_v32 = vmax.f32 %v840_v27, 0.0  ;;  %v3491_v27 = vld [vmem:[%s3894_s11 + $0x40] sm:$0xff] }
 0x21a   : > { %v843_v30 = vpop.f32.mrf.mxu0  ;;  %v1263_v31 = vpop.f32.mrf.mxu1  ;;  %1454 = vmatmul.mubr.bf16.gmra.mxu1 %v1066_v24 }
 0x21b   : > { %v996_v33 = vmax.f32 %v842_v0, 0.0  ;;  %v844_v34 = vadd.f32 %v843_v30, %v4041_v6  ;;  %v1264_v35 = vadd.f32 %v4176_v48, %v1263_v31 }
 0x21c   : > { %v847_v36 = vpop.f32.mrf.mxu0  ;;  %v1265_v49 = vpop.f32.mrf.mxu1 }
 0x21d   : > { %v997_v37 = vmax.f32 %v844_v34, 0.0  ;;  %v4182_v39 = vadd.f32 %v3487_v38, %v1264_v35  ;;  %v1068_v40 = vpack.c.bf16 %v996_v33, %v994_v29  ;;  %v848_v41 = vadd.f32 %v847_v36, %v4039_v5 }
 0x21e   : > { %v849_v60 = vpop.f32.mrf.mxu0  ;;  %v1266_v42 = vpop.f32.mrf.mxu1 }
 0x21f   : > { %v1069_v43 = vpack.c.bf16 %v997_v37, %v995_v32  ;;  %v850_v44 = vadd.f32 %v849_v60, %v4041_v6  ;;  %v1267_v46 = vadd.f32 %v4176_v48, %v1266_v42  ;;  %1576 = vadd.xlane.f32.xlu0 %v4182_v39  ;;  %v998_v54 = vmax.f32 %v848_v41, 0.0  ;;  %v3492_v37 = vld [vmem:[%s3894_s11 + $0x48] sm:$0xff] }
 0x220   : > { %v851_v45 = vpop.f32.mrf.mxu0  ;;  %v1268_v47 = vpop.f32.mrf.mxu1 }
 0x221   : > { %v852_v50 = vadd.f32 %v851_v45, %v4039_v5  ;;  %1461 = vmatprep.mubr.bf16.mxu1 %v1069_v43  ;;  %v4190_v52 = vadd.f32 %v3488_v56, %v1267_v46  ;;  %v999_v59 = vmax.f32 %v850_v44, 0.0  ;;  %v3493_v56 = vld [vmem:[%s3894_s11 + $0x50] sm:$0xff] }
 0x222   : > { %v853_v55 = vpop.f32.mrf.mxu0  ;;  %v1271_v57 = vpop.f32.mrf.mxu1  ;;  %1462 = vmatmul.mubr.bf16.gmra.mxu1 %v1068_v40 }
 0x223   : > { %v1000_v61 = vmax.f32 %v852_v50, 0.0  ;;  %v854_v62 = vadd.f32 %v853_v55, %v4041_v6  ;;  %v1272_v63 = vadd.f32 %v4176_v48, %v1271_v57  ;;  %1578 = vadd.xlane.f32.xlu1 %v4190_v52 }
 0x224   : > { %v857_v1 = vpop.f32.mrf.mxu0  ;;  %v1273_v2 = vpop.f32.mrf.mxu1 }
 0x225   : > { %v1001_v3 = vmax.f32 %v854_v62, 0.0  ;;  %v4196_v58 = vadd.f32 %v3489_v4, %v1272_v63  ;;  %v1070_v7 = vpack.c.bf16 %v1000_v61, %v998_v54  ;;  %v858_v8 = vadd.f32 %v857_v1, %v4039_v5 }
 0x226   : > { %v859_v9 = vpop.f32.mrf.mxu0  ;;  %v1274_v10 = vpop.f32.mrf.mxu1 }
 0x227   : > { %v1071_v11 = vpack.c.bf16 %v1001_v3, %v999_v59  ;;  %v860_v12 = vadd.f32 %v859_v9, %v4041_v6  ;;  %v1275_v53 = vadd.f32 %v4176_v48, %v1274_v10  ;;  %1580 = vadd.xlane.f32.xlu0 %v4196_v58  ;;  %v1002_v18 = vmax.f32 %v858_v8, 0.0 }
 0x228   : > { %v861_v13 = vpop.f32.mrf.mxu0  ;;  %v1276_v14 = vpop.f32.mrf.mxu1 }
 0x229   : > { %v862_v15 = vadd.f32 %v861_v13, %v4039_v5  ;;  %1469 = vmatprep.mubr.bf16.mxu1 %v1071_v11  ;;  %v4204_v17 = vadd.f32 %v3490_v16, %v1275_v53  ;;  %v1003_v21 = vmax.f32 %v860_v12, 0.0 }
 0x22a   : > { %v863_v19 = vpop.f32.mrf.mxu0  ;;  %v1279_v20 = vpop.f32.mrf.mxu1  ;;  %1470 = vmatmul.mubr.bf16.gmra.mxu1 %v1070_v7  ;;  %v3494_v7 = vld [vmem:[%s3894_s11 + $0x58] sm:$0xff] }
 0x22b   : > { %v1004_v22 = vmax.f32 %v862_v15, 0.0  ;;  %v864_v23 = vadd.f32 %v863_v19, %v4041_v6  ;;  %v1280_v24 = vadd.f32 %v4176_v48, %v1279_v20  ;;  %1582 = vadd.xlane.f32.xlu1 %v4204_v17  ;;  %v3495_v19 = vld [vmem:[%s3894_s11 + $0x60] sm:$0xff] }
 0x22c   : > { %v867_v51 = vpop.f32.mrf.mxu0  ;;  %v1281_v25 = vpop.f32.mrf.mxu1 }
 0x22d   : > { %v1005_v26 = vmax.f32 %v864_v23, 0.0  ;;  %v4210_v28 = vadd.f32 %v3491_v27, %v1280_v24  ;;  %v1072_v0 = vpack.c.bf16 %v1004_v22, %v1002_v18  ;;  %v868_v29 = vadd.f32 %v867_v51, %v4039_v5  ;;  %v3496_v27 = vld [vmem:[%s3894_s11 + $0x68] sm:$0xff] }
 0x22e   : > { %v869_v30 = vpop.f32.mrf.mxu0  ;;  %v1282_v31 = vpop.f32.mrf.mxu1 }
 0x22f   : > { %v1073_v32 = vpack.c.bf16 %v1005_v26, %v1003_v21  ;;  %v870_v33 = vadd.f32 %v869_v30, %v4041_v6  ;;  %v1283_v34 = vadd.f32 %v4176_v48, %v1282_v31  ;;  %1584 = vadd.xlane.f32.xlu0 %v4210_v28  ;;  %v1006_v40 = vmax.f32 %v868_v29, 0.0  ;;  %v3497_v29 = vld [vmem:[%s3894_s11] sm:$0xff] }
 0x230   : > { %v871_v35 = vpop.f32.mrf.mxu0  ;;  %v1284_v36 = vpop.f32.mrf.mxu1 }
 0x231   : > { %v872_v49 = vadd.f32 %v871_v35, %v4039_v5  ;;  %1477 = vmatprep.mubr.bf16.mxu1 %v1073_v32  ;;  %v4218_v38 = vadd.f32 %v3492_v37, %v1283_v34  ;;  %v1007_v42 = vmax.f32 %v870_v33, 0.0 }
 0x232   : > { %v873_v41 = vpop.f32.mrf.mxu0  ;;  %v1287_v60 = vpop.f32.mrf.mxu1  ;;  %1478 = vmatmul.mubr.bf16.gmra.mxu1 %v1072_v0 }
 0x233   : > { %v1008_v43 = vmax.f32 %v872_v49, 0.0  ;;  %v874_v44 = vadd.f32 %v873_v41, %v4041_v6  ;;  %v1288_v46 = vadd.f32 %v4176_v48, %v1287_v60  ;;  %1586 = vadd.xlane.f32.xlu1 %v4218_v38  ;;  %v3498_v49 = vld [vmem:[%s3894_s11 + $0x8] sm:$0xff] }
 0x234   : > { %v877_v45 = vpop.f32.mrf.mxu0  ;;  %v1289_v47 = vpop.f32.mrf.mxu1 }
 0x235   : > { %v1009_v50 = vmax.f32 %v874_v44, 0.0  ;;  %v4224_v54 = vadd.f32 %v3493_v56, %v1288_v46  ;;  %v1074_v55 = vpack.c.bf16 %v1008_v43, %v1006_v40  ;;  %v878_v57 = vadd.f32 %v877_v45, %v4039_v5  ;;  %v3500_v45 = vld [vmem:[%s3894_s11 + $0x70] sm:$0xff] }
 0x236   : > { %v879_v59 = vpop.f32.mrf.mxu0  ;;  %v1290_v61 = vpop.f32.mrf.mxu1 }
 0x237   : > { %v1075_v62 = vpack.c.bf16 %v1009_v50, %v1007_v42  ;;  %v880_v63 = vadd.f32 %v879_v59, %v4041_v6  ;;  %v1291_v1 = vadd.f32 %v4176_v48, %v1290_v61  ;;  %1588 = vadd.xlane.f32.xlu0 %v4224_v54  ;;  %v1010_v9 = vmax.f32 %v878_v57, 0.0  ;;  %v3499_v42 = vld [vmem:[%s3894_s11 + $0x10] sm:$0xff]  ;;  %v3501_v59 = vld [vmem:[%s3894_s11 + $0x78] sm:$0xff] }
 0x238   : > { %v881_v2 = vpop.f32.mrf.mxu0  ;;  %v1292_v3 = vpop.f32.mrf.mxu1 }
 0x239   : > { %v882_v4 = vadd.f32 %v881_v2, %v4039_v5  ;;  %1485 = vmatprep.mubr.bf16.mxu1 %v1075_v62  ;;  %v4232_v8 = vadd.f32 %v3494_v7, %v1291_v1  ;;  %v1011_v12 = vmax.f32 %v880_v63, 0.0  ;;  %v3502_v63 = vld [vmem:[%s3894_s11 + $0x80] sm:$0xff] }
 0x23a   : > { %v883_v10 = vpop.f32.mrf.mxu0  ;;  %v1295_v11 = vpop.f32.mrf.mxu1  ;;  %1486 = vmatmul.mubr.bf16.gmra.mxu1 %v1074_v55 }
 0x23b   : > { %v1012_v53 = vmax.f32 %v882_v4, 0.0  ;;  %v884_v13 = vadd.f32 %v883_v10, %v4041_v6  ;;  %v1296_v14 = vadd.f32 %v4176_v48, %v1295_v11  ;;  %1590 = vadd.xlane.f32.xlu1 %v4232_v8  ;;  %v3503_v4 = vld [vmem:[%s3894_s11 + $0x18] sm:$0xff] }
 0x23c   : > { %v1247_v15 = vpop.f32.mrf.mxu0  ;;  %v1297_v5 = vpop.f32.mrf.mxu1 }
 0x23d   : > { %v1013_v16 = vmax.f32 %v884_v13, 0.0  ;;  %v1248_v18 = vadd.f32 %v4176_v48, %v1247_v15  ;;  %v4239_v20 = vadd.f32 %v3495_v19, %v1296_v14  ;;  %v1076_v21 = vpack.c.bf16 %v1012_v53, %v1010_v9  ;;  %v3505_v14 = vld [vmem:[%s3894_s11 + $0x90] sm:$0xff]  ;;  %v3506_v19 = vld [vmem:[%s3894_s11 + $0x98] sm:$0xff] }
 0x23e   : > { %v1249_v22 = vpop.f32.mrf.mxu0  ;;  %v1298_v23 = vpop.f32.mrf.mxu1 }
 0x23f   : > { %v1077_v24 = vpack.c.bf16 %v1013_v16, %v1011_v12  ;;  %v1299_v6 = vadd.f32 %v4176_v48, %v1298_v23  ;;  %1592 = vadd.xlane.f32.xlu0 %v4239_v20  ;;  %v4248_v30 = vadd.f32 %v3497_v29, %v1248_v18  ;;  %v3504_v12 = vld [vmem:[%s3894_s11 + $0x88] sm:$0xff] }
 0x240   : > { %v1250_v51 = vpop.f32.mrf.mxu0  ;;  %v1300_v25 = vpop.f32.mrf.mxu1  ;;  %v3508_v29 = vld [vmem:[%s3894_s11 + $0xa8] sm:$0xff] }
 0x241   : > { %v1251_v26 = vadd.f32 %v4176_v48, %v1250_v51  ;;  %1493 = vmatprep.mubr.bf16.mxu1 %v1077_v24  ;;  %v4245_v0 = vadd.f32 %v3496_v27, %v1299_v6  ;;  %v3507_v6 = vld [vmem:[%s3894_s11 + $0xa0] sm:$0xff] }
 0x242   : > { %v1252_v31 = vpop.f32.mrf.mxu0  ;;  %v1303_v32 = vpop.f32.mrf.mxu1  ;;  %1494 = vmatmul.mubr.bf16.gmra.mxu1 %v1076_v21 }
 0x243   : > { %1594 = vadd.xlane.f32.xlu1 %v4245_v0  ;;  %1568 = vadd.xlane.f32.xlu0 %v4248_v30  ;;  %v1304_v35 = vadd.f32 %v4176_v48, %v1303_v32  ;;  %v4255_v37 = vadd.f32 %v3498_v49, %v1251_v26 }
 0x244   : > { %v1255_v33 = vpop.f32.mrf.mxu0  ;;  %v1305_v34 = vpop.f32.mrf.mxu1 }
 0x245   : > { %v1256_v36 = vadd.f32 %v4176_v48, %v1255_v33  ;;  %v4264_v47 = vadd.f32 %v3500_v45, %v1304_v35  ;;  %v3509_v35 = vld [vmem:[%s3894_s11 + $0xb0] sm:$0xff] }
 0x246   : > { %v1257_v40 = vpop.f32.mrf.mxu0  ;;  %v1306_v41 = vpop.f32.mrf.mxu1 }
 0x247   : > { %v1307_v60 = vadd.f32 %v4176_v48, %v1306_v41  ;;  %1570 = vadd.xlane.f32.xlu0 %v4255_v37  ;;  %v4260_v43 = vadd.f32 %v3499_v42, %v1256_v36 }
 0x248   : > { %v1258_v44 = vpop.f32.mrf.mxu0  ;;  %v1308_v46 = vpop.f32.mrf.mxu1 }
 0x249   : > { %1572 = vadd.xlane.f32.xlu1 %v4260_v43  ;;  %v1259_v55 = vadd.f32 %v4176_v48, %v1258_v44  ;;  %v4270_v61 = vadd.f32 %v3501_v59, %v1307_v60  ;;  %v3510_v60 = vld [vmem:[%s3894_s11 + $0xb8] sm:$0xff] }
 0x24a   : > { %v1260_v50 = vpop.f32.mrf.mxu0  ;;  %v1311_v56 = vpop.f32.mrf.mxu1 }
 0x24b   : > { %v1312_v57 = vadd.f32 %v4176_v48, %v1311_v56  ;;  %1596 = vadd.xlane.f32.xlu0 %v4264_v47  ;;  %v4279_v7 = vadd.f32 %v3503_v4, %v1259_v55  ;;  %v3511_v50 = vld [vmem:[%s3894_s11 + $0xc0] sm:$0xff] }
 0x24c   : > { %v1313_v62 = vpop.f32.mrf.mxu1 }
 0x24d   : > { %1598 = vadd.xlane.f32.xlu1 %v4270_v61  ;;  %v4274_v1 = vadd.f32 %v3502_v63, %v1312_v57  ;;  %v3512_v62 = vld [vmem:[%s3894_s11 + $0xc8] sm:$0xff] }
 0x24e   : > { %v1314_v2 = vpop.f32.mrf.mxu1 }
 0x24f   : > { %v1315_v3 = vadd.f32 %v4176_v48, %v1314_v2  ;;  %1600 = vadd.xlane.f32.xlu0 %v4274_v1 }
 0x250   : > { %v1316_v9 = vpop.f32.mrf.mxu1 }
 0x251   : > { %1574 = vadd.xlane.f32.xlu1 %v4279_v7  ;;  %v4284_v53 = vadd.f32 %v3504_v12, %v1315_v3  ;;  %v3513_v9 = vld [vmem:[%s3894_s11 + $0xd0] sm:$0xff] }
 0x252   : > { %v1319_v10 = vpop.f32.mrf.mxu1 }
 0x253   : > { %v1320_v11 = vadd.f32 %v4176_v48, %v1319_v10 }
 0x254   : > { %v1321_v13 = vpop.f32.mrf.mxu1 }
 0x255   : > { %1602 = vadd.xlane.f32.xlu1 %v4284_v53  ;;  %v4288_v15 = vadd.f32 %v3505_v14, %v1320_v11  ;;  %v3514_v14 = vld [vmem:[%s3894_s11 + $0xd8] sm:$0xff] }
 0x256   : > { %v1322_v5 = vpop.f32.mrf.mxu1 }
 0x257   : > { %v1323_v16 = vadd.f32 %v4176_v48, %v1322_v5  ;;  %1604 = vadd.xlane.f32.xlu0 %v4288_v15 }
 0x258   : > { %v1324_v18 = vpop.f32.mrf.mxu1 }
 0x259   : > { %v4293_v21 = vadd.f32 %v3506_v19, %v1323_v16 }
 0x25a   : > { %v1327_v22 = vpop.f32.mrf.mxu1 }
 0x25b   : > { %v1328_v23 = vadd.f32 %v4176_v48, %v1327_v22  ;;  %1606 = vadd.xlane.f32.xlu1 %v4293_v21  ;;  %v3515_v22 = vld [vmem:[%s3894_s11 + $0xe0] sm:$0xff] }
 0x25c   : > { %v1329_v24 = vpop.f32.mrf.mxu1 }
 0x25d   : > { %v4298_v51 = vadd.f32 %v3507_v6, %v1328_v23 }
 0x25e   : > { %v1330_v25 = vpop.f32.mrf.mxu1 }
 0x25f   : > { %v1331_v26 = vadd.f32 %v4176_v48, %v1330_v25  ;;  %1608 = vadd.xlane.f32.xlu0 %v4298_v51 }
 0x260   : > { %v1332_v27 = vpop.f32.mrf.mxu1 }
 0x261   : > { %v4303_v31 = vadd.f32 %v3508_v29, %v1331_v26  ;;  %v3516_v26 = vld [vmem:[%s3894_s11 + $0xe8] sm:$0xff] }
 0x262   : > { %v1335_v32 = vpop.f32.mrf.mxu1 }
 0x263   : > { %v1336_v33 = vadd.f32 %v4176_v48, %v1335_v32  ;;  %1610 = vadd.xlane.f32.xlu1 %v4303_v31 }
 0x264   : > { %v1337_v34 = vpop.f32.mrf.mxu1 }
 0x265   : > { %v4308_v36 = vadd.f32 %v3509_v35, %v1336_v33  ;;  %v3517_v34 = vld [vmem:[%s3894_s11 + $0xf0] sm:$0xff] }
 0x266   : > { %v1338_v49 = vpop.f32.mrf.mxu1 }
 0x267   : > { %v1339_v40 = vadd.f32 %v4176_v48, %v1338_v49  ;;  %1612 = vadd.xlane.f32.xlu0 %v4308_v36 }
 0x268   : > { %v1340_v41 = vpop.f32.mrf.mxu1 }
 0x269   : > { %v4313_v42 = vadd.f32 %v3510_v60, %v1339_v40  ;;  %v3518_v60 = vld [vmem:[%s3894_s11 + $0xf8] sm:$0xff] }
 0x26a   : > { %v1343_v44 = vpop.f32.mrf.mxu1 }
 0x26b   : > { %v1344_v46 = vadd.f32 %v4176_v48, %v1343_v44  ;;  %1614 = vadd.xlane.f32.xlu1 %v4313_v42 }
 0x26c   : > { %v1345_v45 = vpop.f32.mrf.mxu1 }
 0x26d   : > { %v4318_v56 = vadd.f32 %v3511_v50, %v1344_v46 }
 0x26e   : > { %v1346_v55 = vpop.f32.mrf.mxu1 }
 0x26f   : > { %v1347_v57 = vadd.f32 %v4176_v48, %v1346_v55  ;;  %1616 = vadd.xlane.f32.xlu0 %v4318_v56  ;;  %v3519_v55 = vld [vmem:[%s3894_s11 + $0x100] sm:$0xff] }
 0x270   : > { %v1348_v59 = vpop.f32.mrf.mxu1 }
 0x271   : > { %v4323_v63 = vadd.f32 %v3512_v62, %v1347_v57 }
 0x272   : > { %v1351_v2 = vpop.f32.mrf.mxu1 }
 0x273   : > { %v1352_v3 = vadd.f32 %v4176_v48, %v1351_v2  ;;  %1618 = vadd.xlane.f32.xlu1 %v4323_v63 }
 0x274   : > { %v1353_v4 = vpop.f32.mrf.mxu1 }
 0x275   : > { %v4328_v10 = vadd.f32 %v3513_v9, %v1352_v3  ;;  %v3520_v3 = vld [vmem:[%s3894_s11 + $0x108] sm:$0xff] }
 0x276   : > { %v1354_v11 = vpop.f32.mrf.mxu1 }
 0x277   : > { %v1355_v12 = vadd.f32 %v4176_v48, %v1354_v11  ;;  %1620 = vadd.xlane.f32.xlu0 %v4328_v10 }
 0x278   : > { %v1356_v13 = vpop.f32.mrf.mxu1 }
 0x279   : > { %v4333_v5 = vadd.f32 %v3514_v14, %v1355_v12  ;;  %v3521_v13 = vld [vmem:[%s3894_s11 + $0x110] sm:$0xff] }
 0x27a   : > { %v1359_v16 = vpop.f32.mrf.mxu1 }
 0x27b   : > { %v1360_v18 = vadd.f32 %v4176_v48, %v1359_v16  ;;  %1622 = vadd.xlane.f32.xlu1 %v4333_v5 }
 0x27c   : > { %v1361_v19 = vpop.f32.mrf.mxu1 }
 0x27d   : > { %v4338_v23 = vadd.f32 %v3515_v22, %v1360_v18  ;;  %v3522_v22 = vld [vmem:[%s3894_s11 + $0x118] sm:$0xff] }
 0x27e   : > { %v1362_v24 = vpop.f32.mrf.mxu1 }
 0x27f   : > { %v1363_v6 = vadd.f32 %v4176_v48, %v1362_v24  ;;  %1624 = vadd.xlane.f32.xlu0 %v4338_v23 }
 0x280   : > { %v1364_v25 = vpop.f32.mrf.mxu1 }
 0x281   : > { %v4343_v27 = vadd.f32 %v3516_v26, %v1363_v6 }
 0x282   : > { %v1367_v29 = vpop.f32.mrf.mxu1 }
 0x283   : > { %v1368_v32 = vadd.f32 %v4176_v48, %v1367_v29  ;;  %1626 = vadd.xlane.f32.xlu1 %v4343_v27  ;;  %v3523_v29 = vld [vmem:[%s3894_s11 + $0x120] sm:$0xff] }
 0x284   : > { %v1369_v33 = vpop.f32.mrf.mxu1 }
 0x285   : > { %v4348_v35 = vadd.f32 %v3517_v34, %v1368_v32 }
 0x286   : > { %v1370_v49 = vpop.f32.mrf.mxu1 }
 0x287   : > { %v1371_v40 = vadd.f32 %v4176_v48, %v1370_v49  ;;  %1628 = vadd.xlane.f32.xlu0 %v4348_v35 }
 0x288   : > { %v1372_v41 = vpop.f32.mrf.mxu1 }
 0x289   : > { %v4353_v44 = vadd.f32 %v3518_v60, %v1371_v40  ;;  %v3524_v40 = vld [vmem:[%s3894_s11 + $0x128] sm:$0xff] }
 0x28a   : > { %v1375_v46 = vpop.f32.mrf.mxu1 }
 0x28b   : > { %v1376_v45 = vadd.f32 %v4176_v48, %v1375_v46  ;;  %1630 = vadd.xlane.f32.xlu1 %v4353_v44 }
 0x28c   : > { %v1377_v50 = vpop.f32.mrf.mxu1 }
 0x28d   : > { %v4358_v57 = vadd.f32 %v3519_v55, %v1376_v45  ;;  %v3525_v50 = vld [vmem:[%s3894_s11 + $0x130] sm:$0xff] }
 0x28e   : > { %v1378_v59 = vpop.f32.mrf.mxu1 }
 0x28f   : > { %v1379_v62 = vadd.f32 %v4176_v48, %v1378_v59  ;;  %1632 = vadd.xlane.f32.xlu0 %v4358_v57 }
 0x290   : > { %v1380_v2 = vpop.f32.mrf.mxu1 }
 0x291   : > { %v4363_v4 = vadd.f32 %v3520_v3, %v1379_v62 }
 0x292   : > { %v1383_v9 = vpop.f32.mrf.mxu1 }
 0x293   : > { %v1384_v11 = vadd.f32 %v4176_v48, %v1383_v9  ;;  %1634 = vadd.xlane.f32.xlu1 %v4363_v4 }
 0x294   : > { %v1385_v12 = vpop.f32.mrf.mxu1 }
 0x295   : > { %v4368_v14 = vadd.f32 %v3521_v13, %v1384_v11  ;;  %v3526_v11 = vld [vmem:[%s3894_s11 + $0x138] sm:$0xff] }
 0x296   : > { %v1386_v16 = vpop.f32.mrf.mxu1 }
 0x297   : > { %v1387_v18 = vadd.f32 %v4176_v48, %v1386_v16  ;;  %1636 = vadd.xlane.f32.xlu0 %v4368_v14 }
 0x298   : > { %v1388_v19 = vpop.f32.mrf.mxu1 }
 0x299   : > { %v4373_v24 = vadd.f32 %v3522_v22, %v1387_v18 }
 0x29a   : > { %v1391_v6 = vpop.f32.mrf.mxu1 }
 0x29b   : > { %v1392_v25 = vadd.f32 %v4176_v48, %v1391_v6  ;;  %1638 = vadd.xlane.f32.xlu1 %v4373_v24  ;;  %v3527_v6 = vld [vmem:[%s3894_s11 + $0x140] sm:$0xff] }
 0x29c   : > { %v1393_v26 = vpop.f32.mrf.mxu1 }
 0x29d   : > { %v4378_v32 = vadd.f32 %v3523_v29, %v1392_v25 }
 0x29e   : > { %v1394_v33 = vpop.f32.mrf.mxu1 }
 0x29f   : > { %v1395_v34 = vadd.f32 %v4176_v48, %v1394_v33  ;;  %1640 = vadd.xlane.f32.xlu0 %v4378_v32 }
 0x2a0   : > { %v1396_v49 = vpop.f32.mrf.mxu1 }
 0x2a1   : > { %v4383_v41 = vadd.f32 %v3524_v40, %v1395_v34 }
 0x2a2   : > { %v1399_v60 = vpop.f32.mrf.mxu1 }
 0x2a3   : > { %v1400_v46 = vadd.f32 %v4176_v48, %v1399_v60  ;;  %1642 = vadd.xlane.f32.xlu1 %v4383_v41  ;;  %v3528_v60 = vld [vmem:[%s3894_s11 + $0x148] sm:$0xff] }
 0x2a4   : > { %v1401_v45 = vpop.f32.mrf.mxu1 }
 0x2a5   : > { %v4388_v55 = vadd.f32 %v3525_v50, %v1400_v46 }
 0x2a6   : > { %v1402_v59 = vpop.f32.mrf.mxu1 }
 0x2a7   : > { %v1403_v62 = vadd.f32 %v4176_v48, %v1402_v59  ;;  %1644 = vadd.xlane.f32.xlu0 %v4388_v55 }
 0x2a8   : > { %v1404_v2 = vpop.f32.mrf.mxu1  ;;  %v1577_v3 = vpop.xlane.xlu0 %1576 }
 0x2a9   : > { %v1700_v9 = vmul.f32 0.0078125, %v1577_v3  ;;  %v4393_v12 = vadd.f32 %v3526_v11, %v1403_v62  ;;  %v3529_v11 = vld [vmem:[%s3894_s11 + $0x150] sm:$0xff] }
 0x2aa   : > { %v1407_v13 = vpop.f32.mrf.mxu1 }
 0x2ab   : > { %v1408_v16 = vadd.f32 %v4176_v48, %v1407_v13  ;;  %1646 = vadd.xlane.f32.xlu1 %v4393_v12  ;;  %v4401_v26 = vsub.f32 %v4182_v39, %v1700_v9 }
 0x2ac   : > { %v1409_v18 = vpop.f32.mrf.mxu1  ;;  %v1579_v19 = vpop.xlane.xlu1 %1578 }
 0x2ad   : > { %v1701_v22 = vmul.f32 0.0078125, %v1579_v19  ;;  %v4398_v25 = vadd.f32 %v3527_v6, %v1408_v16  ;;  %v1828_v45 = vmul.f32 %v4401_v26, %v4401_v26 }
 0x2ae   : > { %v1410_v29 = vpop.f32.mrf.mxu1 }
 0x2af   : > { %v1411_v33 = vadd.f32 %v4176_v48, %v1410_v29  ;;  %1648 = vadd.xlane.f32.xlu0 %v4398_v25  ;;  %v4411_v50 = vsub.f32 %v4190_v52, %v1701_v22  ;;  %v3530_v29 = vld [vmem:[%s3894_s11 + $0x158] sm:$0xff] }
 0x2b0   : > { %v1412_v34 = vpop.f32.mrf.mxu1  ;;  %v1581_v49 = vpop.xlane.xlu0 %1580 }
 0x2b1   : > { %v1702_v40 = vmul.f32 0.0078125, %v1581_v49  ;;  %v4406_v46 = vadd.f32 %v3528_v60, %v1411_v33  ;;  %v1829_v9 = vmul.f32 %v4411_v50, %v4411_v50 }
 0x2b2   : > { %v1415_v39 = vpop.f32.mrf.mxu1 }
 0x2b3   : > { %v1416_v59 = vadd.f32 %v4176_v48, %v1415_v39  ;;  %1650 = vadd.xlane.f32.xlu1 %v4406_v46  ;;  %1896 = vadd.xlane.f32.xlu0 %v1828_v45  ;;  %v4421_v16 = vsub.f32 %v4196_v58, %v1702_v40 }
 0x2b4   : > { %v1417_v62 = vpop.f32.mrf.mxu1  ;;  %v1583_v2 = vpop.xlane.xlu1 %1582 }
 0x2b5   : > { %v1703_v3 = vmul.f32 0.0078125, %v1583_v2  ;;  %v4418_v13 = vadd.f32 %v3529_v11, %v1416_v59  ;;  %v1830_v34 = vmul.f32 %v4421_v16, %v4421_v16  ;;  %v3531_v62 = vld [vmem:[%s3894_s11 + $0x160] sm:$0xff] }
 0x2b6   : > { %v1418_v52 = vpop.f32.mrf.mxu1 }
 0x2b7   : > { %v1419_v18 = vadd.f32 %v4176_v48, %v1418_v52  ;;  %1898 = vadd.xlane.f32.xlu1 %v1829_v9  ;;  %1652 = vadd.xlane.f32.xlu0 %v4418_v13  ;;  %v4431_v49 = vsub.f32 %v4204_v17, %v1703_v3 }
 0x2b8   : > { %v1420_v19 = vpop.f32.mrf.mxu1  ;;  %v1585_v22 = vpop.xlane.xlu0 %1584 }
 0x2b9   : > { %v1704_v6 = vmul.f32 0.0078125, %v1585_v22  ;;  %v4426_v33 = vadd.f32 %v3530_v29, %v1419_v18  ;;  %v1831_v59 = vmul.f32 %v4431_v49, %v4431_v49  ;;  %v3532_v19 = vld [vmem:[%s3894_s11 + $0x168] sm:$0xff] }
 0x2ba   : > { %v1423_v58 = vpop.f32.mrf.mxu1 }
 0x2bb   : > { %v1424_v40 = vadd.f32 %v4176_v48, %v1423_v58  ;;  %1654 = vadd.xlane.f32.xlu1 %v4426_v33  ;;  %1900 = vadd.xlane.f32.xlu0 %v1830_v34  ;;  %v4441_v9 = vsub.f32 %v4210_v28, %v1704_v6 }
 0x2bc   : > { %v1425_v60 = vpop.f32.mrf.mxu1  ;;  %v1587_v45 = vpop.xlane.xlu1 %1586 }
 0x2bd   : > { %v1705_v39 = vmul.f32 0.0078125, %v1587_v45  ;;  %v4438_v2 = vadd.f32 %v3531_v62, %v1424_v40  ;;  %v1832_v29 = vmul.f32 %v4441_v9, %v4441_v9 }
 0x2be   : > { %v1426_v17 = vpop.f32.mrf.mxu1 }
 0x2bf   : > { %v1427_v3 = vadd.f32 %v4176_v48, %v1426_v17  ;;  %1902 = vadd.xlane.f32.xlu1 %v1831_v59  ;;  %1656 = vadd.xlane.f32.xlu0 %v4438_v2  ;;  %v4451_v34 = vsub.f32 %v4218_v38, %v1705_v39  ;;  %v3533_v59 = vld [vmem:[%s3894_s11 + $0x170] sm:$0xff] }
 0x2c0   : > { %v1428_v11 = vpop.f32.mrf.mxu1  ;;  %v1589_v52 = vpop.xlane.xlu0 %1588 }
 0x2c1   : > { %v1706_v18 = vmul.f32 0.0078125, %v1589_v52  ;;  %v4446_v22 = vadd.f32 %v3532_v19, %v1427_v3  ;;  %v1833_v45 = vmul.f32 %v4451_v34, %v4451_v34  ;;  %v3534_v19 = vld [vmem:[%s3894_s11 + $0x178] sm:$0xff] }
 0x2c2   : > { %v1431_v28 = vpop.f32.mrf.mxu1 }
 0x2c3   : > { %v1432_v6 = vadd.f32 %v4176_v48, %v1431_v28  ;;  %1658 = vadd.xlane.f32.xlu1 %v4446_v22  ;;  %1904 = vadd.xlane.f32.xlu0 %v1832_v29  ;;  %v4461_v17 = vsub.f32 %v4224_v54, %v1706_v18 }
 0x2c4   : > { %v1433_v58 = vpop.f32.mrf.mxu1  ;;  %v1591_v40 = vpop.xlane.xlu1 %1590 }
 0x2c5   : > { %v1707_v60 = vmul.f32 0.0078125, %v1591_v40  ;;  %v4458_v62 = vadd.f32 %v3533_v59, %v1432_v6  ;;  %v1834_v28 = vmul.f32 %v4461_v17, %v4461_v17 }
 0x2c6   : > { %v1434_v38 = vpop.f32.mrf.mxu1 }
 0x2c7   : > { %v1435_v39 = vadd.f32 %v4176_v48, %v1434_v38  ;;  %1906 = vadd.xlane.f32.xlu1 %v1833_v45  ;;  %1660 = vadd.xlane.f32.xlu0 %v4458_v62  ;;  %v4471_v6 = vsub.f32 %v4232_v8, %v1707_v60 }
 0x2c8   : > { %v1436_v3 = vpop.f32.mrf.mxu1  ;;  %v1593_v11 = vpop.xlane.xlu0 %1592 }
 0x2c9   : > { %v1708_v52 = vmul.f32 0.0078125, %v1593_v11  ;;  %v4466_v29 = vadd.f32 %v3534_v19, %v1435_v39  ;;  %5804 = vst [vmem:[#allocation12_spill] sm:$0xff] %v4471_v6  ;;  %v1835_v38 = vmul.f32 %v4471_v6, %v4471_v6  ;;  %v3535_v39 = vld [vmem:[%s3894_s11 + $0x180] sm:$0xff] }
 0x2ca   : > { %v1439_v54 = vpop.f32.mrf.mxu1 }
 0x2cb   : > { %v1440_v18 = vadd.f32 %v4176_v48, %v1439_v54  ;;  %1662 = vadd.xlane.f32.xlu1 %v4466_v29  ;;  %1908 = vadd.xlane.f32.xlu0 %v1834_v28  ;;  %v4481_v8 = vsub.f32 %v4239_v20, %v1708_v52 }
 0x2cc   : > { %v1441_v58 = vpop.f32.mrf.mxu1  ;;  %v1595_v40 = vpop.xlane.xlu1 %1594 }
 0x2cd   : > { %v1709_v45 = vmul.f32 0.0078125, %v1595_v40  ;;  %v1569_v59 = vpop.xlane.xlu0 %1568  ;;  %v4478_v3 = vadd.f32 %v3535_v39, %v1440_v18  ;;  %5805 = vst [vmem:[#allocation13_spill] sm:$0xff] %v4481_v8  ;;  %v3536_v58 = vld [vmem:[%s3894_s11 + $0x188] sm:$0xff]  ;;  %v1836_v6 = vmul.f32 %v4481_v8, %v4481_v8 }
 0x2ce   : > { %v1696_v60 = vmul.f32 0.0078125, %v1569_v59  ;;  %v1442_v11 = vpop.f32.mrf.mxu1 }
 0x2cf   : > { %v1443_v19 = vadd.f32 %v4176_v48, %v1442_v11  ;;  %1910 = vadd.xlane.f32.xlu1 %v1835_v38  ;;  %1664 = vadd.xlane.f32.xlu0 %v4478_v3  ;;  %v4491_v18 = vsub.f32 %v4245_v0, %v1709_v45 }
 0x2d0   : > { %v1444_v28 = vpop.f32.mrf.mxu1  ;;  %v4494_v20 = vsub.f32 %v4248_v30, %v1696_v60 }
 0x2d1   : > { %v1571_v54 = vpop.xlane.xlu0 %1570  ;;  %v4486_v40 = vadd.f32 %v3536_v58, %v1443_v19  ;;  %5806 = vst [vmem:[#allocation14_spill] sm:$0xff] %v4491_v18  ;;  %v1837_v28 = vmul.f32 %v4491_v18, %v4491_v18 }
 0x2d2   : > { %5807 = vst [vmem:[#allocation15_spill] sm:$0xff] %v4494_v20  ;;  %v1697_v52 = vmul.f32 0.0078125, %v1571_v54  ;;  %v1447_v59 = vpop.f32.mrf.mxu1  ;;  %v1573_v39 = vpop.xlane.xlu1 %1572  ;;  %v1824_v0 = vmul.f32 %v4494_v20, %v4494_v20 }
 0x2d3   : > { %1666 = vadd.xlane.f32.xlu1 %v4486_v40  ;;  %1912 = vadd.xlane.f32.xlu0 %v1836_v6  ;;  %v1448_v38 = vadd.f32 %v4176_v48, %v1447_v59  ;;  %v1698_v6 = vmul.f32 0.0078125, %v1573_v39  ;;  %v3537_v59 = vld [vmem:[%s3894_s11 + $0x190] sm:$0xff] }
 0x2d4   : > { %v1449_v11 = vpop.f32.mrf.mxu1  ;;  %v4503_v30 = vsub.f32 %v4255_v37, %v1697_v52 }
 0x2d5   : > { %v1597_v19 = vpop.xlane.xlu0 %1596  ;;  %v4506_v11 = vadd.f32 %v3537_v59, %v1448_v38  ;;  %v4516_v39 = vsub.f32 %v4260_v43, %v1698_v6 }
 0x2d6   : > { %v1710_v45 = vmul.f32 0.0078125, %v1597_v19  ;;  %v1450_v60 = vpop.f32.mrf.mxu1  ;;  %v1599_v54 = vpop.xlane.xlu1 %1598  ;;  %v1825_v20 = vmul.f32 %v4503_v30, %v4503_v30 }
 0x2d7   : > { %1914 = vadd.xlane.f32.xlu1 %v1837_v28  ;;  %1888 = vadd.xlane.f32.xlu0 %v1824_v0  ;;  %5808 = vst [vmem:[#allocation16_spill] sm:$0xff] %v4506_v11  ;;  %v1451_v8 = vadd.f32 %v4176_v48, %v1450_v60  ;;  %v1711_v18 = vmul.f32 0.0078125, %v1599_v54  ;;  %v3538_v0 = vld [vmem:[%s3894_s11 + $0x198] sm:$0xff]  ;;  %v1826_v43 = vmul.f32 %v4516_v39, %v4516_v39 }
 0x2d8   : > { %v1452_v58 = vpop.f32.mrf.mxu1  ;;  %v4512_v37 = vsub.f32 %v4264_v47, %v1710_v45 }
 0x2d9   : > { %v4519_v58 = vadd.f32 %v3538_v0, %v1451_v8  ;;  %v4524_v54 = vsub.f32 %v4270_v61, %v1711_v18  ;;  %v1601_v47 = vpop.xlane.xlu0 %1600 }
 0x2da   : > { %v1455_v52 = vpop.f32.mrf.mxu1  ;;  %v1575_v19 = vpop.xlane.xlu1 %1574  ;;  %v1838_v60 = vmul.f32 %v4512_v37, %v4512_v37  ;;  %v1712_v6 = vmul.f32 0.0078125, %v1601_v47 }
 0x2db   : > { %1668 = vadd.xlane.f32.xlu0 %v4506_v11  ;;  %1890 = vadd.xlane.f32.xlu1 %v1825_v20  ;;  %v1699_v38 = vmul.f32 0.0078125, %v1575_v19  ;;  %5809 = vst [vmem:[#allocation17_spill] sm:$0xff] %v4519_v58  ;;  %v1456_v8 = vadd.f32 %v4176_v48, %v1455_v52  ;;  %v1839_v19 = vmul.f32 %v4524_v54, %v4524_v54 }
 0x2dc   : > { %v1457_v28 = vpop.f32.mrf.mxu1 }
 0x2dd   : > { %v4533_v61 = vsub.f32 %v4279_v7, %v1699_v38 }
 0x2de   : > { %v1458_v45 = vpop.f32.mrf.mxu1  ;;  %v1603_v59 = vpop.xlane.xlu1 %1602 }
 0x2df   : > { %1670 = vadd.xlane.f32.xlu1 %v4519_v58  ;;  %1916 = vadd.xlane.f32.xlu0 %v1838_v60  ;;  %v1713_v28 = vmul.f32 0.0078125, %v1603_v59  ;;  %v1459_v60 = vadd.f32 %v4176_v48, %v1458_v45  ;;  %v1827_v47 = vmul.f32 %v4533_v61, %v4533_v61  ;;  %v4542_v58 = vsub.f32 %v4274_v1, %v1712_v6 }
 0x2e0   : > { %v1460_v20 = vpop.f32.mrf.mxu1  ;;  %v1605_v11 = vpop.xlane.xlu0 %1604 }
 0x2e1   : > { %v3539_v20 = vld [vmem:[%s3894_s11 + $0x1a0] sm:$0xff]  ;;  %v1714_v45 = vmul.f32 0.0078125, %v1605_v11  ;;  %v1840_v1 = vmul.f32 %v4542_v58, %v4542_v58 }
 0x2e2   : > { %v1463_v18 = vpop.f32.mrf.mxu1  ;;  %v4539_v52 = vadd.f32 %v3539_v20, %v1456_v8  ;;  %v3541_v20 = vld [vmem:[%s3894_s11 + $0x1b0] sm:$0xff] }
 0x2e3   : > { %1918 = vadd.xlane.f32.xlu1 %v1839_v19  ;;  %1892 = vadd.xlane.f32.xlu0 %v1826_v43  ;;  %v4546_v43 = vsub.f32 %v4284_v53, %v1713_v28  ;;  %v1464_v59 = vadd.f32 %v4176_v48, %v1463_v18  ;;  %v3540_v19 = vld [vmem:[%s3894_s11 + $0x1a8] sm:$0xff] }
 0x2e4   : > { %v1465_v0 = vpop.f32.mrf.mxu1  ;;  %v1607_v6 = vpop.xlane.xlu1 %1606 }
 0x2e5   : > { %5810 = vst [vmem:[#allocation18_spill] sm:$0xff] %v4546_v43  ;;  %v4550_v0 = vadd.f32 %v3540_v19, %v1459_v60  ;;  %v1841_v53 = vmul.f32 %v4546_v43, %v4546_v43  ;;  %v1715_v28 = vmul.f32 0.0078125, %v1607_v6  ;;  %v4559_v60 = vadd.f32 %v3541_v20, %v1464_v59  ;;  %v3542_v43 = vld [vmem:[%s3894_s11 + $0x1b8] sm:$0xff]  ;;  %v3543_v20 = vld [vmem:[%s3894_s11 + $0x1c0] sm:$0xff] }
 0x2e6   : > { %v1466_v7 = vpop.f32.mrf.mxu1 }
 0x2e7   : > { %1894 = vadd.xlane.f32.xlu1 %v1827_v47  ;;  %1672 = vadd.xlane.f32.xlu0 %v4539_v52  ;;  %5811 = vst [vmem:[#allocation19_spill] sm:$0xff] %v4550_v0  ;;  %v1467_v11 = vadd.f32 %v4176_v48, %v1466_v7  ;;  %v4572_v59 = vsub.f32 %v4293_v21, %v1715_v28 }
 0x2e8   : > { %v1468_v38 = vpop.f32.mrf.mxu1  ;;  %v1609_v18 = vpop.xlane.xlu0 %1608 }
 0x2e9   : > { %v4562_v38 = vsub.f32 %v4288_v15, %v1714_v45  ;;  %v4567_v6 = vadd.f32 %v3542_v43, %v1467_v11  ;;  %5813 = vst [vmem:[#allocation21_spill] sm:$0xff] %v4572_v59  ;;  %v1843_v11 = vmul.f32 %v4572_v59, %v4572_v59 }
 0x2ea   : > { %v1471_v8 = vpop.f32.mrf.mxu1 }
 0x2eb   : > { %1674 = vadd.xlane.f32.xlu1 %v4550_v0  ;;  %1920 = vadd.xlane.f32.xlu0 %v1840_v1  ;;  %5812 = vst [vmem:[#allocation20_spill] sm:$0xff] %v4562_v38  ;;  %v1716_v0 = vmul.f32 0.0078125, %v1609_v18  ;;  %v1842_v7 = vmul.f32 %v4562_v38, %v4562_v38 }
 0x2ec   : > { %v1473_v47 = vpop.f32.mrf.mxu1  ;;  %v1611_v15 = vpop.xlane.xlu1 %1610 }
 0x2ed   : > { %v1472_v47 = vadd.f32 %v4176_v48, %v1471_v8  ;;  %v4576_v18 = vsub.f32 %v4298_v51, %v1716_v0  ;;  %v1717_v8 = vmul.f32 0.0078125, %v1611_v15 }
 0x2ee   : > { %v1474_v19 = vpop.f32.mrf.mxu1 }
 0x2ef   : > { %1922 = vadd.xlane.f32.xlu1 %v1841_v53  ;;  %1676 = vadd.xlane.f32.xlu0 %v4559_v60  ;;  %5814 = vst [vmem:[#allocation22_spill] sm:$0xff] %v4576_v18  ;;  %v1475_v43 = vadd.f32 %v4176_v48, %v1474_v19  ;;  %v1844_v51 = vmul.f32 %v4576_v18, %v4576_v18 }
 0x2f0   : > { %v1476_v1 = vpop.f32.mrf.mxu1  ;;  %v1613_v21 = vpop.xlane.xlu0 %1612 }
 0x2f1   : > { %v4582_v1 = vadd.f32 %v3543_v20, %v1472_v47  ;;  %v1718_v0 = vmul.f32 0.0078125, %v1613_v21  ;;  %v4592_v47 = vsub.f32 %v4303_v31, %v1717_v8 }
 0x2f2   : > { %v1479_v45 = vpop.f32.mrf.mxu1 }
 0x2f3   : > { %1678 = vadd.xlane.f32.xlu1 %v4567_v6  ;;  %1924 = vadd.xlane.f32.xlu0 %v1842_v7  ;;  %v1480_v15 = vadd.f32 %v4176_v48, %v1479_v45  ;;  %5815 = vst [vmem:[#allocation23_spill] sm:$0xff] %v4592_v47  ;;  %v1845_v21 = vmul.f32 %v4592_v47, %v4592_v47  ;;  %v3545_v45 = vld [vmem:[%s3894_s11 + $0x1d0] sm:$0xff] }
 0x2f4   : > { %v1481_v53 = vpop.f32.mrf.mxu1  ;;  %v1615_v19 = vpop.xlane.xlu1 %1614 }
 0x2f5   : > { %v3544_v53 = vld [vmem:[%s3894_s11 + $0x1c8] sm:$0xff]  ;;  %v4599_v18 = vadd.f32 %v3545_v45, %v1480_v15 }
 0x2f6   : > { %v1482_v28 = vpop.f32.mrf.mxu1  ;;  %v4589_v38 = vadd.f32 %v3544_v53, %v1475_v43  ;;  %v4602_v43 = vsub.f32 %v4308_v36, %v1718_v0 }
 0x2f7   : > { %1926 = vadd.xlane.f32.xlu1 %v1843_v11  ;;  %1680 = vadd.xlane.f32.xlu0 %v4582_v1  ;;  %v1719_v11 = vmul.f32 0.0078125, %v1615_v19  ;;  %v1483_v59 = vadd.f32 %v4176_v48, %v1482_v28 }
 0x2f8   : > { %v1484_v7 = vpop.f32.mrf.mxu1  ;;  %5816 = vst [vmem:[#allocation24_spill] sm:$0xff] %v4602_v43  ;;  %v1617_v31 = vpop.xlane.xlu0 %1616  ;;  %v1846_v36 = vmul.f32 %v4602_v43, %v4602_v43 }
 0x2f9   : > { %v4606_v19 = vsub.f32 %v4313_v42, %v1719_v11  ;;  %v1720_v28 = vmul.f32 0.0078125, %v1617_v31  ;;  %v3547_v31 = vld [vmem:[%s3894_s11 + $0x1e0] sm:$0xff] }
 0x2fa   : > { %v1487_v20 = vpop.f32.mrf.mxu1 }
 0x2fb   : > { %1682 = vadd.xlane.f32.xlu1 %v4589_v38  ;;  %1928 = vadd.xlane.f32.xlu0 %v1844_v51  ;;  %5817 = vst [vmem:[#allocation25_spill] sm:$0xff] %v4606_v19  ;;  %v1488_v53 = vadd.f32 %v4176_v48, %v1487_v20  ;;  %v1847_v42 = vmul.f32 %v4606_v19, %v4606_v19 }
 0x2fc   : > { %v1489_v7 = vpop.f32.mrf.mxu1  ;;  %v1619_v0 = vpop.xlane.xlu1 %1618 }
 0x2fd   : > { %v3546_v7 = vld [vmem:[%s3894_s11 + $0x1d8] sm:$0xff]  ;;  %v1721_v11 = vmul.f32 0.0078125, %v1619_v0  ;;  %v3548_v0 = vld [vmem:[%s5751_s4] ss:$0 sm:$0xff] }
 0x2fe   : > { %v1490_v8 = vpop.f32.mrf.mxu1  ;;  %v4610_v47 = vadd.f32 %v3546_v7, %v1483_v59  ;;  %v4619_v59 = vadd.f32 %v3547_v31, %v1488_v53 }
 0x2ff   : > { %1930 = vadd.xlane.f32.xlu1 %v1845_v21  ;;  %1684 = vadd.xlane.f32.xlu0 %v4599_v18  ;;  %v1491_v45 = vadd.f32 %v4176_v48, %v1490_v8  ;;  %v3549_v8 = vld [vmem:[%s3894_s11 + $0x1e8] sm:$0xff] }
 0x300   : > { %v1492_v51 = vpop.f32.mrf.mxu1  ;;  %v1621_v20 = vpop.xlane.xlu0 %1620 }
 0x301   : > { %v4622_v51 = vsub.f32 %v4318_v56, %v1720_v28  ;;  %v4629_v43 = vadd.f32 %v3549_v8, %v1491_v45  ;;  %v4634_v28 = vsub.f32 %v4323_v63, %v1721_v11 }
 0x302   : > { %v1495_v15 = vpop.f32.mrf.mxu1 }
 0x303   : > { %1686 = vadd.xlane.f32.xlu1 %v4610_v47  ;;  %1932 = vadd.xlane.f32.xlu0 %v1846_v36  ;;  %5818 = vst [vmem:[#allocation26_spill] sm:$0xff] %v4622_v51  ;;  %v1722_v36 = vmul.f32 0.0078125, %v1621_v20  ;;  %v1496_v19 = vadd.f32 %v3548_v0, %v1495_v15  ;;  %v1848_v56 = vmul.f32 %v4622_v51, %v4622_v51 }
 0x304   : > { %v1497_v21 = vpop.f32.mrf.mxu1  ;;  %v1623_v48 = vpop.xlane.xlu1 %1622  ;;  %v1849_v45 = vmul.f32 %v4634_v28, %v4634_v28 }
 0x305   : > { %v4638_v20 = vsub.f32 %v4328_v10, %v1722_v36  ;;  %v3551_v36 = vld [vmem:[%s3894_s11 + $0x1f8] sm:$0xff] }
 0x306   : > { %v1498_v7 = vpop.f32.mrf.mxu1 }
 0x307   : > { %1934 = vadd.xlane.f32.xlu1 %v1847_v42  ;;  %1688 = vadd.xlane.f32.xlu0 %v4619_v59  ;;  %v1723_v42 = vmul.f32 0.0078125, %v1623_v48  ;;  %v1499_v15 = vadd.f32 %v3548_v0, %v1498_v7  ;;  %v1850_v11 = vmul.f32 %v4638_v20, %v4638_v20 }
 0x308   : > { %v1500_v21 = vpop.f32.mrf.mxu1  ;;  %v1625_v53 = vpop.xlane.xlu0 %1624 }
 0x309   : > { %v1724_v31 = vmul.f32 0.0078125, %v1625_v53  ;;  %v3550_v21 = vld [vmem:[%s3894_s11 + $0x1f0] sm:$0xff]  ;;  %v4649_v48 = vsub.f32 %v4333_v5, %v1723_v42  ;;  %v4652_v0 = vadd.f32 %v3551_v36, %v1499_v15 }
 0x30a   : > { %v4643_v8 = vadd.f32 %v3550_v21, %v1496_v19 }
 0x30b   : > { %1690 = vadd.xlane.f32.xlu1 %v4629_v43  ;;  %1936 = vadd.xlane.f32.xlu0 %v1848_v56  ;;  %v4655_v56 = vsub.f32 %v4338_v23, %v1724_v31  ;;  %v1851_v53 = vmul.f32 %v4649_v48, %v4649_v48 }
 0x30c   : > { %v1627_v51 = vpop.xlane.xlu1 %1626 }
 0x30d   : > { %v1725_v10 = vmul.f32 0.0078125, %v1627_v51  ;;  %v1852_v51 = vmul.f32 %v4655_v56, %v4655_v56 }
 0x30f   : > { %1938 = vadd.xlane.f32.xlu1 %v1849_v45  ;;  %1692 = vadd.xlane.f32.xlu0 %v4643_v8  ;;  %v4666_v42 = vsub.f32 %v4343_v27, %v1725_v10 }
 0x310   : > { %v1629_v63 = vpop.xlane.xlu0 %1628 }
 0x311   : > { %v1726_v7 = vmul.f32 0.0078125, %v1629_v63  ;;  %v1853_v21 = vmul.f32 %v4666_v42, %v4666_v42 }
 0x313   : > { %1694 = vadd.xlane.f32.xlu1 %v4652_v0  ;;  %1940 = vadd.xlane.f32.xlu0 %v1850_v11  ;;  %v4661_v45 = vsub.f32 %v4348_v35, %v1726_v7 }
 0x314   : > { %v1631_v19 = vpop.xlane.xlu1 %1630 }
 0x315   : > { %v1727_v5 = vmul.f32 0.0078125, %v1631_v19  ;;  %v1854_v35 = vmul.f32 %v4661_v45, %v4661_v45 }
 0x317   : > { %1942 = vadd.xlane.f32.xlu1 %v1851_v53  ;;  %1944 = vadd.xlane.f32.xlu0 %v1852_v51  ;;  %v4669_v15 = vsub.f32 %v4353_v44, %v1727_v5 }
 0x318   : > { %v1633_v23 = vpop.xlane.xlu0 %1632 }
 0x319   : > { %v1728_v31 = vmul.f32 0.0078125, %v1633_v23  ;;  %v1855_v10 = vmul.f32 %v4669_v15, %v4669_v15 }
 0x31b   : > { %v4676_v63 = vsub.f32 %v4358_v57, %v1728_v31  ;;  %1946 = vadd.xlane.f32.xlu1 %v1853_v21  ;;  %1948 = vadd.xlane.f32.xlu0 %v1854_v35 }
 0x31c   : > { %v1635_v27 = vpop.xlane.xlu1 %1634 }
 0x31d   : > { %v1729_v11 = vmul.f32 0.0078125, %v1635_v27  ;;  %v1856_v44 = vmul.f32 %v4676_v63, %v4676_v63 }
 0x31f   : > { %v4683_v7 = vsub.f32 %v4363_v4, %v1729_v11  ;;  %1950 = vadd.xlane.f32.xlu1 %v1855_v10  ;;  %1952 = vadd.xlane.f32.xlu0 %v1856_v44 }
 0x320   : > { %v1637_v36 = vpop.xlane.xlu0 %1636 }
 0x321   : > { %v1730_v19 = vmul.f32 0.0078125, %v1637_v36  ;;  %v1857_v57 = vmul.f32 %v4683_v7, %v4683_v7 }
 0x323   : > { %v4688_v53 = vsub.f32 %v4368_v14, %v1730_v19  ;;  %1954 = vadd.xlane.f32.xlu1 %v1857_v57 }
 0x324   : > { %v1639_v5 = vpop.xlane.xlu1 %1638 }
 0x325   : > { %v1731_v51 = vmul.f32 0.0078125, %v1639_v5  ;;  %v1858_v23 = vmul.f32 %v4688_v53, %v4688_v53 }
 0x327   : > { %v4693_v31 = vsub.f32 %v4373_v24, %v1731_v51  ;;  %1956 = vadd.xlane.f32.xlu0 %v1858_v23 }
 0x328   : > { %v1641_v4 = vpop.xlane.xlu0 %1640 }
 0x329   : > { %v1732_v21 = vmul.f32 0.0078125, %v1641_v4  ;;  %v1859_v35 = vmul.f32 %v4693_v31, %v4693_v31 }
 0x32b   : > { %v4698_v27 = vsub.f32 %v4378_v32, %v1732_v21  ;;  %1958 = vadd.xlane.f32.xlu1 %v1859_v35 }
 0x32c   : > { %v1643_v14 = vpop.xlane.xlu1 %1642 }
 0x32d   : > { %v1733_v11 = vmul.f32 0.0078125, %v1643_v14  ;;  %v1860_v10 = vmul.f32 %v4698_v27, %v4698_v27 }
 0x32f   : > { %v4703_v44 = vsub.f32 %v4383_v41, %v1733_v11  ;;  %1960 = vadd.xlane.f32.xlu0 %v1860_v10 }
 0x330   : > { %v1645_v24 = vpop.xlane.xlu0 %1644 }
 0x331   : > { %v1734_v36 = vmul.f32 0.0078125, %v1645_v24  ;;  %v1861_v19 = vmul.f32 %v4703_v44, %v4703_v44 }
 0x333   : > { %v4708_v57 = vsub.f32 %v4388_v55, %v1734_v36  ;;  %1962 = vadd.xlane.f32.xlu1 %v1861_v19 }
 0x334   : > { %v1647_v32 = vpop.xlane.xlu1 %1646 }
 0x335   : > { %5819 = vst [vmem:[#allocation27_spill] sm:$0xff] %v4708_v57  ;;  %v1735_v5 = vmul.f32 0.0078125, %v1647_v32  ;;  %v1862_v51 = vmul.f32 %v4708_v57, %v4708_v57 }
 0x337   : > { %v4713_v23 = vsub.f32 %v4393_v12, %v1735_v5  ;;  %1964 = vadd.xlane.f32.xlu0 %v1862_v51 }
 0x338   : > { %v1649_v41 = vpop.xlane.xlu0 %1648 }
 0x339   : > { %5820 = vst [vmem:[#allocation28_spill] sm:$0xff] %v4713_v23  ;;  %v1736_v4 = vmul.f32 0.0078125, %v1649_v41  ;;  %v1863_v21 = vmul.f32 %v4713_v23, %v4713_v23 }
 0x33b   : > { %v4718_v35 = vsub.f32 %v4398_v25, %v1736_v4  ;;  %1966 = vadd.xlane.f32.xlu1 %v1863_v21 }
 0x33c   : > { %v1651_v55 = vpop.xlane.xlu1 %1650  ;;  %v1897_v14 = vpop.xlane.xlu0 %1896 }
 0x33d   : > { %5821 = vst [vmem:[#allocation29_spill] sm:$0xff] %v4718_v35  ;;  %v1737_v11 = vmul.f32 0.0078125, %v1651_v55  ;;  %v2020_v10 = vmul.f32 0.007874016, %v1897_v14  ;;  %v1864_v24 = vmul.f32 %v4718_v35, %v4718_v35 }
 0x33f   : > { %v4723_v12 = vsub.f32 %v4406_v46, %v1737_v11  ;;  %3231 = vrsqrt.f32 %v2020_v10  ;;  %1968 = vadd.xlane.f32.xlu0 %v1864_v24  ;;  %vm2110_vm0 = vcmp.eq.f32.partialorder %v2020_v10, inf  ;;  %vm2112_vm1 = vcmp.eq.f32.partialorder %v2020_v10, 0.0 }
 0x340   : > { %v1899_v36 = vpop.xlane.xlu1 %1898  ;;  %v1653_v19 = vpop.xlane.xlu0 %1652 }
 0x341   : > { %5822 = vst [vmem:[#allocation30_spill] sm:$0xff] %v4723_v12  ;;  %v2021_v32 = vmul.f32 0.007874016, %v1899_v36  ;;  %v1738_v5 = vmul.f32 0.0078125, %v1653_v19  ;;  %v1865_v25 = vmul.f32 %v4723_v12, %v4723_v12 }
 0x343   : > { %3233 = vrsqrt.f32 %v2021_v32  ;;  %1970 = vadd.xlane.f32.xlu1 %v1865_v25  ;;  %v4728_v51 = vsub.f32 %v4418_v13, %v1738_v5  ;;  %vm2117_vm2 = vcmp.eq.f32.partialorder %v2021_v32, inf  ;;  %v2120_v35 = vand.u32 2147483648, %v2021_v32 }
 0x344   : > { %v1655_v41 = vpop.xlane.xlu1 %1654  ;;  %v1901_v4 = vpop.xlane.xlu0 %1900  ;;  %vm2119_vm3 = vcmp.eq.f32.partialorder %v2021_v32, 0.0 }
 0x345   : > { %5823 = vst [vmem:[#allocation31_spill] sm:$0xff] %v4728_v51  ;;  %v1739_v21 = vmul.f32 0.0078125, %v1655_v41  ;;  %v4730_v55 = vmul.f32 0.007874016, %v1901_v4  ;;  %v1866_v46 = vmul.f32 %v4728_v51, %v4728_v51 }
 0x347   : > { %v4735_v14 = vsub.f32 %v4426_v33, %v1739_v21  ;;  %3235 = vrsqrt.f32 %v4730_v55  ;;  %1972 = vadd.xlane.f32.xlu0 %v1866_v46  ;;  %vm2124_vm4 = vcmp.eq.f32.partialorder %v4730_v55, inf  ;;  %vm2126_vm5 = vcmp.eq.f32.partialorder %v4730_v55, 0.0 }
 0x348   : > { %v1903_v11 = vpop.xlane.xlu1 %1902  ;;  %v1657_v24 = vpop.xlane.xlu0 %1656 }
 0x349   : > { %5824 = vst [vmem:[#allocation32_spill] sm:$0xff] %v4735_v14  ;;  %v4738_v36 = vmul.f32 0.007874016, %v1903_v11  ;;  %v1740_v13 = vmul.f32 0.0078125, %v1657_v24  ;;  %v1867_v19 = vmul.f32 %v4735_v14, %v4735_v14  ;;  %v2113_v11 = vand.u32 2147483648, %v2020_v10 }
 0x34b   : > { %3237 = vrsqrt.f32 %v4738_v36  ;;  %1974 = vadd.xlane.f32.xlu1 %v1867_v19  ;;  %v4744_v25 = vsub.f32 %v4438_v2, %v1740_v13  ;;  %vm2131_vm6 = vcmp.eq.f32.partialorder %v4738_v36, inf  ;;  %vm2133_vm7 = vcmp.eq.f32.partialorder %v4738_v36, 0.0 }
 0x34c   : > { %v3232_v5 = vpop.eup %3231  ;;  %v1659_v33 = vpop.xlane.xlu1 %1658 }
 0x34d   : > { %5825 = vst [vmem:[#allocation33_spill] sm:$0xff] %v4744_v25  ;;  %v1905_v41 = vpop.xlane.xlu0 %1904  ;;  %v2109_v4 = vmul.f32 %v3232_v5, %v2020_v10  ;;  %v1741_v21 = vmul.f32 0.0078125, %v1659_v33  ;;  %v1868_v24 = vmul.f32 %v4744_v25, %v4744_v25  ;;  %v5835_v25 = vld [vmem:[#allocation16_spill] sm:$0xff] }
 0x34e   : > { %v4746_v46 = vmul.f32 0.007874016, %v1905_v41 }
 0x34f   : > { %v2111_v51 = vsel %vm2110_vm0, %v2020_v10, %v2109_v4  ;;  %v4751_v14 = vsub.f32 %v4446_v22, %v1741_v21  ;;  %1976 = vadd.xlane.f32.xlu0 %v1868_v24 }
 0x350   : > { %3239 = vrsqrt.f32 %v4746_v46  ;;  %v3234_v2 = vpop.eup %3233  ;;  %v2114_v13 = vsel %vm2112_vm1, %v2113_v11, %v2111_v51  ;;  %v1907_v19 = vpop.xlane.xlu1 %1906  ;;  %v4761_v51 = vld [vmem:[%s5752_s5] ss:$0 sm:$0xff]  ;;  %vm2138_vm8 = vcmp.eq.f32.partialorder %v4746_v46, inf  ;;  %vm2140_vm9 = vcmp.eq.f32.partialorder %v4746_v46, 0.0 }
 0x351   : > { %5826 = vst [vmem:[#allocation34_spill] sm:$0xff] %v4751_v14  ;;  %v1661_v5 = vpop.xlane.xlu0 %1660  ;;  %v2532_v33 = vadd.f32 1e-08, %v2114_v13  ;;  %v2116_v41 = vmul.f32 %v3234_v2, %v2021_v32  ;;  %v4754_v12 = vmul.f32 0.007874016, %v1907_v19  ;;  %v1869_v10 = vmul.f32 %v4751_v14, %v4751_v14 }
 0x352   : > { %v1742_v23 = vmul.f32 0.0078125, %v1661_v5 }
 0x353   : > { %3241 = vrcp.f32 %v2532_v33  ;;  %v2118_v22 = vsel %vm2117_vm2, %v2021_v32, %v2116_v41  ;;  %1978 = vadd.xlane.f32.xlu1 %v1869_v10  ;;  %v2127_v33 = vand.u32 2147483648, %v4730_v55  ;;  %v2666_v10 = vmul.f32 %v4761_v51, %v4401_v26 }
 0x354   : > { %v3236_v4 = vpop.eup %3235  ;;  %v2121_v21 = vsel %vm2119_vm3, %v2120_v35, %v2118_v22  ;;  %3243 = vrsqrt.f32 %v4754_v12  ;;  %v4765_v11 = vsub.f32 %v4458_v62, %v1742_v23  ;;  %v1663_v24 = vpop.xlane.xlu1 %1662  ;;  %v4783_v22 = vmul.f32 %v4761_v51, %v4411_v50 }
 0x355   : > { %v1909_v2 = vpop.xlane.xlu0 %1908  ;;  %v2533_v13 = vadd.f32 1e-08, %v2121_v21  ;;  %v2123_v19 = vmul.f32 %v3236_v4, %v4730_v55  ;;  %v1743_v5 = vmul.f32 0.0078125, %v1663_v24  ;;  %v2134_v26 = vand.u32 2147483648, %v4738_v36 }
 0x356   : > { %5827 = vst [vmem:[#allocation35_spill] sm:$0xff] %v4765_v11  ;;  %v4768_v32 = vmul.f32 0.007874016, %v1909_v2  ;;  %v1870_v35 = vmul.f32 %v4765_v11, %v4765_v11  ;;  %vm2145_vm10 = vcmp.eq.f32.partialorder %v4754_v12, inf  ;;  %vm2147_vm11 = vcmp.eq.f32.partialorder %v4754_v12, 0.0 }
 0x357   : > { %3245 = vrcp.f32 %v2533_v13  ;;  %v2125_v62 = vsel %vm2124_vm4, %v4730_v55, %v2123_v19  ;;  %v4777_v23 = vsub.f32 %v4466_v29, %v1743_v5  ;;  %v4788_v55 = vmul.f32 %v4761_v51, %v4421_v16 }
 0x358   : > { %v3238_v41 = vpop.eup %3237  ;;  %v2128_v4 = vsel %vm2126_vm5, %v2127_v33, %v2125_v62  ;;  %3247 = vrsqrt.f32 %v4768_v32  ;;  %1980 = vadd.xlane.f32.xlu0 %v1870_v35  ;;  %v1911_v21 = vpop.xlane.xlu1 %1910  ;;  %v4799_v5 = vmul.f32 %v4761_v51, %v4431_v49  ;;  %v4805_v35 = vmul.f32 %v4761_v51, %v4441_v9 }
 0x359   : > { %5828 = vst [vmem:[#allocation36_spill] sm:$0xff] %v4777_v23  ;;  %v1665_v24 = vpop.xlane.xlu0 %1664  ;;  %v2534_v29 = vadd.f32 1e-08, %v2128_v4  ;;  %v2130_v2 = vmul.f32 %v3238_v41, %v4738_v36  ;;  %v4791_v13 = vmul.f32 0.007874016, %v1911_v21  ;;  %v1871_v19 = vmul.f32 %v4777_v23, %v4777_v23 }
 0x35a   : > { %v1744_v50 = vmul.f32 0.0078125, %v1665_v24  ;;  %v2141_v9 = vand.u32 2147483648, %v4746_v46  ;;  %vm2152_vm12 = vcmp.eq.f32.partialorder %v4768_v32, inf  ;;  %vm2154_vm13 = vcmp.eq.f32.partialorder %v4768_v32, 0.0 }
 0x35b   : > { %3249 = vrcp.f32 %v2534_v29  ;;  %v2132_v16 = vsel %vm2131_vm6, %v4738_v36, %v2130_v2  ;;  %1982 = vadd.xlane.f32.xlu1 %v1871_v19  ;;  %v4816_v36 = vmul.f32 %v4761_v51, %v4451_v34  ;;  %v4829_v34 = vmul.f32 %v4761_v51, %v4461_v17 }
 0x35c   : > { %v2135_v62 = vsel %vm2133_vm7, %v2134_v26, %v2132_v16  ;;  %3251 = vrsqrt.f32 %v4791_v13  ;;  %v4809_v41 = vsub.f32 %v4478_v3, %v1744_v50  ;;  %v1667_v4 = vpop.xlane.xlu1 %1666  ;;  %v5831_v16 = vld [vmem:[#allocation12_spill] sm:$0xff]  ;;  %vm2159_vm14 = vcmp.eq.f32.partialorder %v4791_v13, inf }
 0x35d   : > { %v3240_v33 = vpop.eup %3239  ;;  %v1913_v49 = vpop.xlane.xlu0 %1912  ;;  %v2535_v21 = vadd.f32 1e-08, %v2135_v62  ;;  %v1745_v29 = vmul.f32 0.0078125, %v1667_v4  ;;  %v4838_v62 = vld [vmem:[%s5753_s6] ss:$0 sm:$0xff]  ;;  %v2162_v14 = vand.u32 2147483648, %v4791_v13 }
 0x35e   : > { %5829 = vst [vmem:[#allocation37_spill] sm:$0xff] %v4809_v41  ;;  %v2137_v24 = vmul.f32 %v3240_v33, %v4746_v46  ;;  %v4812_v2 = vmul.f32 0.007874016, %v1913_v49  ;;  %v1872_v3 = vmul.f32 %v4809_v41, %v4809_v41  ;;  %v4833_v33 = vmul.f32 %v4761_v51, %v5831_v16  ;;  %v5833_v41 = vld [vmem:[#allocation14_spill] sm:$0xff] }
 0x35f   : > { %3253 = vrcp.f32 %v2535_v21  ;;  %v4825_v50 = vsub.f32 %v4486_v40, %v1745_v29  ;;  %v5832_v21 = vld [vmem:[#allocation13_spill] sm:$0xff]  ;;  %v4849_v23 = vmul.f32 %v4761_v51, %v5833_v41  ;;  %vm2161_vm15 = vcmp.eq.f32.partialorder %v4791_v13, 0.0 }
 0x360   : > { %v2139_v26 = vsel %vm2138_vm8, %v4746_v46, %v2137_v24  ;;  %v3242_v19 = vpop.eup %3241  ;;  %3255 = vrsqrt.f32 %v4812_v2  ;;  %1984 = vadd.xlane.f32.xlu0 %v1872_v3  ;;  %v1915_v40 = vpop.xlane.xlu1 %1914  ;;  %v4843_v17 = vmul.f32 %v4761_v51, %v5832_v21  ;;  %vm2166_vm0 = vcmp.eq.f32.partialorder %v4812_v2, inf }
 0x361   : > { %5830 = vst [vmem:[#allocation38_spill] sm:$0xff] %v4825_v50  ;;  %v2142_v4 = vsel %vm2140_vm9, %v2141_v9, %v2139_v26  ;;  %v1889_v46 = vpop.xlane.xlu0 %1888  ;;  %v3244_v49 = vpop.eup %3243  ;;  %v2730_v24 = vmul.f32 %v3242_v19, %v2666_v10  ;;  %v4845_v16 = vmul.f32 0.007874016, %v1915_v40  ;;  %v1873_v3 = vmul.f32 %v4825_v50, %v4825_v50 }
 0x362   : > { %v2536_v29 = vadd.f32 1e-08, %v2142_v4  ;;  %v2144_v9 = vmul.f32 %v3244_v49, %v4754_v12  ;;  %v4852_v26 = vmul.f32 0.007874016, %v1889_v46  ;;  %v2148_v10 = vand.u32 2147483648, %v4754_v12  ;;  %v5834_v4 = vld [vmem:[#allocation15_spill] sm:$0xff] }
 0x363   : > { %v2800_v11 = vadd.f32 %v4838_v62, %v2730_v24  ;;  %v4861_v41 = vmul.f32 %v4761_v51, %v5834_v4  ;;  %1986 = vadd.xlane.f32.xlu1 %v1873_v3  ;;  %v4868_v24 = vmul.f32 %v4761_v51, %v4503_v30  ;;  %vm2168_vm1 = vcmp.eq.f32.partialorder %v4812_v2, 0.0 }
 0x364   : > { %3257 = vrcp.f32 %v2536_v29  ;;  %v3246_v19 = vpop.eup %3245  ;;  %v2146_v40 = vsel %vm2145_vm10, %v4754_v12, %v2144_v9  ;;  %v1891_v46 = vpop.xlane.xlu1 %1890  ;;  %v4879_v12 = vmul.f32 %v4761_v51, %v4516_v39  ;;  %vm2173_vm2 = vcmp.eq.f32.partialorder %v4845_v16, inf }
 0x365   : > { %3259 = vrsqrt.f32 %v4845_v16  ;;  %v1669_v49 = vpop.xlane.xlu0 %1668  ;;  %v3248_v21 = vpop.eup %3247  ;;  %2864 = vst [vmem:[%s4872_s20 + $0x20] sm:$0xff] %v2800_v11  ;;  %v2731_v29 = vmul.f32 %v3246_v19, %v4783_v22  ;;  %v2149_v9 = vsel %vm2147_vm11, %v2148_v10, %v2146_v40  ;;  %v4882_v30 = vmul.f32 0.007874016, %v1891_v46 }
 0x366   : > { %3261 = vrsqrt.f32 %v4852_v26  ;;  %v2537_v3 = vadd.f32 1e-08, %v2149_v9  ;;  %v2151_v4 = vmul.f32 %v3248_v21, %v4768_v32  ;;  %v2155_v11 = vand.u32 2147483648, %v4768_v32 }
 0x367   : > { %v2801_v50 = vadd.f32 %v4838_v62, %v2731_v29  ;;  %v1746_v22 = vmul.f32 0.0078125, %v1669_v49  ;;  %v4889_v19 = vmul.f32 %v4761_v51, %v4512_v37  ;;  %v4895_v29 = vmul.f32 %v4761_v51, %v4524_v54 }
 0x368   : > { %v3250_v10 = vpop.eup %3249  ;;  %3263 = vrcp.f32 %v2537_v3  ;;  %v2153_v39 = vsel %vm2152_vm12, %v4768_v32, %v2151_v4  ;;  %v1671_v40 = vpop.xlane.xlu1 %1670  ;;  %vm2175_vm3 = vcmp.eq.f32.partialorder %v4845_v16, 0.0  ;;  %vm2082_vm4 = vcmp.eq.f32.partialorder %v4852_v26, inf }
 0x369   : > { %v1917_v46 = vpop.xlane.xlu0 %1916  ;;  %v3252_v21 = vpop.eup %3251  ;;  %2865 = vst [vmem:[%s4872_s20 + $0x28] sm:$0xff] %v2801_v50  ;;  %v2732_v49 = vmul.f32 %v3250_v10, %v4788_v55  ;;  %v2156_v9 = vsel %vm2154_vm13, %v2155_v11, %v2153_v39  ;;  %3265 = vrsqrt.f32 %v4882_v30  ;;  %v1747_v32 = vmul.f32 0.0078125, %v1671_v40  ;;  %v5837_v10 = vld [vmem:[#allocation17_spill] sm:$0xff] }
 0x36a   : > { %v2538_v37 = vadd.f32 1e-08, %v2156_v9  ;;  %v2158_v3 = vmul.f32 %v3252_v21, %v4791_v13  ;;  %v4905_v54 = vsub.f32 %v5835_v25, %v1746_v22  ;;  %v4907_v50 = vmul.f32 0.007874016, %v1917_v46 }
 0x36b   : > { %v2802_v4 = vadd.f32 %v4838_v62, %v2732_v49  ;;  %v4912_v39 = vsub.f32 %v5837_v10, %v1747_v32  ;;  %v4916_v49 = vmul.f32 %v4761_v51, %v4542_v58  ;;  %vm2084_vm5 = vcmp.eq.f32.partialorder %v4852_v26, 0.0 }
 0x36c   : > { %5836 = vst [vmem:[#allocation12_spill] sm:$0xff] %v4905_v54  ;;  %v3254_v55 = vpop.eup %3253  ;;  %3267 = vrcp.f32 %v2538_v37  ;;  %v2160_v11 = vsel %vm2159_vm14, %v4791_v13, %v2158_v3  ;;  %v1919_v21 = vpop.xlane.xlu1 %1918  ;;  %v2169_v3 = vand.u32 2147483648, %v4812_v2  ;;  %v1874_v58 = vmul.f32 %v4905_v54, %v4905_v54 }
 0x36d   : > { %5838 = vst [vmem:[#allocation13_spill] sm:$0xff] %v4912_v39  ;;  %v1893_v40 = vpop.xlane.xlu0 %1892  ;;  %v3256_v9 = vpop.eup %3255  ;;  %2866 = vst [vmem:[%s4872_s20 + $0x30] sm:$0xff] %v2802_v4  ;;  %v2733_v25 = vmul.f32 %v3254_v55, %v4799_v5  ;;  %v2163_v22 = vsel %vm2161_vm15, %v2162_v14, %v2160_v11  ;;  %3269 = vrsqrt.f32 %v4907_v50  ;;  %v4928_v32 = vmul.f32 0.007874016, %v1919_v21 }
 0x36e   : > { %v2539_v46 = vadd.f32 1e-08, %v2163_v22  ;;  %v2165_v13 = vmul.f32 %v3256_v9, %v4812_v2  ;;  %v4931_v4 = vmul.f32 0.007874016, %v1893_v40  ;;  %v1875_v55 = vmul.f32 %v4912_v39, %v4912_v39  ;;  %1988 = vadd.xlane.f32.xlu0 %v1874_v58 }
 0x36f   : > { %v2803_v37 = vadd.f32 %v4838_v62, %v2733_v25  ;;  %v2176_v40 = vand.u32 2147483648, %v4845_v16  ;;  %vm2089_vm6 = vcmp.eq.f32.partialorder %v4882_v30, inf  ;;  %vm2091_vm7 = vcmp.eq.f32.partialorder %v4882_v30, 0.0 }
 0x370   : > { %3271 = vrcp.f32 %v2539_v46  ;;  %v2167_v5 = vsel %vm2166_vm0, %v4812_v2, %v2165_v13  ;;  %v1895_v11 = vpop.xlane.xlu1 %1894  ;;  %1990 = vadd.xlane.f32.xlu1 %v1875_v55  ;;  %vm2180_vm8 = vcmp.eq.f32.partialorder %v4907_v50, inf  ;;  %vm2182_vm9 = vcmp.eq.f32.partialorder %v4907_v50, 0.0 }
 0x371   : > { %v3258_v14 = vpop.eup %3257  ;;  %v1673_v10 = vpop.xlane.xlu0 %1672  ;;  %2867 = vst [vmem:[%s4872_s20 + $0x38] sm:$0xff] %v2803_v37  ;;  %v2170_v22 = vsel %vm2168_vm1, %v2169_v3, %v2167_v5  ;;  %3273 = vrsqrt.f32 %v4928_v32  ;;  %v2085_v3 = vand.u32 2147483648, %v4852_v26  ;;  %vm2187_vm10 = vcmp.eq.f32.partialorder %v4928_v32, inf }
 0x372   : > { %v3260_v9 = vpop.eup %3259  ;;  %v2734_v25 = vmul.f32 %v3258_v14, %v4805_v35  ;;  %v2540_v46 = vadd.f32 1e-08, %v2170_v22  ;;  %3275 = vrsqrt.f32 %v4931_v4  ;;  %v1748_v22 = vmul.f32 0.0078125, %v1673_v10 }
 0x373   : > { %v3262_v21 = vpop.eup %3261  ;;  %v2172_v2 = vmul.f32 %v3260_v9, %v4845_v16  ;;  %vm2189_vm11 = vcmp.eq.f32.partialorder %v4928_v32, 0.0  ;;  %vm2096_vm12 = vcmp.eq.f32.partialorder %v4931_v4, inf  ;;  %vm2098_vm13 = vcmp.eq.f32.partialorder %v4931_v4, 0.0 }
 0x374   : > { %v2804_v13 = vadd.f32 %v4838_v62, %v2734_v25  ;;  %v2081_v35 = vmul.f32 %v3262_v21, %v4852_v26  ;;  %3277 = vrcp.f32 %v2540_v46  ;;  %v1675_v58 = vpop.xlane.xlu1 %1674  ;;  %v4951_v25 = vmul.f32 0.007874016, %v1895_v11 }
 0x375   : > { %v2174_v37 = vsel %vm2173_vm2, %v4845_v16, %v2172_v2  ;;  %v1921_v14 = vpop.xlane.xlu0 %1920  ;;  %v3264_v5 = vpop.eup %3263  ;;  %v4955_v46 = vmul.f32 %v4761_v51, %v4533_v61  ;;  %v2092_v11 = vand.u32 2147483648, %v4882_v30  ;;  %v1749_v10 = vmul.f32 0.0078125, %v1675_v58 }
 0x376   : > { %2868 = vst [vmem:[%s4872_s20 + $0x40] sm:$0xff] %v2804_v13  ;;  %v2177_v55 = vsel %vm2175_vm3, %v2176_v40, %v2174_v37  ;;  %v2083_v9 = vsel %vm2082_vm4, %v4852_v26, %v2081_v35  ;;  %v3266_v21 = vpop.eup %3265  ;;  %v2735_v16 = vmul.f32 %v3264_v5, %v4816_v36  ;;  %3279 = vrsqrt.f32 %v4951_v25 }
 0x377   : > { %v2541_v2 = vadd.f32 1e-08, %v2177_v55  ;;  %v2086_v39 = vsel %vm2084_vm5, %v2085_v3, %v2083_v9  ;;  %v2088_v57 = vmul.f32 %v3266_v21, %v4882_v30  ;;  %v4970_v5 = vmul.f32 0.007874016, %v1921_v14 }
 0x378   : > { %v2528_v54 = vadd.f32 1e-08, %v2086_v39  ;;  %v2805_v26 = vadd.f32 %v4838_v62, %v2735_v16  ;;  %v1923_v61 = vpop.xlane.xlu1 %1922  ;;  %v4966_v39 = vsub.f32 %v4539_v52, %v1748_v22  ;;  %vm2103_vm14 = vcmp.eq.f32.partialorder %v4951_v25, inf }
 0x379   : > { %3281 = vrcp.f32 %v2541_v2  ;;  %v1677_v40 = vpop.xlane.xlu0 %1676  ;;  %v3268_v13 = vpop.eup %3267  ;;  %v2090_v36 = vsel %vm2089_vm6, %v4882_v30, %v2088_v57  ;;  %v4972_v55 = vmul.f32 0.007874016, %v1923_v61  ;;  %v2183_v57 = vand.u32 2147483648, %v4907_v50  ;;  %v5839_v30 = vld [vmem:[#allocation19_spill] sm:$0xff] }
 0x37a   : > { %3283 = vrcp.f32 %v2528_v54  ;;  %v3270_v35 = vpop.eup %3269  ;;  %2869 = vst [vmem:[%s4872_s20 + $0x48] sm:$0xff] %v2805_v26  ;;  %v2736_v37 = vmul.f32 %v3268_v13, %v4829_v34  ;;  %v2093_v3 = vsel %vm2091_vm7, %v2092_v11, %v2090_v36  ;;  %v4980_v9 = vsub.f32 %v5839_v30, %v1749_v10 }
 0x37b   : > { %v2529_v58 = vadd.f32 1e-08, %v2093_v3  ;;  %v2179_v54 = vmul.f32 %v3270_v35, %v4907_v50  ;;  %3285 = vrsqrt.f32 %v4970_v5  ;;  %v1876_v16 = vmul.f32 %v4966_v39, %v4966_v39 }
 0x37c   : > { %v2806_v52 = vadd.f32 %v4838_v62, %v2736_v37  ;;  %v1679_v34 = vpop.xlane.xlu1 %1678  ;;  %v2099_v35 = vand.u32 2147483648, %v4931_v4  ;;  %v1877_v37 = vmul.f32 %v4980_v9, %v4980_v9  ;;  %vm2105_vm15 = vcmp.eq.f32.partialorder %v4951_v25, 0.0 }
 0x37d   : > { %v1925_v14 = vpop.xlane.xlu0 %1924  ;;  %v3272_v22 = vpop.eup %3271  ;;  %3287 = vrcp.f32 %v2529_v58  ;;  %v2181_v21 = vsel %vm2180_vm8, %v4907_v50, %v2179_v54  ;;  %v2190_v50 = vand.u32 2147483648, %v4928_v32  ;;  %1992 = vadd.xlane.f32.xlu0 %v1876_v16  ;;  %v1751_v16 = vmul.f32 0.0078125, %v1679_v34 }
 0x37e   : > { %v3274_v2 = vpop.eup %3273  ;;  %2870 = vst [vmem:[%s4872_s20 + $0x50] sm:$0xff] %v2806_v52  ;;  %v2737_v26 = vmul.f32 %v3272_v22, %v4833_v33  ;;  %v2184_v11 = vsel %vm2182_vm9, %v2183_v57, %v2181_v21  ;;  %3289 = vrsqrt.f32 %v4972_v55  ;;  %v1750_v33 = vmul.f32 0.0078125, %v1677_v40  ;;  %1994 = vadd.xlane.f32.xlu1 %v1877_v37 }
 0x37f   : > { %v2542_v10 = vadd.f32 1e-08, %v2184_v11  ;;  %v2186_v61 = vmul.f32 %v3274_v2, %v4928_v32  ;;  %v3276_v13 = vpop.eup %3275  ;;  %v5002_v30 = vmul.f32 0.007874016, %v1925_v14  ;;  %vm2194_vm0 = vcmp.eq.f32.partialorder %v4970_v5, inf }
 0x380   : > { %v2807_v36 = vadd.f32 %v4838_v62, %v2737_v26  ;;  %v1927_v3 = vpop.xlane.xlu1 %1926  ;;  %v2095_v57 = vmul.f32 %v3276_v13, %v4931_v4  ;;  %v5009_v21 = vsub.f32 %v4559_v60, %v1750_v33  ;;  %vm2196_vm1 = vcmp.eq.f32.partialorder %v4970_v5, 0.0 }
 0x381   : > { %v1681_v58 = vpop.xlane.xlu0 %1680  ;;  %v3278_v54 = vpop.eup %3277  ;;  %3291 = vrcp.f32 %v2542_v10  ;;  %v2188_v52 = vsel %vm2187_vm10, %v4928_v32, %v2186_v61  ;;  %v5028_v33 = vmul.f32 0.007874016, %v1927_v3  ;;  %vm2201_vm2 = vcmp.eq.f32.partialorder %v4972_v55, inf }
 0x382   : > { %2871 = vst [vmem:[%s4872_s20 + $0x58] sm:$0xff] %v2807_v36  ;;  %v2738_v22 = vmul.f32 %v3278_v54, %v4843_v17  ;;  %v2191_v40 = vsel %vm2189_vm11, %v2190_v50, %v2188_v52  ;;  %v2097_v26 = vsel %vm2096_vm12, %v4931_v4, %v2095_v57  ;;  %3293 = vrsqrt.f32 %v5002_v30  ;;  %v5840_v57 = vld [vmem:[#allocation18_spill] sm:$0xff] }
 0x383   : > { %v2543_v2 = vadd.f32 1e-08, %v2191_v40  ;;  %v3280_v14 = vpop.eup %3279  ;;  %v2100_v32 = vsel %vm2098_vm13, %v2099_v35, %v2097_v26  ;;  %v2106_v50 = vand.u32 2147483648, %v4951_v25  ;;  %v5024_v36 = vsub.f32 %v4567_v6, %v1751_v16 }
 0x384   : > { %v2808_v17 = vadd.f32 %v4838_v62, %v2738_v22  ;;  %v1683_v60 = vpop.xlane.xlu1 %1682  ;;  %v2530_v10 = vadd.f32 1e-08, %v2100_v32  ;;  %v2102_v61 = vmul.f32 %v3280_v14, %v4951_v25  ;;  %v1878_v35 = vmul.f32 %v5009_v21, %v5009_v21 }
 0x385   : > { %v1929_v34 = vpop.xlane.xlu0 %1928  ;;  %3295 = vrcp.f32 %v2543_v2  ;;  %v1752_v52 = vmul.f32 0.0078125, %v1681_v58  ;;  %v1879_v14 = vmul.f32 %v5024_v36, %v5024_v36  ;;  %vm2203_vm3 = vcmp.eq.f32.partialorder %v4972_v55, 0.0 }
 0x386   : > { %v3282_v11 = vpop.eup %3281  ;;  %2872 = vst [vmem:[%s4872_s20 + $0x60] sm:$0xff] %v2808_v17  ;;  %3297 = vrcp.f32 %v2530_v10  ;;  %v2104_v54 = vsel %vm2103_vm14, %v4951_v25, %v2102_v61  ;;  %1996 = vadd.xlane.f32.xlu0 %v1878_v35  ;;  %v2197_v25 = vand.u32 2147483648, %v4970_v5  ;;  %v1753_v17 = vmul.f32 0.0078125, %v1683_v60 }
 0x387   : > { %v3284_v4 = vpop.eup %3283  ;;  %v2739_v13 = vmul.f32 %v3282_v11, %v4849_v23  ;;  %v5036_v23 = vmul.f32 %v4761_v51, %v5840_v57  ;;  %v2107_v22 = vsel %vm2105_vm15, %v2106_v50, %v2104_v54  ;;  %3299 = vrsqrt.f32 %v5028_v33  ;;  %1998 = vadd.xlane.f32.xlu1 %v1879_v14 }
 0x388   : > { %v2726_v37 = vmul.f32 %v3284_v4, %v4861_v41  ;;  %v1931_v41 = vpop.xlane.xlu1 %1930  ;;  %v3286_v40 = vpop.eup %3285  ;;  %v2531_v2 = vadd.f32 1e-08, %v2107_v22  ;;  %v5053_v10 = vsub.f32 %v4582_v1, %v1752_v52  ;;  %v5055_v61 = vmul.f32 0.007874016, %v1929_v34 }
 0x389   : > { %v2809_v6 = vadd.f32 %v4838_v62, %v2739_v13  ;;  %v1685_v3 = vpop.xlane.xlu0 %1684  ;;  %v2193_v26 = vmul.f32 %v3286_v40, %v4970_v5  ;;  %v2204_v13 = vand.u32 2147483648, %v4972_v55  ;;  %v5065_v34 = vmul.f32 0.007874016, %v1931_v41 }
 0x38a   : > { %v2796_v16 = vadd.f32 %v4838_v62, %v2726_v37  ;;  %v3288_v58 = vpop.eup %3287  ;;  %3301 = vrcp.f32 %v2531_v2  ;;  %v5070_v57 = vsub.f32 %v4589_v38, %v1753_v17  ;;  %v1880_v41 = vmul.f32 %v5053_v10, %v5053_v10  ;;  %v5842_v2 = vld [vmem:[#allocation21_spill] sm:$0xff] }
 0x38b   : > { %2873 = vst [vmem:[%s4872_s20 + $0x68] sm:$0xff] %v2809_v6  ;;  %v3290_v32 = vpop.eup %3289  ;;  %v2727_v11 = vmul.f32 %v3288_v58, %v4868_v24  ;;  %v2195_v50 = vsel %vm2194_vm0, %v4970_v5, %v2193_v26  ;;  %3303 = vrsqrt.f32 %v5055_v61  ;;  %v5841_v6 = vld [vmem:[#allocation20_spill] sm:$0xff]  ;;  %v5082_v58 = vmul.f32 %v4761_v51, %v5842_v2 }
 0x38c   : > { %2860 = vst [vmem:[%s4872_s20] sm:$0xff] %v2796_v16  ;;  %v2200_v4 = vmul.f32 %v3290_v32, %v4972_v55  ;;  %v1687_v60 = vpop.xlane.xlu1 %1686  ;;  %v2198_v1 = vsel %vm2196_vm1, %v2197_v25, %v2195_v50  ;;  %v5074_v22 = vmul.f32 %v4761_v51, %v5841_v6  ;;  %vm2208_vm4 = vcmp.eq.f32.partialorder %v5002_v30, inf  ;;  %2000 = vadd.xlane.f32.xlu0 %v1880_v41  ;;  %v5844_v41 = vld [vmem:[#allocation23_spill] sm:$0xff] }
 0x38d   : > { %v1933_v35 = vpop.xlane.xlu0 %1932  ;;  %v2797_v24 = vadd.f32 %v4838_v62, %v2727_v11  ;;  %v2544_v54 = vadd.f32 1e-08, %v2198_v1  ;;  %v2211_v14 = vand.u32 2147483648, %v5002_v30  ;;  %v1754_v32 = vmul.f32 0.0078125, %v1685_v3 }
 0x38e   : > { %v3292_v37 = vpop.eup %3291  ;;  %v2202_v52 = vsel %vm2201_vm2, %v4972_v55, %v2200_v4  ;;  %v1881_v11 = vmul.f32 %v5070_v57, %v5070_v57  ;;  %v1755_v50 = vmul.f32 0.0078125, %v1687_v60  ;;  %vm2210_vm5 = vcmp.eq.f32.partialorder %v5002_v30, 0.0 }
 0x38f   : > { %2861 = vst [vmem:[%s4872_s20 + $0x8] sm:$0xff] %v2797_v24  ;;  %v2740_v5 = vmul.f32 %v3292_v37, %v4889_v19  ;;  %v2205_v40 = vsel %vm2203_vm3, %v2204_v13, %v2202_v52  ;;  %v3294_v16 = vpop.eup %3293  ;;  %3305 = vrcp.f32 %v2544_v54  ;;  %v5095_v24 = vmul.f32 0.007874016, %v1933_v35  ;;  %v5843_v37 = vld [vmem:[#allocation22_spill] sm:$0xff] }
 0x390   : > { %v2545_v38 = vadd.f32 1e-08, %v2205_v40  ;;  %v1935_v55 = vpop.xlane.xlu1 %1934  ;;  %v2207_v19 = vmul.f32 %v3294_v16, %v5002_v30  ;;  %3307 = vrsqrt.f32 %v5065_v34  ;;  %v5099_v54 = vmul.f32 %v4761_v51, %v5843_v37  ;;  %2002 = vadd.xlane.f32.xlu1 %v1881_v11  ;;  %v5846_v11 = vld [vmem:[#allocation25_spill] sm:$0xff] }
 0x391   : > { %v1689_v26 = vpop.xlane.xlu0 %1688  ;;  %v2810_v25 = vadd.f32 %v4838_v62, %v2740_v5  ;;  %v5102_v52 = vsub.f32 %v4599_v18, %v1754_v32  ;;  %v5104_v60 = vmul.f32 0.007874016, %v1935_v55  ;;  %v5111_v16 = vmul.f32 %v4761_v51, %v5844_v41 }
 0x392   : > { %v3296_v17 = vpop.eup %3295  ;;  %3309 = vrcp.f32 %v2545_v38  ;;  %v2209_v13 = vsel %vm2208_vm4, %v5002_v30, %v2207_v19  ;;  %v5115_v2 = vsub.f32 %v4610_v47, %v1755_v50  ;;  %v1756_v38 = vmul.f32 0.0078125, %v1689_v26 }
 0x393   : > { %2874 = vst [vmem:[%s4872_s20 + $0x70] sm:$0xff] %v2810_v25  ;;  %v2741_v4 = vmul.f32 %v3296_v17, %v4895_v29  ;;  %v3298_v1 = vpop.eup %3297  ;;  %v2212_v3 = vsel %vm2210_vm5, %v2211_v14, %v2209_v13  ;;  %3311 = vrsqrt.f32 %v5095_v24  ;;  %vm2215_vm6 = vcmp.eq.f32.partialorder %v5028_v33, inf  ;;  %v5845_v17 = vld [vmem:[#allocation24_spill] sm:$0xff] }
 0x394   : > { %v1691_v29 = vpop.xlane.xlu1 %1690  ;;  %v3300_v5 = vpop.eup %3299  ;;  %v2728_v35 = vmul.f32 %v3298_v1, %v4879_v12  ;;  %v2546_v40 = vadd.f32 1e-08, %v2212_v3  ;;  %v2218_v12 = vand.u32 2147483648, %v5028_v33  ;;  %vm2217_vm7 = vcmp.eq.f32.partialorder %v5028_v33, 0.0 }
 0x395   : > { %v1937_v6 = vpop.xlane.xlu0 %1936  ;;  %v2811_v30 = vadd.f32 %v4838_v62, %v2741_v4  ;;  %v2214_v18 = vmul.f32 %v3300_v5, %v5028_v33  ;;  %v1882_v14 = vmul.f32 %v5102_v52, %v5102_v52  ;;  %v5128_v32 = vmul.f32 %v4761_v51, %v5845_v17 }
 0x396   : > { %v2798_v55 = vadd.f32 %v4838_v62, %v2728_v35  ;;  %3313 = vrcp.f32 %v2546_v40  ;;  %v5132_v50 = vmul.f32 %v4761_v51, %v5846_v11  ;;  %v5137_v37 = vsub.f32 %v4619_v59, %v1756_v38 }
 0x397   : > { %2875 = vst [vmem:[%s4872_s20 + $0x78] sm:$0xff] %v2811_v30  ;;  %v3302_v25 = vpop.eup %3301  ;;  %v2216_v19 = vsel %vm2215_vm6, %v5028_v33, %v2214_v18  ;;  %3315 = vrsqrt.f32 %v5104_v60  ;;  %2004 = vadd.xlane.f32.xlu0 %v1882_v14  ;;  %v1883_v3 = vmul.f32 %v5115_v2, %v5115_v2  ;;  %v1757_v5 = vmul.f32 0.0078125, %v1691_v29 }
 0x398   : > { %v1939_v47 = vpop.xlane.xlu1 %1938  ;;  %2862 = vst [vmem:[%s4872_s20 + $0x10] sm:$0xff] %v2798_v55  ;;  %v2729_v4 = vmul.f32 %v3302_v25, %v4955_v46  ;;  %v2219_v13 = vsel %vm2217_vm7, %v2218_v12, %v2216_v19  ;;  %v3304_v33 = vpop.eup %3303  ;;  %v5143_v40 = vmul.f32 0.007874016, %v1937_v6  ;;  %vm2222_vm8 = vcmp.eq.f32.partialorder %v5055_v61, inf  ;;  %v5847_v25 = vld [vmem:[#allocation26_spill] sm:$0xff] }
 0x399   : > { %v1693_v26 = vpop.xlane.xlu0 %1692  ;;  %v2547_v1 = vadd.f32 1e-08, %v2219_v13  ;;  %v2221_v35 = vmul.f32 %v3304_v33, %v5055_v61  ;;  %v5145_v41 = vmul.f32 0.007874016, %v1939_v47  ;;  %v2225_v46 = vand.u32 2147483648, %v5055_v61  ;;  %2006 = vadd.xlane.f32.xlu1 %v1883_v3 }
 0x39a   : > { %v2799_v30 = vadd.f32 %v4838_v62, %v2729_v4  ;;  %v1884_v59 = vmul.f32 %v5137_v37, %v5137_v37  ;;  %vm2224_vm9 = vcmp.eq.f32.partialorder %v5055_v61, 0.0  ;;  %v5155_v6 = vsub.f32 %v4629_v43, %v1757_v5 }
 0x39b   : > { %3317 = vrcp.f32 %v2547_v1  ;;  %v2223_v55 = vsel %vm2222_vm8, %v5055_v61, %v2221_v35  ;;  %v5160_v19 = vmul.f32 %v4761_v51, %v5847_v25  ;;  %v5164_v14 = vmul.f32 %v4761_v51, %v4634_v28 }
 0x39c   : > { %v1695_v18 = vpop.xlane.xlu1 %1694  ;;  %v3306_v29 = vpop.eup %3305  ;;  %2863 = vst [vmem:[%s4872_s20 + $0x18] sm:$0xff] %v2799_v30  ;;  %3319 = vrsqrt.f32 %v5143_v40  ;;  %v2226_v17 = vsel %vm2224_vm9, %v2225_v46, %v2223_v55  ;;  %2008 = vadd.xlane.f32.xlu0 %v1884_v59  ;;  %vm2229_vm10 = vcmp.eq.f32.partialorder %v5065_v34, inf  ;;  %vm2231_vm11 = vcmp.eq.f32.partialorder %v5065_v34, 0.0 }
 0x39d   : > { %v1941_v38 = vpop.xlane.xlu0 %1940  ;;  %v3308_v12 = vpop.eup %3307  ;;  %v2742_v47 = vmul.f32 %v3306_v29, %v4916_v49  ;;  %v2548_v61 = vadd.f32 1e-08, %v2226_v17  ;;  %3321 = vrsqrt.f32 %v5145_v41  ;;  %v2232_v28 = vand.u32 2147483648, %v5065_v34 }
 0x39e   : > { %v2228_v43 = vmul.f32 %v3308_v12, %v5065_v34  ;;  %v1758_v1 = vmul.f32 0.0078125, %v1693_v26  ;;  %v1885_v3 = vmul.f32 %v5155_v6, %v5155_v6  ;;  %v5179_v59 = vmul.f32 0.007874016, %v1941_v38 }
 0x39f   : > { %v3310_v11 = vpop.eup %3309  ;;  %v2812_v4 = vadd.f32 %v4838_v62, %v2742_v47  ;;  %3323 = vrcp.f32 %v2548_v61  ;;  %vm2236_vm12 = vcmp.eq.f32.partialorder %v5095_v24, inf  ;;  %vm2238_vm13 = vcmp.eq.f32.partialorder %v5095_v24, 0.0 }
 0x3a0   : > { %v2743_v13 = vmul.f32 %v3310_v11, %v5036_v23  ;;  %v1943_v49 = vpop.xlane.xlu1 %1942  ;;  %v2230_v33 = vsel %vm2229_vm10, %v5065_v34, %v2228_v43  ;;  %v3312_v30 = vpop.eup %3311  ;;  %v1759_v23 = vmul.f32 0.0078125, %v1695_v18  ;;  %v5183_v12 = vsub.f32 %v4643_v8, %v1758_v1  ;;  %2010 = vadd.xlane.f32.xlu1 %v1885_v3 }
 0x3a1   : > { %v1945_v5 = vpop.xlane.xlu0 %1944  ;;  %2876 = vst [vmem:[%s4872_s20 + $0x80] sm:$0xff] %v2812_v4  ;;  %v2233_v46 = vsel %vm2231_vm11, %v2232_v28, %v2230_v33  ;;  %v2235_v55 = vmul.f32 %v3312_v30, %v5095_v24  ;;  %v5185_v34 = vmul.f32 0.007874016, %v1943_v49  ;;  %v2239_v25 = vand.u32 2147483648, %v5095_v24 }
 0x3a2   : > { %v2813_v35 = vadd.f32 %v4838_v62, %v2743_v13  ;;  %v2549_v29 = vadd.f32 1e-08, %v2233_v46  ;;  %3325 = vrsqrt.f32 %v5179_v59  ;;  %v5195_v17 = vsub.f32 %v4652_v0, %v1759_v23 }
 0x3a3   : > { %v3314_v26 = vpop.eup %3313  ;;  %v2237_v8 = vsel %vm2236_vm12, %v5095_v24, %v2235_v55  ;;  %vm2243_vm14 = vcmp.eq.f32.partialorder %v5104_v60, inf  ;;  %v2246_v43 = vand.u32 2147483648, %v5104_v60  ;;  %v5206_v0 = vmul.f32 %v4761_v51, %v4638_v20 }
 0x3a4   : > { %2877 = vst [vmem:[%s4872_s20 + $0x88] sm:$0xff] %v2813_v35  ;;  %v1947_v18 = vpop.xlane.xlu1 %1946  ;;  %v3316_v38 = vpop.eup %3315  ;;  %v2744_v47 = vmul.f32 %v3314_v26, %v5074_v22  ;;  %3327 = vrcp.f32 %v2549_v29  ;;  %v2240_v11 = vsel %vm2238_vm13, %v2239_v25, %v2237_v8  ;;  %v1886_v22 = vmul.f32 %v5183_v12, %v5183_v12 }
 0x3a5   : > { %v2242_v61 = vmul.f32 %v3316_v38, %v5104_v60  ;;  %v2550_v13 = vadd.f32 1e-08, %v2240_v11  ;;  %3329 = vrsqrt.f32 %v5185_v34  ;;  %v1949_v24 = vpop.xlane.xlu0 %1948  ;;  %v5210_v28 = vmul.f32 %v4761_v51, %v4649_v48 }
 0x3a6   : > { %v2814_v4 = vadd.f32 %v4838_v62, %v2744_v47  ;;  %vm2245_vm15 = vcmp.eq.f32.partialorder %v5104_v60, 0.0  ;;  %2012 = vadd.xlane.f32.xlu0 %v1886_v22  ;;  %v5215_v30 = vmul.f32 0.007874016, %v1945_v5  ;;  %v1887_v20 = vmul.f32 %v5195_v17, %v5195_v17 }
 0x3a7   : > { %v2244_v49 = vsel %vm2243_vm14, %v5104_v60, %v2242_v61  ;;  %3331 = vrcp.f32 %v2550_v13  ;;  %v5220_v23 = vmul.f32 0.007874016, %v1947_v18  ;;  %v5222_v29 = vmul.f32 0.007874016, %v1949_v24 }
 0x3a8   : > { %v1951_v33 = vpop.xlane.xlu1 %1950  ;;  %v3318_v1 = vpop.eup %3317  ;;  %2878 = vst [vmem:[%s4872_s20 + $0x90] sm:$0xff] %v2814_v4  ;;  %v2247_v3 = vsel %vm2245_vm15, %v2246_v43, %v2244_v49  ;;  %v5226_v60 = vmul.f32 %v4761_v51, %v4655_v56  ;;  %v5230_v5 = vmul.f32 %v4761_v51, %v4666_v42  ;;  %3333 = vrsqrt.f32 %v5215_v30  ;;  %2014 = vadd.xlane.f32.xlu1 %v1887_v20 }
 0x3a9   : > { %v3320_v35 = vpop.eup %3319  ;;  %v2745_v46 = vmul.f32 %v3318_v1, %v5082_v58  ;;  %v2551_v48 = vadd.f32 1e-08, %v2247_v3  ;;  %vm2250_vm0 = vcmp.eq.f32.partialorder %v5143_v40, inf  ;;  %v2253_v25 = vand.u32 2147483648, %v5143_v40  ;;  %v1953_v51 = vpop.xlane.xlu0 %1952 }
 0x3aa   : > { %v2249_v55 = vmul.f32 %v3320_v35, %v5143_v40  ;;  %v3322_v58 = vpop.eup %3321  ;;  %vm2252_vm1 = vcmp.eq.f32.partialorder %v5143_v40, 0.0  ;;  %vm2257_vm2 = vcmp.eq.f32.partialorder %v5145_v41, inf  ;;  %v2260_v47 = vand.u32 2147483648, %v5145_v41 }
 0x3ab   : > { %v2815_v26 = vadd.f32 %v4838_v62, %v2745_v46  ;;  %3335 = vrcp.f32 %v2551_v48  ;;  %v2256_v42 = vmul.f32 %v3322_v58, %v5145_v41  ;;  %vm2259_vm3 = vcmp.eq.f32.partialorder %v5145_v41, 0.0 }
 0x3ac   : > { %v2251_v56 = vsel %vm2250_vm0, %v5143_v40, %v2249_v55  ;;  %3337 = vrsqrt.f32 %v5220_v23  ;;  %v3324_v18 = vpop.eup %3323  ;;  %v1955_v8 = vpop.xlane.xlu1 %1954  ;;  %vm2264_vm4 = vcmp.eq.f32.partialorder %v5179_v59, inf  ;;  %v5249_v4 = vmul.f32 0.007874016, %v1951_v33 }
 0x3ad   : > { %2879 = vst [vmem:[%s4872_s20 + $0x98] sm:$0xff] %v2815_v26  ;;  %v2254_v38 = vsel %vm2252_vm1, %v2253_v25, %v2251_v56  ;;  %3339 = vrsqrt.f32 %v5222_v29  ;;  %v2746_v11 = vmul.f32 %v3324_v18, %v5099_v54  ;;  %v2258_v40 = vsel %vm2257_vm2, %v5145_v41, %v2256_v42 }
 0x3ae   : > { %v2552_v61 = vadd.f32 1e-08, %v2254_v38  ;;  %v2261_v43 = vsel %vm2259_vm3, %v2260_v47, %v2258_v40  ;;  %v5251_v13 = vmul.f32 0.007874016, %v1953_v51  ;;  %v5254_v1 = vmul.f32 0.007874016, %v1955_v8 }
 0x3af   : > { %v3326_v22 = vpop.eup %3325  ;;  %v2816_v24 = vadd.f32 %v4838_v62, %v2746_v11  ;;  %v2553_v49 = vadd.f32 1e-08, %v2261_v43  ;;  %vm2266_vm5 = vcmp.eq.f32.partialorder %v5179_v59, 0.0  ;;  %v2267_v41 = vand.u32 2147483648, %v5179_v59 }
 0x3b0   : > { %3341 = vrcp.f32 %v2552_v61  ;;  %v2263_v3 = vmul.f32 %v3326_v22, %v5179_v59  ;;  %vm2271_vm6 = vcmp.eq.f32.partialorder %v5185_v34, inf  ;;  %vm2273_vm7 = vcmp.eq.f32.partialorder %v5185_v34, 0.0  ;;  %v1957_v48 = vpop.xlane.xlu0 %1956 }
 0x3b1   : > { %v3328_v54 = vpop.eup %3327  ;;  %3343 = vrsqrt.f32 %v5249_v4  ;;  %2880 = vst [vmem:[%s4872_s20 + $0xa0] sm:$0xff] %v2816_v24  ;;  %v2274_v46 = vand.u32 2147483648, %v5185_v34  ;;  %vm2278_vm8 = vcmp.eq.f32.partialorder %v5215_v30, inf  ;;  %vm2280_vm9 = vcmp.eq.f32.partialorder %v5215_v30, 0.0 }
 0x3b2   : > { %v2747_v33 = vmul.f32 %v3328_v54, %v5111_v16  ;;  %3345 = vrcp.f32 %v2553_v49  ;;  %v3330_v20 = vpop.eup %3329  ;;  %v2265_v35 = vsel %vm2264_vm4, %v5179_v59, %v2263_v3  ;;  %v2281_v59 = vand.u32 2147483648, %v5215_v30 }
 0x3b3   : > { %3347 = vrsqrt.f32 %v5251_v13  ;;  %v2268_v55 = vsel %vm2266_vm5, %v2267_v41, %v2265_v35  ;;  %v2270_v58 = vmul.f32 %v3330_v20, %v5185_v34  ;;  %vm2285_vm10 = vcmp.eq.f32.partialorder %v5220_v23, inf }
 0x3b4   : > { %v2817_v16 = vadd.f32 %v4838_v62, %v2747_v33  ;;  %3349 = vrsqrt.f32 %v5254_v1  ;;  %v1959_v26 = vpop.xlane.xlu1 %1958  ;;  %v3332_v25 = vpop.eup %3331  ;;  %v2554_v56 = vadd.f32 1e-08, %v2268_v55  ;;  %vm2287_vm11 = vcmp.eq.f32.partialorder %v5220_v23, 0.0 }
 0x3b5   : > { %v2748_v42 = vmul.f32 %v3332_v25, %v5128_v32  ;;  %v2272_v51 = vsel %vm2271_vm6, %v5185_v34, %v2270_v58  ;;  %v5282_v18 = vmul.f32 0.007874016, %v1957_v48  ;;  %v3334_v38 = vpop.eup %3333  ;;  %v2288_v8 = vand.u32 2147483648, %v5220_v23 }
 0x3b6   : > { %2881 = vst [vmem:[%s4872_s20 + $0xa8] sm:$0xff] %v2817_v16  ;;  %3351 = vrcp.f32 %v2554_v56  ;;  %v2275_v47 = vsel %vm2273_vm7, %v2274_v46, %v2272_v51  ;;  %v5287_v11 = vmul.f32 0.007874016, %v1959_v26  ;;  %v2277_v43 = vmul.f32 %v3334_v38, %v5215_v30 }
 0x3b7   : > { %v2818_v32 = vadd.f32 %v4838_v62, %v2748_v42  ;;  %v2555_v40 = vadd.f32 1e-08, %v2275_v47  ;;  %3353 = vrsqrt.f32 %v5282_v18  ;;  %vm2292_vm12 = vcmp.eq.f32.partialorder %v5222_v29, inf }
 0x3b8   : > { %v3336_v61 = vpop.eup %3335  ;;  %vm2294_vm13 = vcmp.eq.f32.partialorder %v5222_v29, 0.0  ;;  %v2295_v34 = vand.u32 2147483648, %v5222_v29  ;;  %v2279_v54 = vsel %vm2278_vm8, %v5215_v30, %v2277_v43  ;;  %vm2299_vm14 = vcmp.eq.f32.partialorder %v5249_v4, inf  ;;  %v1961_v41 = vpop.xlane.xlu0 %1960 }
 0x3b9   : > { %v3338_v22 = vpop.eup %3337  ;;  %v2749_v24 = vmul.f32 %v3336_v61, %v5132_v50  ;;  %2882 = vst [vmem:[%s4872_s20 + $0xb0] sm:$0xff] %v2818_v32  ;;  %3355 = vrcp.f32 %v2555_v40  ;;  %v2282_v33 = vsel %vm2280_vm9, %v2281_v59, %v2279_v54  ;;  %vm2301_vm15 = vcmp.eq.f32.partialorder %v5249_v4, 0.0 }
 0x3ba   : > { %v3340_v49 = vpop.eup %3339  ;;  %v2284_v3 = vmul.f32 %v3338_v22, %v5220_v23  ;;  %3357 = vrsqrt.f32 %v5287_v11  ;;  %v2556_v46 = vadd.f32 1e-08, %v2282_v33  ;;  %v2302_v16 = vand.u32 2147483648, %v5249_v4 }
 0x3bb   : > { %v2819_v50 = vadd.f32 %v4838_v62, %v2749_v24  ;;  %v2291_v20 = vmul.f32 %v3340_v49, %v5222_v29  ;;  %v5318_v58 = vmul.f32 0.007874016, %v1961_v41  ;;  %vm2306_vm0 = vcmp.eq.f32.partialorder %v5251_v13, inf }
 0x3bc   : > { %v1963_v35 = vpop.xlane.xlu1 %1962  ;;  %v2286_v48 = vsel %vm2285_vm10, %v5220_v23, %v2284_v3  ;;  %3359 = vrcp.f32 %v2556_v46  ;;  %vm2308_vm1 = vcmp.eq.f32.partialorder %v5251_v13, 0.0  ;;  %v2309_v43 = vand.u32 2147483648, %v5251_v13 }
 0x3bd   : > { %v3342_v55 = vpop.eup %3341  ;;  %2883 = vst [vmem:[%s4872_s20 + $0xb8] sm:$0xff] %v2819_v50  ;;  %v2289_v62 = vsel %vm2287_vm11, %v2288_v8, %v2286_v48  ;;  %v2293_v30 = vsel %vm2292_vm12, %v5222_v29, %v2291_v20  ;;  %v5320_v26 = vmul.f32 0.007874016, %v1963_v35  ;;  %3361 = vrsqrt.f32 %v5318_v58  ;;  %v5331_v8 = vld [vmem:[%s5753_s6] ss:$0 sm:$0xff] }
 0x3be   : > { %v3344_v25 = vpop.eup %3343  ;;  %v2750_v56 = vmul.f32 %v3342_v55, %v5160_v19  ;;  %v2557_v59 = vadd.f32 1e-08, %v2289_v62  ;;  %v2296_v42 = vsel %vm2294_vm13, %v2295_v34, %v2293_v30  ;;  %vm2313_vm2 = vcmp.eq.f32.partialorder %v5254_v1, inf }
 0x3bf   : > { %v3346_v51 = vpop.eup %3345  ;;  %v2558_v38 = vadd.f32 1e-08, %v2296_v42  ;;  %v2298_v23 = vmul.f32 %v3344_v25, %v5249_v4  ;;  %v2316_v3 = vand.u32 2147483648, %v5254_v1  ;;  %vm2315_vm3 = vcmp.eq.f32.partialorder %v5254_v1, 0.0 }
 0x3c0   : > { %v3348_v47 = vpop.eup %3347  ;;  %v2820_v19 = vadd.f32 %v5331_v8, %v2750_v56  ;;  %v2751_v29 = vmul.f32 %v3346_v51, %v5164_v14  ;;  %3363 = vrcp.f32 %v2557_v59  ;;  %v1965_v22 = vpop.xlane.xlu0 %1964  ;;  %vm2320_vm4 = vcmp.eq.f32.partialorder %v5282_v18, inf }
 0x3c1   : > { %v3350_v61 = vpop.eup %3349  ;;  %3365 = vrcp.f32 %v2558_v38  ;;  %v2300_v32 = vsel %vm2299_vm14, %v5249_v4, %v2298_v23  ;;  %v2305_v40 = vmul.f32 %v3348_v47, %v5251_v13  ;;  %v5357_v33 = vmul.f32 0.007874016, %v1965_v22 }
 0x3c2   : > { %2884 = vst [vmem:[%s4872_s20 + $0xc0] sm:$0xff] %v2820_v19  ;;  %v2821_v24 = vadd.f32 %v5331_v8, %v2751_v29  ;;  %v2303_v14 = vsel %vm2301_vm15, %v2302_v16, %v2300_v32  ;;  %v2312_v34 = vmul.f32 %v3350_v61, %v5254_v1  ;;  %3367 = vrsqrt.f32 %v5320_v26 }
 0x3c3   : > { %v2559_v49 = vadd.f32 1e-08, %v2303_v14  ;;  %v2307_v54 = vsel %vm2306_vm0, %v5251_v13, %v2305_v40  ;;  %v3352_v41 = vpop.eup %3351  ;;  %vm2322_vm5 = vcmp.eq.f32.partialorder %v5282_v18, 0.0  ;;  %vm2327_vm6 = vcmp.eq.f32.partialorder %v5287_v11, inf }
 0x3c4   : > { %2885 = vst [vmem:[%s4872_s20 + $0xc8] sm:$0xff] %v2821_v24  ;;  %v2310_v50 = vsel %vm2308_vm1, %v2309_v43, %v2307_v54  ;;  %v2314_v4 = vsel %vm2313_vm2, %v5254_v1, %v2312_v34  ;;  %v3354_v20 = vpop.eup %3353  ;;  %v2752_v35 = vmul.f32 %v3352_v41, %v5206_v0  ;;  %v1967_v16 = vpop.xlane.xlu1 %1966  ;;  %v2323_v0 = vand.u32 2147483648, %v5282_v18 }
 0x3c5   : > { %3369 = vrcp.f32 %v2559_v49  ;;  %v2560_v46 = vadd.f32 1e-08, %v2310_v50  ;;  %v2317_v48 = vsel %vm2315_vm3, %v2316_v3, %v2314_v4  ;;  %v2319_v62 = vmul.f32 %v3354_v20, %v5282_v18 }
 0x3c6   : > { %v2561_v55 = vadd.f32 1e-08, %v2317_v48  ;;  %3371 = vrsqrt.f32 %v5357_v33  ;;  %v3356_v13 = vpop.eup %3355  ;;  %v2822_v1 = vadd.f32 %v5331_v8, %v2752_v35  ;;  %v5368_v42 = vmul.f32 0.007874016, %v1967_v16 }
 0x3c7   : > { %3373 = vrcp.f32 %v2560_v46  ;;  %v3358_v25 = vpop.eup %3357  ;;  %v2753_v56 = vmul.f32 %v3356_v13, %v5210_v28  ;;  %v2321_v59 = vsel %vm2320_vm4, %v5282_v18, %v2319_v62  ;;  %v2330_v29 = vand.u32 2147483648, %v5287_v11  ;;  %v5381_v18 = vld [vmem:[%s5752_s5] ss:$0 sm:$0xff] }
 0x3c8   : > { %v1969_v30 = vpop.xlane.xlu0 %1968  ;;  %3375 = vrcp.f32 %v2561_v55  ;;  %2886 = vst [vmem:[%s4872_s20 + $0xd0] sm:$0xff] %v2822_v1  ;;  %v2324_v51 = vsel %vm2322_vm5, %v2323_v0, %v2321_v59  ;;  %v2326_v38 = vmul.f32 %v3358_v25, %v5287_v11  ;;  %v2692_v61 = vmul.f32 %v5381_v18, %v4661_v45 }
 0x3c9   : > { %v5373_v23 = vmul.f32 0.007874016, %v1969_v30  ;;  %v2823_v47 = vadd.f32 %v5331_v8, %v2753_v56  ;;  %v2562_v19 = vadd.f32 1e-08, %v2324_v51  ;;  %3377 = vrsqrt.f32 %v5368_v42  ;;  %v3360_v28 = vpop.eup %3359 }
 0x3ca   : > { %v2328_v32 = vsel %vm2327_vm6, %v5287_v11, %v2326_v38  ;;  %vm2329_vm7 = vcmp.eq.f32.partialorder %v5287_v11, 0.0  ;;  %v3362_v43 = vpop.eup %3361  ;;  %v2693_v22 = vmul.f32 %v5381_v18, %v4669_v15  ;;  %v2754_v24 = vmul.f32 %v3360_v28, %v5226_v60 }
 0x3cb   : > { %3379 = vrsqrt.f32 %v5373_v23  ;;  %2887 = vst [vmem:[%s4872_s20 + $0xd8] sm:$0xff] %v2823_v47  ;;  %v2331_v14 = vsel %vm2329_vm7, %v2330_v29, %v2328_v32  ;;  %v2694_v45 = vmul.f32 %v5381_v18, %v4676_v63  ;;  %v2333_v11 = vmul.f32 %v3362_v43, %v5318_v58 }
 0x3cc   : > { %v1971_v40 = vpop.xlane.xlu1 %1970  ;;  %3381 = vrcp.f32 %v2562_v19  ;;  %v2563_v49 = vadd.f32 1e-08, %v2331_v14  ;;  %vm2334_vm8 = vcmp.eq.f32.partialorder %v5318_v58, inf  ;;  %v2824_v3 = vadd.f32 %v5331_v8, %v2754_v24 }
 0x3cd   : > { %v3364_v34 = vpop.eup %3363  ;;  %v2337_v41 = vand.u32 2147483648, %v5318_v58  ;;  %v5399_v60 = vmul.f32 0.007874016, %v1971_v40  ;;  %v2335_v63 = vsel %vm2334_vm8, %v5318_v58, %v2333_v11  ;;  %vm2336_vm9 = vcmp.eq.f32.partialorder %v5318_v58, 0.0 }
 0x3ce   : > { %v3366_v54 = vpop.eup %3365  ;;  %v2755_v15 = vmul.f32 %v3364_v34, %v5230_v5  ;;  %3383 = vrcp.f32 %v2563_v49  ;;  %2888 = vst [vmem:[%s4872_s20 + $0xe0] sm:$0xff] %v2824_v3  ;;  %vm2341_vm10 = vcmp.eq.f32.partialorder %v5320_v26, inf  ;;  %v2344_v55 = vand.u32 2147483648, %v5320_v26 }
 0x3cf   : > { %v3368_v50 = vpop.eup %3367  ;;  %v2756_v4 = vmul.f32 %v3366_v54, %v2692_v61  ;;  %v2338_v35 = vsel %vm2336_vm9, %v2337_v41, %v2335_v63  ;;  %3385 = vrsqrt.f32 %v5399_v60  ;;  %v2695_v58 = vmul.f32 %v5381_v18, %v4683_v7 }
 0x3d0   : > { %v2825_v20 = vadd.f32 %v5331_v8, %v2755_v15  ;;  %v2340_v46 = vmul.f32 %v3368_v50, %v5320_v26  ;;  %v1973_v5 = vpop.xlane.xlu0 %1972  ;;  %v2564_v16 = vadd.f32 1e-08, %v2338_v35  ;;  %vm2343_vm11 = vcmp.eq.f32.partialorder %v5320_v26, 0.0 }
 0x3d1   : > { %v2826_v48 = vadd.f32 %v5331_v8, %v2756_v4  ;;  %v5415_v1 = vmul.f32 0.007874016, %v1973_v5  ;;  %v2696_v30 = vmul.f32 %v5381_v18, %v4688_v53  ;;  %vm2348_vm12 = vcmp.eq.f32.partialorder %v5357_v33, inf }
 0x3d2   : > { %v3370_v62 = vpop.eup %3369  ;;  %2889 = vst [vmem:[%s4872_s20 + $0xe8] sm:$0xff] %v2825_v20  ;;  %v2342_v13 = vsel %vm2341_vm10, %v5320_v26, %v2340_v46  ;;  %3387 = vrcp.f32 %v2564_v16  ;;  %vm2350_vm13 = vcmp.eq.f32.partialorder %v5357_v33, 0.0  ;;  %v2351_v53 = vand.u32 2147483648, %v5357_v33 }
 0x3d3   : > { %v3372_v0 = vpop.eup %3371  ;;  %2890 = vst [vmem:[%s4872_s20 + $0xf0] sm:$0xff] %v2826_v48  ;;  %v2757_v25 = vmul.f32 %v3370_v62, %v2693_v22  ;;  %v2345_v56 = vsel %vm2343_vm11, %v2344_v55, %v2342_v13  ;;  %3389 = vrsqrt.f32 %v5415_v1  ;;  %vm2355_vm14 = vcmp.eq.f32.partialorder %v5368_v42, inf }
 0x3d4   : > { %v1975_v59 = vpop.xlane.xlu1 %1974  ;;  %v3374_v51 = vpop.eup %3373  ;;  %v2565_v38 = vadd.f32 1e-08, %v2345_v56  ;;  %v2347_v7 = vmul.f32 %v3372_v0, %v5357_v33  ;;  %vm2357_vm15 = vcmp.eq.f32.partialorder %v5368_v42, 0.0  ;;  %v2358_v49 = vand.u32 2147483648, %v5368_v42 }
 0x3d5   : > { %v3376_v26 = vpop.eup %3375  ;;  %v2827_v47 = vadd.f32 %v5331_v8, %v2757_v25  ;;  %v2758_v19 = vmul.f32 %v3374_v51, %v2694_v45  ;;  %v5427_v61 = vmul.f32 0.007874016, %v1975_v59  ;;  %vm2362_vm0 = vcmp.eq.f32.partialorder %v5373_v23, inf }
 0x3d6   : > { %v2759_v29 = vmul.f32 %v3376_v26, %v2695_v58  ;;  %3391 = vrcp.f32 %v2565_v38  ;;  %v2349_v28 = vsel %vm2348_vm12, %v5357_v33, %v2347_v7  ;;  %v3378_v32 = vpop.eup %3377  ;;  %v2365_v54 = vand.u32 2147483648, %v5373_v23 }
 0x3d7   : > { %2891 = vst [vmem:[%s4872_s20 + $0xf8] sm:$0xff] %v2827_v47  ;;  %v2828_v40 = vadd.f32 %v5331_v8, %v2758_v19  ;;  %v2352_v43 = vsel %vm2350_vm13, %v2351_v53, %v2349_v28  ;;  %v2354_v34 = vmul.f32 %v3378_v32, %v5368_v42  ;;  %3393 = vrsqrt.f32 %v5427_v61 }
 0x3d8   : > { %v3380_v22 = vpop.eup %3379  ;;  %v2829_v24 = vadd.f32 %v5331_v8, %v2759_v29  ;;  %v2566_v14 = vadd.f32 1e-08, %v2352_v43  ;;  %v1977_v33 = vpop.xlane.xlu0 %1976  ;;  %v2697_v50 = vmul.f32 %v5381_v18, %v4693_v31  ;;  %vm2364_vm1 = vcmp.eq.f32.partialorder %v5373_v23, 0.0  ;;  %v5848_v43 = vld [vmem:[#allocation27_spill] sm:$0xff] }
 0x3d9   : > { %v3382_v45 = vpop.eup %3381  ;;  %2892 = vst [vmem:[%s4872_s20 + $0x100] sm:$0xff] %v2828_v40  ;;  %v2361_v11 = vmul.f32 %v3380_v22, %v5373_v23  ;;  %v2356_v15 = vsel %vm2355_vm14, %v5368_v42, %v2354_v34  ;;  %v5445_v41 = vmul.f32 0.007874016, %v1977_v33  ;;  %v2698_v31 = vmul.f32 %v5381_v18, %v4698_v27 }
 0x3da   : > { %2893 = vst [vmem:[%s4872_s20 + $0x108] sm:$0xff] %v2829_v24  ;;  %v2760_v3 = vmul.f32 %v3382_v45, %v2696_v30  ;;  %3395 = vrcp.f32 %v2566_v14  ;;  %v2359_v4 = vsel %vm2357_vm15, %v2358_v49, %v2356_v15  ;;  %vm2369_vm2 = vcmp.eq.f32.partialorder %v5399_v60, inf }
 0x3db   : > { %v2363_v63 = vsel %vm2362_vm0, %v5373_v23, %v2361_v11  ;;  %v3384_v20 = vpop.eup %3383  ;;  %v2567_v46 = vadd.f32 1e-08, %v2359_v4  ;;  %3397 = vrsqrt.f32 %v5445_v41  ;;  %v2372_v13 = vand.u32 2147483648, %v5399_v60 }
 0x3dc   : > { %v2830_v35 = vadd.f32 %v5331_v8, %v2760_v3  ;;  %v2366_v5 = vsel %vm2364_vm1, %v2365_v54, %v2363_v63  ;;  %v1979_v48 = vpop.xlane.xlu1 %1978  ;;  %v3386_v16 = vpop.eup %3385  ;;  %v2761_v55 = vmul.f32 %v3384_v20, %v2697_v50  ;;  %vm2371_vm3 = vcmp.eq.f32.partialorder %v5399_v60, 0.0  ;;  %v5849_v50 = vld [vmem:[#allocation28_spill] sm:$0xff] }
 0x3dd   : > { %v2568_v62 = vadd.f32 1e-08, %v2366_v5  ;;  %3399 = vrcp.f32 %v2567_v46  ;;  %v2368_v42 = vmul.f32 %v3386_v16, %v5399_v60  ;;  %v5459_v23 = vmul.f32 0.007874016, %v1979_v48  ;;  %v5850_v5 = vld [vmem:[#allocation29_spill] sm:$0xff] }
 0x3de   : > { %2894 = vst [vmem:[%s4872_s20 + $0x110] sm:$0xff] %v2830_v35  ;;  %v2831_v58 = vadd.f32 %v5331_v8, %v2761_v55  ;;  %v2699_v38 = vmul.f32 %v5381_v18, %v4703_v44  ;;  %vm2376_vm4 = vcmp.eq.f32.partialorder %v5415_v1, inf  ;;  %vm2378_vm5 = vcmp.eq.f32.partialorder %v5415_v1, 0.0 }
 0x3df   : > { %3401 = vrcp.f32 %v2568_v62  ;;  %v3388_v0 = vpop.eup %3387  ;;  %v2370_v30 = vsel %vm2369_vm2, %v5399_v60, %v2368_v42  ;;  %v2379_v60 = vand.u32 2147483648, %v5415_v1  ;;  %v2700_v22 = vmul.f32 %v5381_v18, %v5848_v43  ;;  %v5852_v43 = vld [vmem:[#allocation31_spill] sm:$0xff] }
 0x3e0   : > { %3403 = vrsqrt.f32 %v5459_v23  ;;  %v3390_v25 = vpop.eup %3389  ;;  %2895 = vst [vmem:[%s4872_s20 + $0x118] sm:$0xff] %v2831_v58  ;;  %v2762_v56 = vmul.f32 %v3388_v0, %v2698_v31  ;;  %v2373_v59 = vsel %vm2371_vm3, %v2372_v13, %v2370_v30  ;;  %vm2383_vm6 = vcmp.eq.f32.partialorder %v5427_v61, inf }
 0x3e1   : > { %v1981_v27 = vpop.xlane.xlu0 %1980  ;;  %v2569_v7 = vadd.f32 1e-08, %v2373_v59  ;;  %v2375_v26 = vmul.f32 %v3390_v25, %v5415_v1  ;;  %v2386_v45 = vand.u32 2147483648, %v5427_v61  ;;  %vm2385_vm7 = vcmp.eq.f32.partialorder %v5427_v61, 0.0 }
 0x3e2   : > { %v5468_v51 = vmul.f32 0.007874016, %v1981_v27  ;;  %v2832_v19 = vadd.f32 %v5331_v8, %v2762_v56  ;;  %v2701_v4 = vmul.f32 %v5381_v18, %v5849_v50  ;;  %v2702_v48 = vmul.f32 %v5381_v18, %v5850_v5 }
 0x3e3   : > { %v3392_v47 = vpop.eup %3391  ;;  %v2377_v29 = vsel %vm2376_vm4, %v5415_v1, %v2375_v26  ;;  %vm2390_vm8 = vcmp.eq.f32.partialorder %v5445_v41, inf  ;;  %vm2392_vm9 = vcmp.eq.f32.partialorder %v5445_v41, 0.0  ;;  %vm2397_vm10 = vcmp.eq.f32.partialorder %v5459_v23, inf }
 0x3e4   : > { %3405 = vrsqrt.f32 %v5468_v51  ;;  %v2763_v53 = vmul.f32 %v3392_v47, %v2699_v38  ;;  %v1983_v44 = vpop.xlane.xlu1 %1982  ;;  %v3394_v28 = vpop.eup %3393  ;;  %2896 = vst [vmem:[%s4872_s20 + $0x120] sm:$0xff] %v2832_v19  ;;  %v2380_v32 = vsel %vm2378_vm5, %v2379_v60, %v2377_v29  ;;  %v2400_v59 = vand.u32 2147483648, %v5459_v23  ;;  %v5851_v38 = vld [vmem:[#allocation30_spill] sm:$0xff] }
 0x3e5   : > { %3407 = vrcp.f32 %v2569_v7  ;;  %v5480_v40 = vmul.f32 0.007874016, %v1983_v44  ;;  %v2570_v14 = vadd.f32 1e-08, %v2380_v32  ;;  %v2382_v34 = vmul.f32 %v3394_v28, %v5427_v61 }
 0x3e6   : > { %v2833_v24 = vadd.f32 %v5331_v8, %v2763_v53  ;;  %v2703_v7 = vmul.f32 %v5381_v18, %v5851_v38  ;;  %vm2399_vm11 = vcmp.eq.f32.partialorder %v5459_v23, 0.0  ;;  %vm2404_vm12 = vcmp.eq.f32.partialorder %v5468_v51, inf }
 0x3e7   : > { %v3396_v33 = vpop.eup %3395  ;;  %3409 = vrsqrt.f32 %v5480_v40  ;;  %v2384_v49 = vsel %vm2383_vm6, %v5427_v61, %v2382_v34  ;;  %v2393_v61 = vand.u32 2147483648, %v5445_v41  ;;  %v2407_v44 = vand.u32 2147483648, %v5468_v51 }
 0x3e8   : > { %2897 = vst [vmem:[%s4872_s20 + $0x128] sm:$0xff] %v2833_v24  ;;  %v2764_v1 = vmul.f32 %v3396_v33, %v2700_v22  ;;  %3411 = vrcp.f32 %v2570_v14  ;;  %v3398_v54 = vpop.eup %3397  ;;  %v2387_v3 = vsel %vm2385_vm7, %v2386_v45, %v2384_v49  ;;  %vm2406_vm13 = vcmp.eq.f32.partialorder %v5468_v51, 0.0 }
 0x3e9   : > { %v1985_v11 = vpop.xlane.xlu0 %1984  ;;  %v2571_v20 = vadd.f32 1e-08, %v2387_v3  ;;  %v2389_v35 = vmul.f32 %v3398_v54, %v5445_v41  ;;  %vm2411_vm14 = vcmp.eq.f32.partialorder %v5480_v40, inf  ;;  %vm2413_vm15 = vcmp.eq.f32.partialorder %v5480_v40, 0.0 }
 0x3ea   : > { %v5492_v15 = vmul.f32 0.007874016, %v1985_v11  ;;  %v2834_v63 = vadd.f32 %v5331_v8, %v2764_v1  ;;  %v3400_v46 = vpop.eup %3399  ;;  %v2414_v1 = vand.u32 2147483648, %v5480_v40  ;;  %v5853_v11 = vld [vmem:[#allocation32_spill] sm:$0xff] }
 0x3eb   : > { %v2765_v55 = vmul.f32 %v3400_v46, %v2701_v4  ;;  %v2391_v62 = vsel %vm2390_vm8, %v5445_v41, %v2389_v35  ;;  %v2705_v54 = vmul.f32 %v5381_v18, %v5853_v11 }
 0x3ec   : > { %3413 = vrsqrt.f32 %v5492_v15  ;;  %v3402_v16 = vpop.eup %3401  ;;  %2898 = vst [vmem:[%s4872_s20 + $0x130] sm:$0xff] %v2834_v63  ;;  %v1987_v31 = vpop.xlane.xlu1 %1986  ;;  %v2394_v13 = vsel %vm2392_vm9, %v2393_v61, %v2391_v62  ;;  %vm2418_vm0 = vcmp.eq.f32.partialorder %v5492_v15, inf  ;;  %v2421_v5 = vand.u32 2147483648, %v5492_v15  ;;  %v5854_v62 = vld [vmem:[#allocation33_spill] sm:$0xff] }
 0x3ed   : > { %3415 = vrcp.f32 %v2571_v20  ;;  %v3404_v42 = vpop.eup %3403  ;;  %v2766_v58 = vmul.f32 %v3402_v16, %v2702_v48  ;;  %v5506_v0 = vmul.f32 0.007874016, %v1987_v31  ;;  %v2835_v30 = vadd.f32 %v5331_v8, %v2765_v55 }
 0x3ee   : > { %v2572_v27 = vadd.f32 1e-08, %v2394_v13  ;;  %v2396_v25 = vmul.f32 %v3404_v42, %v5459_v23  ;;  %vm2420_vm1 = vcmp.eq.f32.partialorder %v5492_v15, 0.0  ;;  %v2706_v31 = vmul.f32 %v5381_v18, %v5854_v62 }
 0x3ef   : > { %v2836_v56 = vadd.f32 %v5331_v8, %v2766_v58  ;;  %3417 = vrsqrt.f32 %v5506_v0  ;;  %2899 = vst [vmem:[%s4872_s20 + $0x138] sm:$0xff] %v2835_v30  ;;  %vm2425_vm2 = vcmp.eq.f32.partialorder %v5506_v0, inf  ;;  %vm2427_vm3 = vcmp.eq.f32.partialorder %v5506_v0, 0.0 }
 0x3f0   : > { %3419 = vrcp.f32 %v2572_v27  ;;  %v2398_v26 = vsel %vm2397_vm10, %v5459_v23, %v2396_v25  ;;  %v2704_v23 = vmul.f32 %v5381_v18, %v5852_v43 }
 0x3f1   : > { %v3406_v41 = vpop.eup %3405  ;;  %2900 = vst [vmem:[%s4872_s20 + $0x140] sm:$0xff] %v2836_v56  ;;  %v2401_v19 = vsel %vm2399_vm11, %v2400_v59, %v2398_v26  ;;  %v5855_v59 = vld [vmem:[#allocation34_spill] sm:$0xff] }
 0x3f2   : > { %v3408_v47 = vpop.eup %3407  ;;  %v2403_v60 = vmul.f32 %v3406_v41, %v5468_v51  ;;  %v2573_v29 = vadd.f32 1e-08, %v2401_v19  ;;  %v2707_v41 = vmul.f32 %v5381_v18, %v5855_v59 }
 0x3f3   : > { %v2767_v53 = vmul.f32 %v3408_v47, %v2703_v7 }
 0x3f4   : > { %v2405_v28 = vsel %vm2404_vm12, %v5468_v51, %v2403_v60  ;;  %v3410_v32 = vpop.eup %3409  ;;  %3421 = vrcp.f32 %v2573_v29  ;;  %v5856_v60 = vld [vmem:[#allocation35_spill] sm:$0xff] }
 0x3f5   : > { %v2837_v22 = vadd.f32 %v5331_v8, %v2767_v53  ;;  %v2408_v24 = vsel %vm2406_vm13, %v2407_v44, %v2405_v28  ;;  %v3412_v14 = vpop.eup %3411  ;;  %v2410_v33 = vmul.f32 %v3410_v32, %v5480_v40  ;;  %v2708_v53 = vmul.f32 %v5381_v18, %v5856_v60 }
 0x3f6   : > { %v2574_v34 = vadd.f32 1e-08, %v2408_v24  ;;  %v2768_v45 = vmul.f32 %v3412_v14, %v2704_v23 }
 0x3f7   : > { %2901 = vst [vmem:[%s4872_s20 + $0x148] sm:$0xff] %v2837_v22  ;;  %v2412_v51 = vsel %vm2411_vm14, %v5480_v40, %v2410_v33  ;;  %v1989_v35 = vpop.xlane.xlu0 %1988  ;;  %v5858_v33 = vld [vmem:[#allocation37_spill] sm:$0xff] }
 0x3f8   : > { %3423 = vrcp.f32 %v2574_v34  ;;  %v2838_v3 = vadd.f32 %v5331_v8, %v2768_v45  ;;  %v2415_v50 = vsel %vm2413_vm15, %v2414_v1, %v2412_v51  ;;  %v2066_v40 = vmul.f32 0.007874016, %v1989_v35 }
 0x3f9   : > { %v3414_v49 = vpop.eup %3413  ;;  %v2575_v63 = vadd.f32 1e-08, %v2415_v50  ;;  %v1991_v48 = vpop.xlane.xlu1 %1990  ;;  %v2710_v45 = vmul.f32 %v5381_v18, %v5858_v33 }
 0x3fa   : > { %v3416_v4 = vpop.eup %3415  ;;  %v2417_v20 = vmul.f32 %v3414_v49, %v5492_v15  ;;  %2902 = vst [vmem:[%s4872_s20 + $0x150] sm:$0xff] %v2838_v3  ;;  %v5543_v16 = vmul.f32 0.007874016, %v1991_v48  ;;  %vm2432_vm4 = vcmp.eq.f32.partialorder %v2066_v40, inf  ;;  %vm2434_vm5 = vcmp.eq.f32.partialorder %v2066_v40, 0.0 }
 0x3fb   : > { %v2769_v46 = vmul.f32 %v3416_v4, %v2705_v54  ;;  %3425 = vrcp.f32 %v2575_v63  ;;  %v2435_v54 = vand.u32 2147483648, %v2066_v40 }
 0x3fc   : > { %v2419_v61 = vsel %vm2418_vm0, %v5492_v15, %v2417_v20  ;;  %v3418_v55 = vpop.eup %3417  ;;  %3427 = vrsqrt.f32 %v2066_v40  ;;  %v2428_v15 = vand.u32 2147483648, %v5506_v0  ;;  %vm2439_vm6 = vcmp.eq.f32.partialorder %v5543_v16, inf }
 0x3fd   : > { %v2839_v42 = vadd.f32 %v5331_v8, %v2769_v46  ;;  %v2422_v58 = vsel %vm2420_vm1, %v2421_v5, %v2419_v61  ;;  %v3420_v13 = vpop.eup %3419  ;;  %v2424_v27 = vmul.f32 %v3418_v55, %v5506_v0  ;;  %3429 = vrsqrt.f32 %v5543_v16  ;;  %v5859_v61 = vld [vmem:[#allocation38_spill] sm:$0xff] }
 0x3fe   : > { %v2576_v30 = vadd.f32 1e-08, %v2422_v58  ;;  %v2770_v25 = vmul.f32 %v3420_v13, %v2706_v31  ;;  %v2442_v46 = vand.u32 2147483648, %v5543_v16  ;;  %vm2441_vm7 = vcmp.eq.f32.partialorder %v5543_v16, 0.0 }
 0x3ff   : > { %2903 = vst [vmem:[%s4872_s20 + $0x158] sm:$0xff] %v2839_v42  ;;  %v2426_v56 = vsel %vm2425_vm2, %v5506_v0, %v2424_v27  ;;  %v5857_v0 = vld [vmem:[#allocation36_spill] sm:$0xff] }
 0x400   : > { %3431 = vrcp.f32 %v2576_v30  ;;  %v2840_v38 = vadd.f32 %v5331_v8, %v2770_v25  ;;  %v2429_v7 = vsel %vm2427_vm3, %v2428_v15, %v2426_v56  ;;  %v2709_v32 = vmul.f32 %v5381_v18, %v5857_v0 }
 0x401   : > { %v3422_v26 = vpop.eup %3421  ;;  %v2577_v47 = vadd.f32 1e-08, %v2429_v7 }
 0x402   : > { %2904 = vst [vmem:[%s4872_s20 + $0x160] sm:$0xff] %v2840_v38  ;;  %v2771_v19 = vmul.f32 %v3422_v26, %v2707_v41 }
 0x403   : > { %3433 = vrcp.f32 %v2577_v47  ;;  %v5860_v47 = vld [vmem:[#allocation12_spill] sm:$0xff] }
 0x404   : > { %v2841_v44 = vadd.f32 %v5331_v8, %v2771_v19  ;;  %v2712_v19 = vmul.f32 %v5381_v18, %v5860_v47 }
 0x405   : > { %v3424_v29 = vpop.eup %3423 }
 0x406   : > { %v2772_v28 = vmul.f32 %v3424_v29, %v2708_v53  ;;  %2905 = vst [vmem:[%s4872_s20 + $0x168] sm:$0xff] %v2841_v44  ;;  %v1993_v23 = vpop.xlane.xlu0 %1992 }
 0x407   : > { %v2068_v24 = vmul.f32 0.007874016, %v1993_v23  ;;  %v1995_v51 = vpop.xlane.xlu1 %1994  ;;  %v5861_v23 = vld [vmem:[#allocation13_spill] sm:$0xff] }
 0x408   : > { %v2842_v43 = vadd.f32 %v5331_v8, %v2772_v28  ;;  %v3426_v22 = vpop.eup %3425  ;;  %v2069_v3 = vmul.f32 0.007874016, %v1995_v51 }
 0x409   : > { %v3428_v14 = vpop.eup %3427  ;;  %v2773_v34 = vmul.f32 %v3426_v22, %v2709_v32  ;;  %3435 = vrsqrt.f32 %v2068_v24  ;;  %vm2446_vm8 = vcmp.eq.f32.partialorder %v2068_v24, inf  ;;  %v2449_v59 = vand.u32 2147483648, %v2068_v24 }
 0x40a   : > { %2906 = vst [vmem:[%s4872_s20 + $0x170] sm:$0xff] %v2842_v43  ;;  %v2431_v1 = vmul.f32 %v3428_v14, %v2066_v40  ;;  %v3430_v49 = vpop.eup %3429  ;;  %3437 = vrsqrt.f32 %v2069_v3  ;;  %vm2448_vm9 = vcmp.eq.f32.partialorder %v2068_v24, 0.0  ;;  %vm2453_vm10 = vcmp.eq.f32.partialorder %v2069_v3, inf }
 0x40b   : > { %v2843_v11 = vadd.f32 %v5331_v8, %v2773_v34  ;;  %v2438_v63 = vmul.f32 %v3430_v49, %v5543_v16  ;;  %v2456_v44 = vand.u32 2147483648, %v2069_v3  ;;  %vm2455_vm11 = vcmp.eq.f32.partialorder %v2069_v3, 0.0 }
 0x40c   : > { %v2433_v4 = vsel %vm2432_vm4, %v2066_v40, %v2431_v1  ;;  %v2711_v40 = vmul.f32 %v5381_v18, %v5859_v61  ;;  %v2713_v22 = vmul.f32 %v5381_v18, %v5861_v23 }
 0x40d   : > { %v3432_v50 = vpop.eup %3431  ;;  %2907 = vst [vmem:[%s4872_s20 + $0x178] sm:$0xff] %v2843_v11  ;;  %v2436_v35 = vsel %vm2434_vm5, %v2435_v54, %v2433_v4  ;;  %v2440_v48 = vsel %vm2439_vm6, %v5543_v16, %v2438_v63 }
 0x40e   : > { %v2774_v20 = vmul.f32 %v3432_v50, %v2710_v45  ;;  %v2578_v5 = vadd.f32 1e-08, %v2436_v35  ;;  %v2443_v62 = vsel %vm2441_vm7, %v2442_v46, %v2440_v48 }
 0x40f   : > { %v2579_v42 = vadd.f32 1e-08, %v2443_v62  ;;  %v1997_v58 = vpop.xlane.xlu0 %1996 }
 0x410   : > { %v2844_v55 = vadd.f32 %v5331_v8, %v2774_v20  ;;  %v3434_v31 = vpop.eup %3433  ;;  %3439 = vrcp.f32 %v2578_v5  ;;  %v2070_v30 = vmul.f32 0.007874016, %v1997_v58  ;;  %v1999_v25 = vpop.xlane.xlu1 %1998 }
 0x411   : > { %v2775_v13 = vmul.f32 %v3434_v31, %v2711_v40  ;;  %3441 = vrcp.f32 %v2579_v42  ;;  %v2071_v16 = vmul.f32 0.007874016, %v1999_v25 }
 0x412   : > { %2908 = vst [vmem:[%s4872_s20 + $0x180] sm:$0xff] %v2844_v55  ;;  %3443 = vrsqrt.f32 %v2070_v30  ;;  %vm2460_vm12 = vcmp.eq.f32.partialorder %v2070_v30, inf  ;;  %v2463_v54 = vand.u32 2147483648, %v2070_v30  ;;  %vm2462_vm13 = vcmp.eq.f32.partialorder %v2070_v30, 0.0 }
 0x413   : > { %v2845_v27 = vadd.f32 %v5331_v8, %v2775_v13  ;;  %3445 = vrsqrt.f32 %v2071_v16  ;;  %vm2467_vm14 = vcmp.eq.f32.partialorder %v2071_v16, inf  ;;  %v2470_v48 = vand.u32 2147483648, %v2071_v16 }
 0x414   : > { %vm2469_vm15 = vcmp.eq.f32.partialorder %v2071_v16, 0.0  ;;  %v2714_v13 = vmul.f32 %v5381_v18, %v4966_v39  ;;  %v2715_v39 = vmul.f32 %v5381_v18, %v4980_v9 }
 0x415   : > { %2909 = vst [vmem:[%s4872_s20 + $0x188] sm:$0xff] %v2845_v27  ;;  %v2001_v41 = vpop.xlane.xlu0 %2000 }
 0x416   : > { %v3436_v15 = vpop.eup %3435  ;;  %v5582_v26 = vmul.f32 0.007874016, %v2001_v41 }
 0x417   : > { %v2445_v56 = vmul.f32 %v3436_v15, %v2068_v24  ;;  %v3438_v38 = vpop.eup %3437 }
 0x418   : > { %v2452_v53 = vmul.f32 %v3438_v38, %v2069_v3  ;;  %3447 = vrsqrt.f32 %v5582_v26  ;;  %vm2474_vm0 = vcmp.eq.f32.partialorder %v5582_v26, inf  ;;  %v2477_v25 = vand.u32 2147483648, %v5582_v26 }
 0x419   : > { %v2447_v7 = vsel %vm2446_vm8, %v2068_v24, %v2445_v56  ;;  %v2003_v28 = vpop.xlane.xlu1 %2002  ;;  %vm2476_vm1 = vcmp.eq.f32.partialorder %v5582_v26, 0.0 }
 0x41a   : > { %v2450_v60 = vsel %vm2448_vm9, %v2449_v59, %v2447_v7  ;;  %v2454_v32 = vsel %vm2453_vm10, %v2069_v3, %v2452_v53  ;;  %v5587_v43 = vmul.f32 0.007874016, %v2003_v28 }
 0x41b   : > { %v2580_v29 = vadd.f32 1e-08, %v2450_v60  ;;  %v2457_v14 = vsel %vm2455_vm11, %v2456_v44, %v2454_v32 }
 0x41c   : > { %v2581_v33 = vadd.f32 1e-08, %v2457_v14  ;;  %vm2481_vm2 = vcmp.eq.f32.partialorder %v5587_v43, inf  ;;  %v2484_v53 = vand.u32 2147483648, %v5587_v43  ;;  %vm2483_vm3 = vcmp.eq.f32.partialorder %v5587_v43, 0.0 }
 0x41d   : > { %v3440_v0 = vpop.eup %3439  ;;  %3449 = vrcp.f32 %v2580_v29 }
 0x41e   : > { %v2776_v24 = vmul.f32 %v3440_v0, %v2712_v19  ;;  %v3442_v34 = vpop.eup %3441  ;;  %3451 = vrsqrt.f32 %v5587_v43 }
 0x41f   : > { %v3444_v45 = vpop.eup %3443  ;;  %v2777_v51 = vmul.f32 %v3442_v34, %v2713_v22  ;;  %3453 = vrcp.f32 %v2581_v33  ;;  %v2716_v22 = vmul.f32 %v5381_v18, %v5009_v21 }
 0x420   : > { %v2846_v1 = vadd.f32 %v5331_v8, %v2776_v24  ;;  %v2459_v49 = vmul.f32 %v3444_v45, %v2070_v30  ;;  %v2005_v3 = vpop.xlane.xlu0 %2004  ;;  %v3446_v63 = vpop.eup %3445  ;;  %v2717_v24 = vmul.f32 %v5381_v18, %v5024_v36 }
 0x421   : > { %v2847_v11 = vadd.f32 %v5331_v8, %v2777_v51  ;;  %v5595_v4 = vmul.f32 0.007874016, %v2005_v3  ;;  %v2466_v5 = vmul.f32 %v3446_v63, %v2071_v16 }
 0x422   : > { %2910 = vst [vmem:[%s4872_s20 + $0x190] sm:$0xff] %v2846_v1  ;;  %v2461_v50 = vsel %vm2460_vm12, %v2070_v30, %v2459_v49  ;;  %v2007_v35 = vpop.xlane.xlu1 %2006 }
 0x423   : > { %2911 = vst [vmem:[%s4872_s20 + $0x198] sm:$0xff] %v2847_v11  ;;  %v2464_v20 = vsel %vm2462_vm13, %v2463_v54, %v2461_v50  ;;  %3455 = vrsqrt.f32 %v5595_v4  ;;  %v5599_v61 = vmul.f32 0.007874016, %v2007_v35  ;;  %v2468_v55 = vsel %vm2467_vm14, %v2071_v16, %v2466_v5 }
 0x424   : > { %v2582_v46 = vadd.f32 1e-08, %v2464_v20  ;;  %v2471_v31 = vsel %vm2469_vm15, %v2470_v48, %v2468_v55  ;;  %vm2488_vm4 = vcmp.eq.f32.partialorder %v5595_v4, inf  ;;  %vm2490_vm5 = vcmp.eq.f32.partialorder %v5595_v4, 0.0 }
 0x425   : > { %v2009_v40 = vpop.xlane.xlu0 %2008  ;;  %v3448_v42 = vpop.eup %3447  ;;  %v2583_v58 = vadd.f32 1e-08, %v2471_v31  ;;  %v2491_v33 = vand.u32 2147483648, %v5595_v4  ;;  %vm2495_vm6 = vcmp.eq.f32.partialorder %v5599_v61, inf  ;;  %vm2497_vm7 = vcmp.eq.f32.partialorder %v5599_v61, 0.0 }
 0x426   : > { %3457 = vrcp.f32 %v2582_v46  ;;  %v5601_v62 = vmul.f32 0.007874016, %v2009_v40  ;;  %v2473_v30 = vmul.f32 %v3448_v42, %v5582_v26  ;;  %v2498_v54 = vand.u32 2147483648, %v5599_v61 }
 0x427   : > { %3459 = vrsqrt.f32 %v5599_v61 }
 0x428   : > { %3461 = vrsqrt.f32 %v5601_v62  ;;  %v2475_v59 = vsel %vm2474_vm0, %v5582_v26, %v2473_v30  ;;  %vm2502_vm8 = vcmp.eq.f32.partialorder %v5601_v62, inf  ;;  %vm2504_vm9 = vcmp.eq.f32.partialorder %v5601_v62, 0.0 }
 0x429   : > { %3463 = vrcp.f32 %v2583_v58  ;;  %v2011_v16 = vpop.xlane.xlu1 %2010  ;;  %v2478_v38 = vsel %vm2476_vm1, %v2477_v25, %v2475_v59  ;;  %v2505_v35 = vand.u32 2147483648, %v5601_v62 }
 0x42a   : > { %v3450_v27 = vpop.eup %3449  ;;  %v5612_v41 = vmul.f32 0.007874016, %v2011_v16  ;;  %v2584_v60 = vadd.f32 1e-08, %v2478_v38  ;;  %v2719_v16 = vmul.f32 %v5381_v18, %v5070_v57 }
 0x42b   : > { %v3452_v15 = vpop.eup %3451  ;;  %v2778_v56 = vmul.f32 %v3450_v27, %v2714_v13 }
 0x42c   : > { %v2480_v7 = vmul.f32 %v3452_v15, %v5587_v43  ;;  %v3454_v47 = vpop.eup %3453  ;;  %3465 = vrsqrt.f32 %v5612_v41  ;;  %vm2509_vm10 = vcmp.eq.f32.partialorder %v5612_v41, inf  ;;  %vm2511_vm11 = vcmp.eq.f32.partialorder %v5612_v41, 0.0 }
 0x42d   : > { %v2848_v19 = vadd.f32 %v5331_v8, %v2778_v56  ;;  %v2779_v26 = vmul.f32 %v3454_v47, %v2715_v39  ;;  %3467 = vrcp.f32 %v2584_v60  ;;  %v3554_v47 = vld [vmem:[%s5753_s6] ss:$0 sm:$0xff] }
 0x42e   : > { %v2482_v29 = vsel %vm2481_vm2, %v5587_v43, %v2480_v7 }
 0x42f   : > { %2912 = vst [vmem:[%s4872_s20 + $0x1a0] sm:$0xff] %v2848_v19  ;;  %v2485_v9 = vsel %vm2483_vm3, %v2484_v53, %v2482_v29  ;;  %v2849_v44 = vadd.f32 %v5331_v8, %v2779_v26  ;;  %v2013_v0 = vpop.xlane.xlu0 %2012 }
 0x430   : > { %v2585_v28 = vadd.f32 1e-08, %v2485_v9  ;;  %v3456_v32 = vpop.eup %3455  ;;  %v5625_v23 = vmul.f32 0.007874016, %v2013_v0 }
 0x431   : > { %2913 = vst [vmem:[%s4872_s20 + $0x1a8] sm:$0xff] %v2849_v44  ;;  %v2487_v43 = vmul.f32 %v3456_v32, %v5595_v4  ;;  %v2015_v14 = vpop.xlane.xlu1 %2014 }
 0x432   : > { %3469 = vrcp.f32 %v2585_v28  ;;  %v5639_v36 = vmul.f32 0.007874016, %v2015_v14  ;;  %vm2516_vm12 = vcmp.eq.f32.partialorder %v5625_v23, inf  ;;  %v2519_v57 = vand.u32 2147483648, %v5625_v23 }
 0x433   : > { %v3458_v34 = vpop.eup %3457  ;;  %3471 = vrsqrt.f32 %v5625_v23  ;;  %v2489_v21 = vsel %vm2488_vm4, %v5595_v4, %v2487_v43  ;;  %vm2518_vm13 = vcmp.eq.f32.partialorder %v5625_v23, 0.0 }
 0x434   : > { %v3460_v45 = vpop.eup %3459  ;;  %v2780_v1 = vmul.f32 %v3458_v34, %v2716_v22  ;;  %v2492_v49 = vsel %vm2490_vm5, %v2491_v33, %v2489_v21  ;;  %3473 = vrsqrt.f32 %v5639_v36  ;;  %vm2523_vm14 = vcmp.eq.f32.partialorder %v5639_v36, inf }
 0x435   : > { %v3462_v51 = vpop.eup %3461  ;;  %v2494_v11 = vmul.f32 %v3460_v45, %v5599_v61  ;;  %v2586_v50 = vadd.f32 1e-08, %v2492_v49  ;;  %v2526_v44 = vand.u32 2147483648, %v5639_v36  ;;  %vm2525_vm15 = vcmp.eq.f32.partialorder %v5639_v36, 0.0 }
 0x436   : > { %v2850_v3 = vadd.f32 %v5331_v8, %v2780_v1  ;;  %v2501_v63 = vmul.f32 %v3462_v51, %v5601_v62  ;;  %v3464_v4 = vpop.eup %3463  ;;  %v2722_v22 = vmul.f32 %v5381_v18, %v5137_v37  ;;  %v2724_v51 = vmul.f32 %v5381_v18, %v5183_v12 }
 0x437   : > { %v2496_v20 = vsel %vm2495_vm6, %v5599_v61, %v2494_v11  ;;  %v2781_v46 = vmul.f32 %v3464_v4, %v2717_v24  ;;  %3475 = vrcp.f32 %v2586_v50  ;;  %v2718_v61 = vmul.f32 %v5381_v18, %v5053_v10 }
 0x438   : > { %2914 = vst [vmem:[%s4872_s20 + $0x1b0] sm:$0xff] %v2850_v3  ;;  %v2499_v5 = vsel %vm2497_vm7, %v2498_v54, %v2496_v20  ;;  %v2503_v48 = vsel %vm2502_vm8, %v5601_v62, %v2501_v63  ;;  %v2512_v62 = vand.u32 2147483648, %v5612_v41  ;;  %v2725_v54 = vmul.f32 %v5381_v18, %v5195_v17 }
 0x439   : > { %v2587_v40 = vadd.f32 1e-08, %v2499_v5  ;;  %v2506_v55 = vsel %vm2504_vm9, %v2505_v35, %v2503_v48  ;;  %v3466_v31 = vpop.eup %3465  ;;  %v2851_v42 = vadd.f32 %v5331_v8, %v2781_v46 }
 0x43a   : > { %v2588_v58 = vadd.f32 1e-08, %v2506_v55  ;;  %v2508_v13 = vmul.f32 %v3466_v31, %v5612_v41  ;;  %v3468_v30 = vpop.eup %3467 }
 0x43b   : > { %3477 = vrcp.f32 %v2587_v40  ;;  %2915 = vst [vmem:[%s4872_s20 + $0x1b8] sm:$0xff] %v2851_v42  ;;  %v2782_v27 = vmul.f32 %v3468_v30, %v2718_v61 }
 0x43c   : > { %3479 = vrcp.f32 %v2588_v58  ;;  %v2510_v25 = vsel %vm2509_vm10, %v5612_v41, %v2508_v13 }
 0x43d   : > { %v2513_v10 = vsel %vm2511_vm11, %v2512_v62, %v2510_v25  ;;  %v2852_v56 = vadd.f32 %v5331_v8, %v2782_v27  ;;  %v2720_v8 = vmul.f32 %v5381_v18, %v5102_v52  ;;  %v2721_v52 = vmul.f32 %v5381_v18, %v5115_v2 }
 0x43e   : > { %v2589_v59 = vadd.f32 1e-08, %v2513_v10  ;;  %v2723_v2 = vmul.f32 %v5381_v18, %v5155_v6 }
 0x43f   : > { %v3470_v15 = vpop.eup %3469  ;;  %2916 = vst [vmem:[%s4872_s20 + $0x1c0] sm:$0xff] %v2852_v56 }
 0x440   : > { %v3472_v39 = vpop.eup %3471  ;;  %v2783_v38 = vmul.f32 %v3470_v15, %v2719_v16  ;;  %3481 = vrcp.f32 %v2589_v59 }
 0x441   : > { %v2515_v7 = vmul.f32 %v3472_v39, %v5625_v23  ;;  %v3474_v19 = vpop.eup %3473 }
 0x442   : > { %v2853_v41 = vadd.f32 %v3554_v47, %v2783_v38  ;;  %v2522_v26 = vmul.f32 %v3474_v19, %v5639_v36 }
 0x443   : > { %v2517_v60 = vsel %vm2516_vm12, %v5625_v23, %v2515_v7 }
 0x444   : > { %2917 = vst [vmem:[%s4872_s20 + $0x1c8] sm:$0xff] %v2853_v41  ;;  %v2520_v53 = vsel %vm2518_vm13, %v2519_v57, %v2517_v60  ;;  %v3476_v29 = vpop.eup %3475  ;;  %v2524_v0 = vsel %vm2523_vm14, %v5639_v36, %v2522_v26 }
 0x445   : > { %v2590_v9 = vadd.f32 1e-08, %v2520_v53  ;;  %v2784_v28 = vmul.f32 %v3476_v29, %v2720_v8  ;;  %v2527_v32 = vsel %vm2525_vm15, %v2526_v44, %v2524_v0 }
 0x446   : > { %v2591_v43 = vadd.f32 1e-08, %v2527_v32 }
 0x447   : > { %3483 = vrcp.f32 %v2590_v9  ;;  %v2854_v24 = vadd.f32 %v3554_v47, %v2784_v28 }
 0x448   : > { %v3478_v23 = vpop.eup %3477  ;;  %3485 = vrcp.f32 %v2591_v43 }
 0x449   : > { %v3480_v14 = vpop.eup %3479  ;;  %v2785_v34 = vmul.f32 %v3478_v23, %v2721_v52  ;;  %2918 = vst [vmem:[%s4872_s20 + $0x1d0] sm:$0xff] %v2854_v24 }
 0x44a   : > { %v2786_v33 = vmul.f32 %v3480_v14, %v2722_v22 }
 0x44b   : > { %v2855_v45 = vadd.f32 %v3554_v47, %v2785_v34 }
 0x44c   : > { %v2856_v1 = vadd.f32 %v3554_v47, %v2786_v33 }
 0x44d   : > { %2919 = vst [vmem:[%s4872_s20 + $0x1d8] sm:$0xff] %v2855_v45  ;;  %v3482_v21 = vpop.eup %3481 }
 0x44e   : > { %2920 = vst [vmem:[%s4872_s20 + $0x1e0] sm:$0xff] %v2856_v1  ;;  %v2787_v37 = vmul.f32 %v3482_v21, %v2723_v2 }
 0x450   : > { %v2857_v36 = vadd.f32 %v3554_v47, %v2787_v37 }
 0x452   : > { %2921 = vst [vmem:[%s4872_s20 + $0x1e8] sm:$0xff] %v2857_v36 }
 0x454   : > { %v3484_v49 = vpop.eup %3483 }
 0x455   : > { %v2788_v11 = vmul.f32 %v3484_v49, %v2724_v51  ;;  %v3486_v6 = vpop.eup %3485 }
 0x456   : > { %v2789_v50 = vmul.f32 %v3486_v6, %v2725_v54 }
 0x457   : > { %v2858_v3 = vadd.f32 %v3554_v47, %v2788_v11 }
 0x458   : > { %v2859_v12 = vadd.f32 %v3554_v47, %v2789_v50 }
 0x459   : > { %2922 = vst [vmem:[%s4872_s20 + $0x1f0] sm:$0xff] %v2858_v3 }
 0x45a   : > { %2923 = vst [vmem:[%s4872_s20 + $0x1f8] sm:$0xff] %v2859_v12 }
 0x45b   : > { %3648 = shalt.err (!%p3645_p5)
}
 0x45c   : > { %s3649_s20 = scalar_lea.hbm %s5702_s12, 8192  ;;  %s3653_s9 = scalar_lea.hbm %s5754_s7, 32768 }
 0x45d   : > { %p3650_p10 = scmp.ne.s32.totalorder %s5702_s12, %s3649_s20  ;;  %p3654_p4 = scmp.lt.s32.totalorder %s5702_s12, %s5754_s7 }
 0x45e   : > { %p3655_p6 = scmp.lt.s32.totalorder %s3653_s9, %s3649_s20 }
 0x45f   : > { %p3651_p9 = pnand %p3650_p10, %p5862_p2 }
 0x460   : > { %p3656_p8 = por %p3655_p6, %p3654_p4 }
 0x461   : > { %p3652_p1 = pneg %p3651_p9 }
 0x463   : > { %p3657_p0 = pnand %p3656_p8, %p3652_p1 }
 0x465   : > { %3660 = shalt.err (!%p3657_p0)
}
 0x466   : > { %s3714_s21 = smov 128   ;;  %s3715_s23 = smov 8  }
 0x467   : > { %3127 = dma.vmem_to_hbm [thread:$0]  (%p5862_p2), %s5704_s13, 8192, %s5702_s12, %s2925_s14, %s3714_s21, %s3714_s21, %s3715_s23  }
 0x468 PF: > { %p3149_p7 = scmp.ge.s32.totalorder %s3703_s27, 2  ;;  %s2953_s16 = sand.u32 1, %s3691_s24  }
 0x469   : > { %p5863_p11 = scmp.ne.s32.totalorder %s5792_s8, 0  ;;  %s2954_s28 = scalar_lea.sflag [#allocation4], %s2953_s16 }
 0x46b   : > { %p3141_p12 = pnand %p3149_p7, %p5863_p11 }
 0x46d   : > { %p3142_p13 = pneg %p3141_p12 }
 0x46f   : > { %3686 = dma.done.wait (%p3142_p13), %s2954_s28, 8192  }
 0x470   : > { %3688 = vsyncadd (%p3142_p13), %s2954_s28, 4294959104  ;;  %p21_p3 = scmp.ge.s32.totalorder %s3830_s10, 6   ;;  %s5864_s24 = smov %s3695_s25 }
 0x471   : > { %s5865_s25 = smov %s3699_s26  ;;  %s5866_s26 = smov %s3839_s15 }
 0x472   : > { %s5867_s27 = smov %s3830_s10  ;;  %23 = sbr.rel (!%p21_p3) target bundleno = 8 (0x8), region = 101 }
 0x477   :  { %2959 = vsyncpa [#allocation3], 1 }
 0x478   :  { %2961 = vsyncpa [#allocation3 + $0x1], 1 }
 0x479   :  { %2962 = vsyncpa [#allocation6], 1 }
 0x47a   :  { %2963 = vsyncpa [#allocation4], 1 }
 0x47b   :  { %2965 = vsyncpa [#allocation4 + $0x1], 1 }

</bundles_post_ra>
